<compile_context>
chip_gen: v7x
topology: tpu7x:2x2x1
jax: 0.10.0
libtpu: 0.0.40
codegen_flags: <defaults>
</compile_context>

<pallas_src>
import functools
import math

import jax
import jax.numpy as jnp
from jax.experimental import pallas as pl
from jax.experimental.pallas import tpu as pltpu

_BN_EPS = 1e-5
_LANE = 128


def _round_up(x, m):
    return (x + m - 1) // m * m


# ----------------------------------------------------------------------------
# Fused NormBlock kernel: one batch element per grid step, everything in VMEM.
# ----------------------------------------------------------------------------
def _norm_block_kernel(*refs, k, stride, ho, wo, use_res, use_se):
    if use_se:
        (x_ref, w_ref, b_ref, w1_ref, b1_ref, w2_ref, b2_ref, o_ref, xp_ref) = refs
    else:
        (x_ref, w_ref, b_ref, o_ref, xp_ref) = refs

    h, w_in, cin = x_ref.shape
    cout_p = o_ref.shape[-1]                 # padded (lane-dense) channel count
    hp, wp, _ = xp_ref.shape
    pad = k // 2
    m = ho * wo
    cdt = xp_ref.dtype                       # MXU dtype (bf16 by default)

    # --- zero only the pad ring (interior is fully overwritten every step) -----------------
    xp_ref[pl.ds(0, pad), :, :] = jnp.zeros((pad, wp, cin), cdt)
    xp_ref[pl.ds(pad + h, pad), :, :] = jnp.zeros((pad, wp, cin), cdt)
    xp_ref[pl.ds(pad, h), pl.ds(0, pad), :] = jnp.zeros((h, pad, cin), cdt)
    xp_ref[pl.ds(pad, h), pl.ds(pad + w_in, pad), :] = jnp.zeros((h, pad, cin), cdt)

    # --- fill the interior once; x already arrives in the MXU dtype (no per-tap casts) -----
    xv = x_ref[...]
    xp_ref[pl.ds(pad, h), pl.ds(pad, w_in), :] = xv

    # --- in-VMEM im2col: ONE deep-K MXU matmul (K = k*k*cin) instead of k*k shallow ones ----
    taps = []
    for kh in range(k):
        for kw in range(k):
            if stride == 1:
                win = xp_ref[pl.ds(kh, ho), pl.ds(kw, wo), :]
            else:
                win = xp_ref[pl.ds(kh, ho, stride), pl.ds(kw, wo, stride), :]
            taps.append(win.reshape(m, cin))
    lhs = jnp.concatenate(taps, axis=-1) if len(taps) > 1 else taps[0]
    acc = jnp.dot(lhs, w_ref[...], preferred_element_type=jnp.float32)   # (m, cout_p) f32

    # --- folded-BN bias + ReLU epilogue (f32) -----------------------------------------------
    y = jnp.maximum(acc + b_ref[...], 0.0)

    if use_res:   # stride == 1 and cin == cout: shortcut is the conv input itself
        res = xv.reshape(m, cin).astype(jnp.float32)
        if cout_p > cin:
            res = jnp.concatenate(
                [res, jnp.zeros((m, cout_p - cin), jnp.float32)], axis=-1)
        y = y + res

    if use_se:    # fused squeeze-excite: pool + two tiny matmuls + sigmoid gate
        pooled = jnp.mean(y, axis=0, keepdims=True)                        # (1, cout_p)
        hid = jnp.dot(pooled, w1_ref[...], preferred_element_type=jnp.float32)
        hid = jnp.maximum(hid + b1_ref[...], 0.0)                          # (1, mid)
        z = jnp.dot(hid, w2_ref[...], preferred_element_type=jnp.float32) + b2_ref[...]
        gate = 1.0 / (1.0 + jnp.exp(-z))                                   # (1, cout_p)
        y = y * gate

    o_ref[...] = y.reshape(ho, wo, cout_p).astype(o_ref.dtype)


# ----------------------------------------------------------------------------
# One-time parameter prepack (hoisted out of the per-forward jitted path).
# ----------------------------------------------------------------------------
def prepare_norm_block_params(params, *, kernel_size=3, se=False,
                              mxu_dtype=jnp.bfloat16, bn_eps=_BN_EPS):
    """Fold BN into the conv weight/bias, reshape to (k*k*cin, cout_p), pad cout to 128.

    mxu_dtype=jnp.float32 is the exact-precision escape hatch for layers where the folded
    BN scale is large (small bn_var) and bf16 weight rounding would be amplified.
    Returns (w_mat, bias, se_params_or_None, cout).
    """
    k = kernel_size
    conv_w = jnp.asarray(params["conv_w"], jnp.float32)        # (cout, cin, k, k), no conv bias
    cout, cin = int(conv_w.shape[0]), int(conv_w.shape[1])
    cout_p = _round_up(cout, _LANE)

    scale = params["bn_gamma"] * jax.lax.rsqrt(params["bn_var"] + bn_eps)
    bias = params["bn_beta"] - params["bn_mean"] * scale

    w = (jnp.transpose(conv_w, (2, 3, 1, 0)) * scale).reshape(k * k * cin, cout)
    w = jnp.pad(w, ((0, 0), (0, cout_p - cout))).astype(mxu_dtype)          # (k*k*cin, cout_p)
    b = jnp.pad(bias, (0, cout_p - cout)).reshape(1, cout_p).astype(jnp.float32)

    se_params = None
    if se:
        mid = int(params["se_w1"].shape[0])
        w1 = jnp.pad(params["se_w1"].reshape(mid, cout).T,
                     ((0, cout_p - cout), (0, 0))).astype(jnp.float32)      # (cout_p, mid)
        b1 = params["se_b1"].reshape(1, mid).astype(jnp.float32)
        w2 = jnp.pad(params["se_w2"].reshape(cout, mid).T,
                     ((0, 0), (0, cout_p - cout))).astype(jnp.float32)      # (mid, cout_p)
        b2 = jnp.pad(params["se_b2"], (0, cout_p - cout)).reshape(1, cout_p).astype(jnp.float32)
        se_params = (w1, b1, w2, b2)
    return w, b, se_params, cout


# ----------------------------------------------------------------------------
# NHWC forward (the jitted path): layout transposes are NOT done per call here.
# ----------------------------------------------------------------------------
def norm_block_nhwc(x, w_mat, bias, se_params=None, *, kernel_size=3, stride=1,
                    cout=None, out_dtype=jnp.float32):
    """x: (N, H, W, Cin); w_mat/bias/se_params from prepare_norm_block_params."""
    if kernel_size == 1:
        # TODO(synk): kernel==1 makes self.op an identity nn.Sequential(); trivial passthrough, not lowered here.
        raise NotImplementedError("kernel_size == 1 (identity op) is not lowered to Pallas")
    assert stride in (1, 2, 4)

    n, h, w, cin = x.shape
    k = kernel_size
    pad = k // 2
    kkcin, cout_p = w_mat.shape
    assert kkcin == k * k * cin, (kkcin, k, cin)
    cout = cout_p if cout is None else cout
    ho = (h + 2 * pad - k) // stride + 1
    wo = (w + 2 * pad - k) // stride + 1
    use_res = (stride == 1) and (cin == cout)
    use_se = se_params is not None

    act_dtype = w_mat.dtype                         # bf16 by default, f32 escape hatch
    x = x.astype(act_dtype)                         # bf16 activations from HBM (half the DMA)

    inputs = [x, w_mat, bias]
    in_specs = [
        pl.BlockSpec((None, h, w, cin), lambda nb: (nb, 0, 0, 0)),
        pl.BlockSpec((kkcin, cout_p), lambda nb: (0, 0)),
        pl.BlockSpec((1, cout_p), lambda nb: (0, 0)),
    ]
    if use_se:
        w1, b1, w2, b2 = se_params
        mid = w1.shape[1]
        inputs += [w1, b1, w2, b2]
        in_specs += [
            pl.BlockSpec((cout_p, mid), lambda nb: (0, 0)),
            pl.BlockSpec((1, mid), lambda nb: (0, 0)),
            pl.BlockSpec((mid, cout_p), lambda nb: (0, 0)),
            pl.BlockSpec((1, cout_p), lambda nb: (0, 0)),
        ]

    kernel = functools.partial(
        _norm_block_kernel, k=k, stride=stride, ho=ho, wo=wo,
        use_res=use_res, use_se=use_se)

    # Explicit VMEM budget (>= v5e's 16 MiB default scoped limit, generous margin).
    ab = jnp.dtype(act_dtype).itemsize
    ob = jnp.dtype(out_dtype).itemsize
    est = (2 * h * w * cin * ab                       # x block (double-buffered)
           + 2 * ho * wo * cout_p * ob                # out block (double-buffered)
           + 2 * (kkcin + 4) * cout_p * 4             # weights + bias (conservative)
           + (h + 2 * pad) * (w + 2 * pad) * cin * ab         # halo scratch
           + ho * wo * (kkcin * ab + 2 * cout_p * 4))          # live im2col + acc/epilogue
    vmem_limit = int(min(128 * 1024 * 1024, max(32 * 1024 * 1024, 2 * est)))

    y = pl.pallas_call(
        kernel,
        out_shape=jax.ShapeDtypeStruct((n, ho, wo, cout_p), out_dtype),
        grid=(n,),
        in_specs=in_specs,
        out_specs=pl.BlockSpec((None, ho, wo, cout_p), lambda nb: (nb, 0, 0, 0)),
        scratch_shapes=[pltpu.VMEM((h + 2 * pad, w + 2 * pad, cin), act_dtype)],
        compiler_params=pltpu.CompilerParams(
            dimension_semantics=("parallel",),        # megacore splits the batch
            vmem_limit_bytes=vmem_limit),
    )(*inputs)

    if cout != cout_p:
        y = y[..., :cout]                             # drop the lane-padding channels
    return y


def norm_block_nchw(x_nchw, w_mat, bias, se_params=None, **kw):
    """Compatibility shim for NCHW callers (PyTorch parity). Prefer the NHWC entry point."""
    x = jnp.transpose(x_nchw, (0, 2, 3, 1))
    y = norm_block_nhwc(x, w_mat, bias, se_params, **kw)
    return jnp.transpose(y, (0, 3, 1, 2))


# ----------------------------------------------------------------------------
# Pure-JAX reference (exact PyTorch NormBlock semantics, eval mode) for validation.
# ----------------------------------------------------------------------------
def norm_block_ref(x_nchw, params, *, stride=1, kernel_size=3, se=False):
    k = kernel_size
    pad = k // 2
    w = params["conv_w"]
    cout, cin = w.shape[0], w.shape[1]
    y = jax.lax.conv_general_dilated(
        x_nchw, w, window_strides=(stride, stride),
        padding=((pad, pad), (pad, pad)),
        dimension_numbers=("NCHW", "OIHW", "NCHW"),
        precision=jax.lax.Precision.HIGHEST)
    scale = params["bn_gamma"] / jnp.sqrt(params["bn_var"] + _BN_EPS)
    bias = params["bn_beta"] - params["bn_mean"] * scale
    y = jnp.maximum(y * scale[None, :, None, None] + bias[None, :, None, None], 0.0)
    if stride == 1 and cin == cout:
        y = y + x_nchw
    if se:
        mid = params["se_w1"].shape[0]
        pooled = jnp.mean(y, axis=(2, 3))                                   # (N, C)
        hid = jnp.maximum(pooled @ params["se_w1"].reshape(mid, cout).T
                          + params["se_b1"], 0.0)
        z = hid @ params["se_w2"].reshape(cout, mid).T + params["se_b2"]
        y = y * jax.nn.sigmoid(z)[:, :, None, None]
    return y


# ----------------------------------------------------------------------------
# Deterministic synthetic parameters matching the PyTorch module's shapes.
# ----------------------------------------------------------------------------
def init_params(key, cin, cout, kernel=3):
    k = kernel
    keys = jax.random.split(key, 9)
    conv_w = jax.random.normal(keys[0], (cout, cin, k, k), jnp.float32) * math.sqrt(
        2.0 / (cout * k * k))                         # kaiming_normal_, fan_out, relu
    p = dict(
        conv_w=conv_w,
        bn_gamma=1.0 + 0.1 * jax.random.normal(keys[1], (cout,), jnp.float32),
        bn_beta=0.1 * jax.random.normal(keys[2], (cout,), jnp.float32),
        bn_mean=0.1 * jax.random.normal(keys[3], (cout,), jnp.float32),
        bn_var=1.0 + 0.1 * jnp.abs(jax.random.normal(keys[4], (cout,), jnp.float32)),
    )
    mid = max(cout // 4, 8)
    p["se_w1"] = 0.1 * jax.random.normal(keys[5], (mid, cout, 1, 1), jnp.float32)
    p["se_b1"] = 0.05 * jax.random.normal(keys[6], (mid,), jnp.float32)
    p["se_w2"] = 0.1 * jax.random.normal(keys[7], (cout, mid, 1, 1), jnp.float32)
    p["se_b2"] = 0.05 * jax.random.normal(keys[8], (cout,), jnp.float32)
    return p


if __name__ == "__main__":
    key = jax.random.PRNGKey(0)
    kx, kp, kp2 = jax.random.split(key, 3)
    n, c, hw = 2, 32, 16                        # NormBlock(32, 32, expansion, stride=1, kernel=3)
    x_nchw = jax.random.normal(kx, (n, c, hw, hw), jnp.float32)
    x_nhwc = jnp.transpose(x_nchw, (0, 2, 3, 1))   # model runs NHWC end-to-end
    params = init_params(kp, cin=c, cout=c, kernel=3)

    fwd = jax.jit(norm_block_nhwc,
                  static_argnames=("kernel_size", "stride", "cout", "out_dtype"))

    # 1) stride=1, Cin==Cout, bf16 MXU path: conv + folded BN + ReLU + residual, one pallas_call.
    w_mat, b_vec, _, cout = prepare_norm_block_params(params, kernel_size=3, se=False)
    y1 = jax.block_until_ready(fwd(x_nhwc, w_mat, b_vec, None,
                                   kernel_size=3, stride=1, cout=cout))
    r1 = jnp.transpose(norm_block_ref(x_nchw, params, stride=1, kernel_size=3, se=False),
                       (0, 2, 3, 1))
    assert y1.shape == (n, hw, hw, c), y1.shape
    assert bool(jnp.all(jnp.isfinite(y1)))
    assert bool(jnp.allclose(y1, r1, rtol=1e-1, atol=1e-1))   # bf16 MXU operands, f32 accum

    # 2) same block with the SEModule fused into the same kernel.
    w_mat, b_vec, se_p, cout = prepare_norm_block_params(params, kernel_size=3, se=True)
    y2 = jax.block_until_ready(fwd(x_nhwc, w_mat, b_vec, se_p,
                                   kernel_size=3, stride=1, cout=cout))
    r2 = jnp.transpose(norm_block_ref(x_nchw, params, stride=1, kernel_size=3, se=True),
                       (0, 2, 3, 1))
    assert y2.shape == (n, hw, hw, c), y2.shape
    assert bool(jnp.all(jnp.isfinite(y2)))
    assert bool(jnp.allclose(y2, r2, rtol=1e-1, atol=1e-1))

    # 3) stride=2, Cin!=Cout (no residual), f32 escape-hatch weights: validates the strided
    #    window path and the exact-precision prepack.
    params2 = init_params(kp2, cin=c, cout=48, kernel=3)
    w_mat2, b_vec2, _, cout2 = prepare_norm_block_params(
        params2, kernel_size=3, se=False, mxu_dtype=jnp.float32)
    y3 = jax.block_until_ready(fwd(x_nhwc, w_mat2, b_vec2, None,
                                   kernel_size=3, stride=2, cout=cout2))
    r3 = jnp.transpose(norm_block_ref(x_nchw, params2, stride=2, kernel_size=3, se=False),
                       (0, 2, 3, 1))
    assert y3.shape == (n, 8, 8, 48), y3.shape
    assert bool(jnp.all(jnp.isfinite(y3)))
    assert bool(jnp.allclose(y3, r3, rtol=5e-2, atol=5e-2))

    print("KERNEL_OK")
</pallas_src>

<mosaic_0001>
module attributes {stable_mosaic.version = 11 : i64} {
  func.func @_norm_block_kernel(%arg0: i32, %arg1: memref<1x16x16x32xbf16, #tpu.memory_space<vmem>>, %arg2: memref<288x128xbf16, #tpu.memory_space<vmem>>, %arg3: memref<1x128xf32, #tpu.memory_space<vmem>>, %arg4: memref<1x16x16x128xf32, #tpu.memory_space<vmem>>, %arg5: memref<18x18x32xbf16, #tpu.memory_space<vmem>>) attributes {dimension_semantics = [#tpu.dimension_semantics<parallel>], iteration_bounds = array<i64: 2>, scalar_prefetch = 0 : i64, scratch_operands = 1 : i64, tpu.core_type = #tpu.core_type<tc>, window_params = [{transform_indices = @transform_0, window_bounds = array<i64: 1, 16, 16, 32>}, {pipeline_mode = #tpu.pipeline_mode<synchronous>, transform_indices = @transform_1, window_bounds = array<i64: 288, 128>}, {pipeline_mode = #tpu.pipeline_mode<synchronous>, transform_indices = @transform_2, window_bounds = array<i64: 1, 128>}, {transform_indices = @transform_3, window_bounds = array<i64: 1, 16, 16, 128>}]} {
    %cst = arith.constant 0.000000e+00 : bf16
    %0 = vector.broadcast %cst : bf16 to vector<1x18x32xbf16>
    %c0 = arith.constant 0 : index
    %c0_0 = arith.constant 0 : index
    %c0_1 = arith.constant 0 : index
    %1 = vector.load %arg5[%c0, %c0_0, %c0_1] : memref<18x18x32xbf16, #tpu.memory_space<vmem>>, vector<1x18x32xbf16>
    tpu.vector_store %arg5[%c0, %c0_0, %c0_1], %0 {strides = array<i32>} : memref<18x18x32xbf16, #tpu.memory_space<vmem>>, vector<1x18x32xbf16>,
    %cst_2 = arith.constant 0.000000e+00 : bf16
    %2 = vector.broadcast %cst_2 : bf16 to vector<1x18x32xbf16>
    %c17 = arith.constant 17 : index
    %c0_3 = arith.constant 0 : index
    %c0_4 = arith.constant 0 : index
    %3 = vector.load %arg5[%c17, %c0_3, %c0_4] : memref<18x18x32xbf16, #tpu.memory_space<vmem>>, vector<1x18x32xbf16>
    tpu.vector_store %arg5[%c17, %c0_3, %c0_4], %2 {strides = array<i32>} : memref<18x18x32xbf16, #tpu.memory_space<vmem>>, vector<1x18x32xbf16>,
    %cst_5 = arith.constant 0.000000e+00 : bf16
    %4 = vector.broadcast %cst_5 : bf16 to vector<16x1x32xbf16>
    %c1 = arith.constant 1 : index
    %c0_6 = arith.constant 0 : index
    %c0_7 = arith.constant 0 : index
    %5 = vector.load %arg5[%c1, %c0_6, %c0_7] : memref<18x18x32xbf16, #tpu.memory_space<vmem>>, vector<16x1x32xbf16>
    tpu.vector_store %arg5[%c1, %c0_6, %c0_7], %4 {strides = array<i32>} : memref<18x18x32xbf16, #tpu.memory_space<vmem>>, vector<16x1x32xbf16>,
    %cst_8 = arith.constant 0.000000e+00 : bf16
    %6 = vector.broadcast %cst_8 : bf16 to vector<16x1x32xbf16>
    %c1_9 = arith.constant 1 : index
    %c17_10 = arith.constant 17 : index
    %c0_11 = arith.constant 0 : index
    %7 = vector.load %arg5[%c1_9, %c17_10, %c0_11] : memref<18x18x32xbf16, #tpu.memory_space<vmem>>, vector<16x1x32xbf16>
    tpu.vector_store %arg5[%c1_9, %c17_10, %c0_11], %6 {strides = array<i32>} : memref<18x18x32xbf16, #tpu.memory_space<vmem>>, vector<16x1x32xbf16>,
    %c0_12 = arith.constant 0 : index
    %c0_13 = arith.constant 0 : index
    %c0_14 = arith.constant 0 : index
    %c0_15 = arith.constant 0 : index
    %8 = vector.load %arg1[%c0_12, %c0_13, %c0_14, %c0_15] : memref<1x16x16x32xbf16, #tpu.memory_space<vmem>>, vector<1x16x16x32xbf16>
    %9 = vector.shape_cast %8 : vector<1x16x16x32xbf16> to vector<16x16x32xbf16>
    %c1_16 = arith.constant 1 : index
    %c1_17 = arith.constant 1 : index
    %c0_18 = arith.constant 0 : index
    %10 = vector.load %arg5[%c1_16, %c1_17, %c0_18] : memref<18x18x32xbf16, #tpu.memory_space<vmem>>, vector<16x16x32xbf16>
    tpu.vector_store %arg5[%c1_16, %c1_17, %c0_18], %9 {strides = array<i32>} : memref<18x18x32xbf16, #tpu.memory_space<vmem>>, vector<16x16x32xbf16>,
    %c0_19 = arith.constant 0 : index
    %c0_20 = arith.constant 0 : index
    %c0_21 = arith.constant 0 : index
    %11 = vector.load %arg5[%c0_19, %c0_20, %c0_21] : memref<18x18x32xbf16, #tpu.memory_space<vmem>>, vector<16x16x32xbf16>
    %12 = vector.shape_cast %11 : vector<16x16x32xbf16> to vector<256x32xbf16>
    %c0_22 = arith.constant 0 : index
    %c1_23 = arith.constant 1 : index
    %c0_24 = arith.constant 0 : index
    %13 = vector.load %arg5[%c0_22, %c1_23, %c0_24] : memref<18x18x32xbf16, #tpu.memory_space<vmem>>, vector<16x16x32xbf16>
    %14 = vector.shape_cast %13 : vector<16x16x32xbf16> to vector<256x32xbf16>
    %c0_25 = arith.constant 0 : index
    %c2 = arith.constant 2 : index
    %c0_26 = arith.constant 0 : index
    %15 = vector.load %arg5[%c0_25, %c2, %c0_26] : memref<18x18x32xbf16, #tpu.memory_space<vmem>>, vector<16x16x32xbf16>
    %16 = vector.shape_cast %15 : vector<16x16x32xbf16> to vector<256x32xbf16>
    %c1_27 = arith.constant 1 : index
    %c0_28 = arith.constant 0 : index
    %c0_29 = arith.constant 0 : index
    %17 = vector.load %arg5[%c1_27, %c0_28, %c0_29] : memref<18x18x32xbf16, #tpu.memory_space<vmem>>, vector<16x16x32xbf16>
    %18 = vector.shape_cast %17 : vector<16x16x32xbf16> to vector<256x32xbf16>
    %c1_30 = arith.constant 1 : index
    %c1_31 = arith.constant 1 : index
    %c0_32 = arith.constant 0 : index
    %19 = vector.load %arg5[%c1_30, %c1_31, %c0_32] : memref<18x18x32xbf16, #tpu.memory_space<vmem>>, vector<16x16x32xbf16>
    %20 = vector.shape_cast %19 : vector<16x16x32xbf16> to vector<256x32xbf16>
    %c1_33 = arith.constant 1 : index
    %c2_34 = arith.constant 2 : index
    %c0_35 = arith.constant 0 : index
    %21 = vector.load %arg5[%c1_33, %c2_34, %c0_35] : memref<18x18x32xbf16, #tpu.memory_space<vmem>>, vector<16x16x32xbf16>
    %22 = vector.shape_cast %21 : vector<16x16x32xbf16> to vector<256x32xbf16>
    %c2_36 = arith.constant 2 : index
    %c0_37 = arith.constant 0 : index
    %c0_38 = arith.constant 0 : index
    %23 = vector.load %arg5[%c2_36, %c0_37, %c0_38] : memref<18x18x32xbf16, #tpu.memory_space<vmem>>, vector<16x16x32xbf16>
    %24 = vector.shape_cast %23 : vector<16x16x32xbf16> to vector<256x32xbf16>
    %c2_39 = arith.constant 2 : index
    %c1_40 = arith.constant 1 : index
    %c0_41 = arith.constant 0 : index
    %25 = vector.load %arg5[%c2_39, %c1_40, %c0_41] : memref<18x18x32xbf16, #tpu.memory_space<vmem>>, vector<16x16x32xbf16>
    %26 = vector.shape_cast %25 : vector<16x16x32xbf16> to vector<256x32xbf16>
    %c2_42 = arith.constant 2 : index
    %c2_43 = arith.constant 2 : index
    %c0_44 = arith.constant 0 : index
    %27 = vector.load %arg5[%c2_42, %c2_43, %c0_44] : memref<18x18x32xbf16, #tpu.memory_space<vmem>>, vector<16x16x32xbf16>
    %28 = vector.shape_cast %27 : vector<16x16x32xbf16> to vector<256x32xbf16>
    %29 = tpu.concatenate %12, %14, %16, %18, %20, %22, %24, %26, %28 in 1 : vector<256x32xbf16>, vector<256x32xbf16>, vector<256x32xbf16>, vector<256x32xbf16>, vector<256x32xbf16>, vector<256x32xbf16>, vector<256x32xbf16>, vector<256x32xbf16>, vector<256x32xbf16> -> vector<256x288xbf16>
    %c0_45 = arith.constant 0 : index
    %c0_46 = arith.constant 0 : index
    %30 = vector.load %arg2[%c0_45, %c0_46] : memref<288x128xbf16, #tpu.memory_space<vmem>>, vector<288x128xbf16>
    %cst_47 = arith.constant dense<0.000000e+00> : vector<256x128xf32>
    %31 = tpu.matmul %29, %30, %cst_47 {dimension_numbers = #tpu.dot_dimension_numbers<[1], [0], [0], [1], [0, 0, 1, 1], [], []>} : vector<256x288xbf16>, vector<288x128xbf16>, vector<256x128xf32> -> vector<256x128xf32>
    %c0_48 = arith.constant 0 : index
    %c0_49 = arith.constant 0 : index
    %32 = vector.load %arg3[%c0_48, %c0_49] : memref<1x128xf32, #tpu.memory_space<vmem>>, vector<1x128xf32>
    %33 = vector.broadcast %32 : vector<1x128xf32> to vector<256x128xf32>
    %34 = arith.addf %31, %33 : vector<256x128xf32>
    %cst_50 = arith.constant 0.000000e+00 : f32
    %35 = vector.broadcast %cst_50 : f32 to vector<256x128xf32>
    %36 = arith.maximumf %34, %35 : vector<256x128xf32>
    %37 = vector.shape_cast %9 : vector<16x16x32xbf16> to vector<256x32xbf16>
    %38 = arith.extf %37 : vector<256x32xbf16> to vector<256x32xf32>
    %cst_51 = arith.constant 0.000000e+00 : f32
    %39 = vector.broadcast %cst_51 : f32 to vector<256x96xf32>
    %40 = tpu.concatenate %38, %39 in 1 : vector<256x32xf32>, vector<256x96xf32> -> vector<256x128xf32>
    %41 = arith.addf %36, %40 : vector<256x128xf32>
    %42 = vector.shape_cast %41 : vector<256x128xf32> to vector<16x16x128xf32>
    %c0_52 = arith.constant 0 : index
    %c0_53 = arith.constant 0 : index
    %c0_54 = arith.constant 0 : index
    %c0_55 = arith.constant 0 : index
    %43 = vector.load %arg4[%c0_52, %c0_53, %c0_54, %c0_55] : memref<1x16x16x128xf32, #tpu.memory_space<vmem>>, vector<1x16x16x128xf32>
    %44 = vector.shape_cast %43 : vector<1x16x16x128xf32> to vector<16x16x128xf32>
    %45 = vector.shape_cast %42 : vector<16x16x128xf32> to vector<1x16x16x128xf32>
    tpu.vector_store %arg4[%c0_52, %c0_53, %c0_54, %c0_55], %45 {strides = array<i32>} : memref<1x16x16x128xf32, #tpu.memory_space<vmem>>, vector<1x16x16x128xf32>,
    return
  }
  func.func @transform_0(%arg0: i32) -> (i32, i32, i32, i32) {
    %c0_i32 = arith.constant 0 : i32
    %c0_i32_0 = arith.constant 0 : i32
    %c0_i32_1 = arith.constant 0 : i32
    %c0_i32_2 = arith.constant 0 : i32
    return %arg0, %c0_i32, %c0_i32_0, %c0_i32_1 : i32, i32, i32, i32
  }
  func.func @transform_1(%arg0: i32) -> (i32, i32) {
    %c0_i32 = arith.constant 0 : i32
    %c0_i32_0 = arith.constant 0 : i32
    %c0_i32_1 = arith.constant 0 : i32
    return %c0_i32, %c0_i32_0 : i32, i32
  }
  func.func @transform_2(%arg0: i32) -> (i32, i32) {
    %c0_i32 = arith.constant 0 : i32
    %c0_i32_0 = arith.constant 0 : i32
    %c0_i32_1 = arith.constant 0 : i32
    return %c0_i32, %c0_i32_0 : i32, i32
  }
  func.func @transform_3(%arg0: i32) -> (i32, i32, i32, i32) {
    %c0_i32 = arith.constant 0 : i32
    %c0_i32_0 = arith.constant 0 : i32
    %c0_i32_1 = arith.constant 0 : i32
    %c0_i32_2 = arith.constant 0 : i32
    return %arg0, %c0_i32, %c0_i32_0, %c0_i32_1 : i32, i32, i32, i32
  }
}

</mosaic_0001>

<bundles_post_ra>
// kernel: norm_block_nhwc.1
= control target key start
LH: loop header
LB: loop body
LE: loop exit
PB: predicated region body
PF: predicated region fallthrough
CT: control target
= control target key end

     0   :  { %8 = vsyncpa [#allocation4], 0  ;;  %s7477_s0 = inlined_call_operand.vmem [shape: bf16[2,16,16,32], index: 0, kind: input, shape index: {}]   ;;  %s7478_s1 = inlined_call_operand.vmem [shape: bf16[288,128], index: 1, kind: input, shape index: {}]   ;;  %s7479_s2 = inlined_call_operand.vmem [shape: f32[1,128], index: 2, kind: input, shape index: {}]   ;;  %s7480_s3 = inlined_call_operand.hbm [shape: f32[2,16,16,128], index: 3, kind: output, shape index: {}]  }
   0x1   :  { %10 = vsyncpa [#allocation4 + $0x1], 0  ;;  %s4942_s12 = smov 0   ;;  %s4944_s13 = smov 0  }
   0x2   :  { %s4946_s14 = smov 0   ;;  %s4948_s15 = smov 0  }
   0x3 LB: > { %s4963_s16 = sadd.s32 4294967295, %s4913_s15   ;;  %s4268_s17 = sadd.s32 4294967294, %s4913_s15   ;;  %s4913_s15 = sphi %s4948_s15, %s7739_s15   ;;  %s4909_s14 = sphi %s4946_s14, %s7738_s14   ;;  %s4905_s13 = sphi %s4944_s13, %s7737_s13   ;;  %s4901_s12 = sphi %s4942_s12, %s7736_s12  }
   0x4   : > { %s4967_s18 = sadd.s32 1, %s4913_s15   ;;  %s91_s19 = sadd.s32 1, %s4909_s14 }
   0x5   : > { %s88_s20 = ssub.s32 %s4913_s15, %s4967_s18  ;;  %p101_p0 = scmp.ne.s32.totalorder %s4909_s14, %s4905_s13 }
   0x6   : > { %p89_p1 = scmp.eq.s32.totalorder %s88_s20, 0  ;;  %p102_p2 = scmp.eq.s32.totalorder %s4963_s16, 1 }
   0x7   : > { %p107_p3 = scmp.ne.s32.totalorder %s4905_s13, %s4901_s12  ;;  %p108_p4 = scmp.eq.s32.totalorder %s4268_s17, 1 }
   0x8   : > { %s4978_s21 = scalar_select %p89_p1, %s4909_s14, %s91_s19  }
   0x9   : > { %p4980_p5 = por %p102_p2, %p101_p0  ;;  %p4984_p6 = por %p108_p4, %p107_p3 }
   0xa   : > { %p4271_p7 = scmp.ge.s32.totalorder %s4913_s15, 1  ;;  %p140_p8 = scmp.lt.s32.totalorder %s4913_s15, 3 }
   0xc   : > { %p141_p9 = pnand %p4271_p7, %p140_p8 }
   0xe   : > { %144 = sbr.rel (%p141_p9) target bundleno = 717 (0x2cd), region = 32 }
  0x15   : > { %vm170_vm0 = vcmask 257024   ;;  %vm173_vm1 = vcmask 253952   ;;  %vm181_vm2 = vsmask.f32 256  ;;  %v4915_v0 = vmov 0   ;;  %p164_p10 = scmp.lt.s32.totalorder %s4963_s16, 1 }
  0x16   : > { %171 = vst.msk [vmem:[#allocation2] sm:$0xf] %vm170_vm0, %v4915_v0  ;;  %172 = vst.msk [vmem:[#allocation2 + $0x4] sm:$0xf] %vm170_vm0, %v4915_v0  ;;  %vm231_vm4 = vsmask.f32 7938 }
  0x17   : > { %174 = vst.msk [vmem:[#allocation2 + $0x8] sm:$0x1] %vm173_vm1, %v4915_v0  ;;  %vm4993_vm3 = vmand %vm173_vm1, %vm181_vm2  ;;  %v222_v2 = vld [vmem:[#allocation2 + $0xa8] sm:$0x1]  ;;  %vm1248_vm6 = vcmask 1042432   ;;  %vm1249_vm7 = vcmask 1046532  }
  0x18   : > { %176 = vst.msk [vmem:[#allocation2 + $0xcc] sm:$0xf] %vm170_vm0, %v4915_v0  ;;  %177 = vst.msk [vmem:[#allocation2 + $0xd0] sm:$0xf] %vm170_vm0, %v4915_v0  ;;  %v223_v4 = vsel %vm4993_vm3, 0, %v222_v2  ;;  %s165_s24 = scalar_select %p164_p10, %s4963_s16, 1 }
  0x19   : > { %178 = vst.msk [vmem:[#allocation2 + $0xd4] sm:$0x1] %vm173_vm1, %v4915_v0  ;;  %vm5001_vm5 = vmand %vm173_vm1, %vm231_vm4  ;;  %v186_v5 = vld [vmem:[#allocation2 + $0x18] sm:$0x1]  ;;  %vm797_vm8 = vsmask.f32 3328 }
  0x1a   : > { %224 = vst [vmem:[#allocation2 + $0xa8] sm:$0x1] %v223_v4  ;;  %v187_v6 = vsel %vm4993_vm3, 0, %v186_v5  ;;  %v189_v7 = vld [vmem:[#allocation2 + $0x24] sm:$0x1]  ;;  %s4507_s25 = sshll.u32 %s165_s24, 7  ;;  %vm5020_vm9 = vmor %vm1248_vm6, %vm1249_vm7 }
  0x1b   : > { %v183_v8 = vld [vmem:[#allocation2 + $0xc] sm:$0x1]  ;;  %188 = vst [vmem:[#allocation2 + $0x18] sm:$0x1] %v187_v6  ;;  %v190_v9 = vsel %vm4993_vm3, 0, %v189_v7  ;;  %s5027_s28 = scalar_lea.vmem %s7477_s0, %s4507_s25  ;;  %vm5040_vm12 = vmand %vm170_vm0, %vm231_vm4  ;;  %s4916_s29 = smov 64  }
  0x1c   : > { %v184_v10 = vsel %vm4993_vm3, 0, %v183_v8  ;;  %v233_v11 = vld [vmem:[#allocation2 + $0x14] sm:$0x1]  ;;  %v219_v12 = vld [vmem:[#allocation2 + $0x9c] sm:$0x1]  ;;  %s4917_s30 = smov 32  }
  0x1d   : > { %191 = vst [vmem:[#allocation2 + $0x24] sm:$0x1] %v190_v9  ;;  %185 = vst [vmem:[#allocation2 + $0xc] sm:$0x1] %v184_v10  ;;  %v234_v13 = vsel %vm5001_vm5, 0, %v233_v11  ;;  %v220_v14 = vsel %vm4993_vm3, 0, %v219_v12 }
  0x1e   : > { %v269_v15 = vld [vmem:[#allocation2 + $0xa4] sm:$0x1]  ;;  %vm798_vm10 = vsmask.f32 7440  ;;  %vm313_vm11 = vsmask.f32 4368 }
  0x1f   : > { %235 = vst [vmem:[#allocation2 + $0x14] sm:$0x1] %v234_v13  ;;  %221 = vst [vmem:[#allocation2 + $0x9c] sm:$0x1] %v220_v14  ;;  %v270_v17 = vsel %vm5001_vm5, 0, %v269_v15  ;;  %s4918_s4 = smov 96  }
  0x20   : > { %v750_v18 = vld [vmem:[#allocation2 + $0x4] sm:$0xf]  ;;  %v781_v19 = vld [vmem:[#allocation2 + $0x8] sm:$0x1]  ;;  %v1184_v20 = vld [vmem:[#allocation2] sm:$0xe] }
  0x21   : > { %271 = vst [vmem:[#allocation2 + $0xa4] sm:$0x1] %v270_v17  ;;  %v4275_v21 = vrot.slane %v1184_v20, 9  ;;  %v1253_v22 = vrot.slane %v750_v18, 5  ;;  %v1256_v23 = vrot.slane %v781_v19, 5  ;;  %v810_v25 = vshll.u32 %v750_v18, 16  ;;  %vm5047_vm13 = vmor %vm797_vm8, %vm798_vm10 }
  0x22   : > { %v749_v24 = vld [vmem:[#allocation2] sm:$0xf]  ;;  %v814_v28 = vshrl.u32 %v750_v18, 16  ;;  %v820_v29 = vshll.u32 %v781_v19, 16  ;;  %v307_v30 = vld [vmem:[%s5027_s28 + $0x68] sm:$0xf]  ;;  %vm5056_vm14 = vmor %vm181_vm2, %vm313_vm11 }
  0x23   : > { %v801_v26 = vshrl.u32 %v749_v24, 16  ;;  %v804_v27 = vshll.u32 %v749_v24, 16  ;;  %v1254_v31 = vsel %vm5020_vm9, %v4275_v21, %v1253_v22  ;;  %v1255_v32 = vrot.slane %v1253_v22, 4  ;;  %v308_v34 = vld [vmem:[%s5027_s28 + $0x6c] sm:$0xf]  ;;  %s4508_s24 = sshll.u32 %s4963_s16, 12 }
  0x24   : > { %v812_v33 = vrot.slane %v810_v25, 5  ;;  %v537_v35 = vshrl.u32 %v307_v30, 16  ;;  %v816_v38 = vrot.slane %v814_v28, 4  ;;  %v822_v39 = vrot.slane %v820_v29, 5  ;;  %v283_v44 = vld [vmem:[%s5027_s28 + $0x8] sm:$0xf]  ;;  %s7428_s27 = scalar_lea.hbm %s7480_s3, %s4508_s24 }
  0x25   : > { %v803_v36 = vrot.slane %v801_v26, 4  ;;  %v806_v37 = vrot.slane %v804_v27, 5  ;;  %v1257_v40 = vsel %vm5020_vm9, %v1255_v32, %v1256_v23  ;;  %v540_v42 = vshll.u32 %v307_v30, 16  ;;  %v728_v50 = vld [vmem:[#allocation2 + $0xa8] sm:$0xf]  ;;  %s4919_s6 = smov [#allocation3]  }
  0x26   : > { %v539_v41 = vrot.slane %v537_v35, 7  ;;  %v545_v43 = vshrl.u32 %v308_v34, 16  ;;  %v4355_v46 = vcombine.low %v1254_v31, %v1257_v40  ;;  %v817_v48 = vor.u32 %v816_v38, %v812_v33  ;;  %v284_v51 = vld [vmem:[%s5027_s28 + $0xc] sm:$0xf]  ;;  %v644_v2 = vld [vmem:[#allocation2 + $0x18] sm:$0xf] }
  0x27   : > { %v807_v47 = vor.u32 %v806_v37, %v803_v36  ;;  %v548_v49 = vshll.u32 %v308_v34, 16  ;;  %v333_v56 = vshrl.u32 %v283_v44, 16  ;;  %v336_v60 = vshll.u32 %v283_v44, 16  ;;  %v285_v4 = vld [vmem:[%s5027_s28 + $0x10] sm:$0xf]  ;;  %s4855_s7 = sshll.u32 %s4919_s6, 4  ;;  %s4856_s7 = int_to_ptr.vmem [resolvable:$false] %s4855_s7 }
  0x28   : > { %v542_v53 = vor.u32 %v540_v42, %v539_v41  ;;  %v543_v54 = vrot.slane %v539_v41, 4  ;;  %v5051_v55 = vrot.slane %v545_v43, 7  ;;  %2772 = vrot.lane.b32.xlu1 %v4355_v46, %s4916_s29  ;;  %v818_v58 = vrot.slane %v817_v48, 4  ;;  %v286_v9 = vld [vmem:[%s5027_s28 + $0x14] sm:$0xf]  ;;  %s4857_s8 = scalar_lea.vmem %s4856_s7, 8192 }
  0x29   : > { %v808_v57 = vrot.slane %v807_v47, 4  ;;  %v341_v61 = vshrl.u32 %v284_v51, 16  ;;  %v335_v0 = vrot.slane %v333_v56, 7  ;;  %v344_v8 = vshll.u32 %v284_v51, 16  ;;  %v281_v10 = vld [vmem:[%s5027_s28] sm:$0xf] }
  0x2a   : > { %v550_v62 = vor.u32 %v548_v49, %v5051_v55  ;;  %v729_v63 = vsel %vm5040_vm12, %v542_v53, %v728_v50  ;;  %v823_v6 = vsel %vm5047_vm13, %v818_v58, %v822_v39  ;;  %v282_v15 = vld [vmem:[%s5027_s28 + $0x4] sm:$0xf]  ;;  %v350_v18 = vshrl.u32 %v285_v4, 16  ;;  %v305_v20 = vld [vmem:[%s5027_s28 + $0x60] sm:$0xf] }
  0x2b   : > { %v813_v5 = vsel %vm5047_vm13, %v808_v57, %v812_v33  ;;  %730 = vst [vmem:[#allocation2 + $0xa8] sm:$0xf] %v729_v63  ;;  %v5068_v7 = vrot.slane %v341_v61, 7  ;;  %v338_v13 = vor.u32 %v336_v60, %v335_v0  ;;  %v339_v14 = vrot.slane %v335_v0, 4  ;;  %v651_v30 = vld [vmem:[#allocation2 + $0x24] sm:$0xf] }
  0x2c   : > { %v4339_v11 = vcombine.low %v813_v5, %v823_v6  ;;  %v551_v12 = vsel %vm5056_vm14, %v543_v54, %v550_v62  ;;  %v353_v19 = vshll.u32 %v285_v4, 16  ;;  %v358_v22 = vshrl.u32 %v286_v9, 16  ;;  %v637_v37 = vld [vmem:[#allocation2 + $0xc] sm:$0xf]  ;;  %v641_v47 = vld [vmem:[#allocation2 + $0x14] sm:$0x1] }
  0x2d   : > { %731 = vst.msk [vmem:[#allocation2 + $0xac] sm:$0xf] %vm170_vm0, %v551_v12  ;;  %v346_v17 = vor.u32 %v344_v8, %v5068_v7  ;;  %v645_v21 = vsel %vm5040_vm12, %v338_v13, %v644_v2  ;;  %v361_v23 = vshll.u32 %v286_v9, 16  ;;  %v316_v24 = vshrl.u32 %v281_v10, 16  ;;  %v306_v53 = vld [vmem:[%s5027_s28 + $0x64] sm:$0xf] }
  0x2e   : > { %2692 = vrot.lane.b32.xlu0 %v4339_v11, %s4917_s30  ;;  %646 = vst [vmem:[#allocation2 + $0x18] sm:$0xf] %v645_v21  ;;  %v352_v26 = vrot.slane %v350_v18, 7  ;;  %v319_v27 = vshll.u32 %v281_v10, 16  ;;  %v324_v28 = vshrl.u32 %v282_v15, 16  ;;  %v5084_v29 = vrot.slane %v358_v22, 7 }
  0x2f   : > { %v347_v25 = vsel %vm5056_vm14, %v339_v14, %v346_v17  ;;  %v318_v31 = vrot.slane %v316_v24, 7  ;;  %v327_v32 = vshll.u32 %v282_v15, 16  ;;  %v520_v33 = vshrl.u32 %v305_v20, 16  ;;  %v721_v4 = vld [vmem:[#allocation2 + $0x9c] sm:$0xf] }
  0x30   : > { %647 = vst.msk [vmem:[#allocation2 + $0x1c] sm:$0xf] %vm170_vm0, %v347_v25  ;;  %v355_v34 = vor.u32 %v353_v19, %v352_v26  ;;  %v356_v35 = vrot.slane %v352_v26, 4  ;;  %v326_v36 = vrot.slane %v324_v28, 7  ;;  %v363_v39 = vor.u32 %v361_v23, %v5084_v29  ;;  %v236_v15 = vld [vmem:[#allocation2 + $0x20] sm:$0x1] }
  0x31   : > { %v321_v40 = vor.u32 %v319_v27, %v318_v31  ;;  %v322_v41 = vrot.slane %v318_v31, 4  ;;  %v523_v42 = vshll.u32 %v305_v20, 16  ;;  %v522_v54 = vrot.slane %v520_v33, 7 }
  0x32   : > { %v1996_v38 = vld [vmem:[#allocation2 + $0xa8] sm:$0xf]  ;;  %v652_v44 = vsel %vm5040_vm12, %v355_v34, %v651_v30  ;;  %v329_v46 = vor.u32 %v327_v32, %v326_v36  ;;  %v364_v49 = vsel %vm5056_vm14, %v356_v35, %v363_v39  ;;  %v331_v50 = vrot.slane %v326_v36, 4 }
  0x33   : > { %v2309_v43 = vshrl.u32 %v1996_v38, 16  ;;  %653 = vst [vmem:[#allocation2 + $0x24] sm:$0xf] %v652_v44  ;;  %v638_v51 = vsel %vm5040_vm12, %v321_v40, %v637_v37  ;;  %v552_v56 = vrot.slane %v5051_v55, 4  ;;  %v2312_v58 = vshll.u32 %v1996_v38, 16 }
  0x34   : > { %v5089_v48 = vld [vmem:[#allocation2 + $0xac] sm:$0xf]  ;;  %v348_v60 = vrot.slane %v5068_v7, 4  ;;  %654 = vst.msk [vmem:[#allocation2 + $0x28] sm:$0xf] %vm170_vm0, %v364_v49  ;;  %v365_v62 = vrot.slane %v5084_v29, 4  ;;  %v330_v63 = vsel %vm5056_vm14, %v322_v41, %v329_v46  ;;  %v642_v0 = vsel %vm4993_vm3, %v331_v50, %v641_v47 }
  0x35   : > { %7550 = vst [vmem:[#allocation6_spill] sm:$0xff] %v5089_v48  ;;  %v4431_v57 = vcombine.low %v1996_v38, %v5089_v48  ;;  %639 = vst [vmem:[#allocation2 + $0xc] sm:$0xf] %v638_v51  ;;  %v1972_v61 = vld [vmem:[#allocation2 + $0x18] sm:$0xf]  ;;  %v525_v2 = vor.u32 %v523_v42, %v522_v54  ;;  %v2322_v5 = vshrl.u32 %v5089_v48, 16 }
  0x36   : > { %v2021_v8 = vshrl.u32 %v1972_v61, 16  ;;  %v2024_v9 = vshll.u32 %v1972_v61, 16  ;;  %640 = vst.msk [vmem:[#allocation2 + $0x10] sm:$0xf] %vm170_vm0, %v330_v63  ;;  %643 = vst [vmem:[#allocation2 + $0x14] sm:$0x1] %v642_v0 }
  0x37   : > { %3116 = vrot.lane.b32.xlu0 %v4431_v57, %s4916_s29  ;;  %v5107_v6 = vld [vmem:[#allocation2 + $0x1c] sm:$0xf]  ;;  %v528_v10 = vshrl.u32 %v306_v53, 16  ;;  %v5111_v12 = vrot.slane %v2309_v43, 4  ;;  %v531_v14 = vshll.u32 %v306_v53, 16  ;;  %v5114_v17 = vrot.slane %v2312_v58, 5 }
  0x38   : > { %7551 = vst [vmem:[#allocation7_spill] sm:$0xff] %v5107_v6  ;;  %v4419_v13 = vcombine.low %v1972_v61, %v5107_v6  ;;  %v526_v18 = vrot.slane %v522_v54, 4  ;;  %v722_v20 = vsel %vm5040_vm12, %v525_v2, %v721_v4  ;;  %v5118_v21 = vld [vmem:[#allocation2 + $0x18] sm:$0xf]  ;;  %v2034_v22 = vshrl.u32 %v5107_v6, 16 }
  0x39   : > { %v530_v19 = vrot.slane %v528_v10, 7  ;;  %v5123_v24 = vrot.slane %v2021_v8, 4  ;;  %v5125_v25 = vrot.slane %v2024_v9, 5  ;;  %723 = vst [vmem:[#allocation2 + $0x9c] sm:$0xf] %v722_v20  ;;  %v1436_v30 = vshrl.u32 %v5118_v21, 16 }
  0x3a   : > { %3092 = vrot.lane.b32.xlu1 %v4419_v13, %s4916_s29  ;;  %v5127_v26 = vld [vmem:[#allocation2 + $0x1c] sm:$0xf]  ;;  %v1974_v27 = vld [vmem:[#allocation2 + $0x24] sm:$0xf]  ;;  %v1439_v31 = vshll.u32 %v5118_v21, 16  ;;  %v237_v32 = vsel %vm5001_vm5, 0, %v236_v15 }
  0x3b   : > { %v533_v28 = vor.u32 %v531_v14, %v530_v19  ;;  %v5133_v33 = vld [vmem:[#allocation2 + $0x28] sm:$0xf]  ;;  %v5135_v34 = vld [vmem:[#allocation2 + $0x24] sm:$0xe]  ;;  %v1449_v36 = vshrl.u32 %v5127_v26, 16  ;;  %v2045_v38 = vshrl.u32 %v1974_v27, 16 }
  0x3c   : > { %7552 = vst [vmem:[#allocation8_spill] sm:$0xff] %v5133_v33  ;;  %7553 = vst [vmem:[#allocation9_spill] sm:$0xff] %v5135_v34  ;;  %v4420_v37 = vcombine.low %v1974_v27, %v5133_v33  ;;  %v1363_v39 = vld [vmem:[#allocation2 + $0xc] sm:$0xf]  ;;  %v535_v41 = vrot.slane %v530_v19, 4  ;;  %v2058_v49 = vshrl.u32 %v5133_v33, 16 }
  0x3d   : > { %238 = vst [vmem:[#allocation2 + $0x20] sm:$0x1] %v237_v32  ;;  %v534_v40 = vsel %vm5056_vm14, %v526_v18, %v533_v28  ;;  %v725_v42 = vld [vmem:[#allocation2 + $0xa4] sm:$0x1]  ;;  %v5142_v43 = vld [vmem:[#allocation2 + $0x10] sm:$0xf]  ;;  %v4372_v28 = vcombine.low %v5118_v21, %v5127_v26 }
  0x3e   : > { %v1412_v44 = vshrl.u32 %v1363_v39, 16  ;;  %v1415_v46 = vshll.u32 %v1363_v39, 16  ;;  %v1795_v47 = vld [vmem:[#allocation2 + $0xc] sm:$0xe]  ;;  %724 = vst.msk [vmem:[#allocation2 + $0xa0] sm:$0xf] %vm170_vm0, %v534_v40  ;;  %3094 = vrot.lane.b32.xlu0 %v4420_v37, %s4916_s29  ;;  %v4371_v58 = vcombine.low %v1363_v39, %v5142_v43  ;;  %v726_v15 = vsel %vm4993_vm3, %v535_v41, %v725_v42 }
  0x3f   : > { %v2048_v51 = vshll.u32 %v1974_v27, 16  ;;  %v5148_v53 = vld [vmem:[#allocation2 + $0x14] sm:$0x1]  ;;  %v5150_v54 = vrot.slane %v1436_v30, 4  ;;  %v7481_v57 = vrot.slane %v5133_v33, 5  ;;  %v1425_v0 = vshrl.u32 %v5142_v43, 16 }
  0x40   : > { %v1414_v61 = vrot.slane %v1412_v44, 4  ;;  %v1417_v63 = vrot.slane %v1415_v46, 5  ;;  %v4291_v2 = vrot.slane %v1795_v47, 9  ;;  %v1861_v4 = vrot.slane %v5142_v43, 5  ;;  %v1387_v9 = vld [vmem:[#allocation2 + $0x9c] sm:$0xf]  ;;  %2868 = vrot.lane.b32.xlu1 %v4371_v58, %s4918_s4 }
  0x41   : > { %v1864_v8 = vrot.slane %v5148_v53, 5  ;;  %v5157_v10 = vrot.slane %v2045_v38, 4  ;;  %v1700_v14 = vshrl.u32 %v1387_v9, 16  ;;  %v1703_v20 = vshll.u32 %v1387_v9, 16  ;;  %727 = vst [vmem:[#allocation2 + $0xa4] sm:$0x1] %v726_v15 }
  0x42   : > { %v1418_v13 = vor.u32 %v1417_v63, %v1414_v61  ;;  %v1862_v18 = vsel %vm5020_vm9, %v4291_v2, %v1861_v4  ;;  %v1863_v19 = vrot.slane %v1861_v4, 4  ;;  %v1807_v27 = vld [vmem:[#allocation2 + $0x9c] sm:$0xe]  ;;  %v216_v32 = vld [vmem:[#allocation2 + $0x90] sm:$0x1]  ;;  %v5168_v37 = vrot.slane %v7481_v57, 4 }
  0x43   : > { %v5170_v38 = vrot.slane %v2048_v51, 5  ;;  %v5173_v40 = vrot.slane %v1439_v31, 5  ;;  %v266_v41 = vld [vmem:[#allocation2 + $0x98] sm:$0x1]  ;;  %v5175_v42 = vrot.slane %v1425_v0, 4  ;;  %v5189_v61 = vrot.slane %v1700_v14, 4 }
  0x44   : > { %v648_v30 = vld [vmem:[#allocation2 + $0x20] sm:$0x1]  ;;  %v1865_v21 = vsel %vm5020_vm9, %v1863_v19, %v1864_v8  ;;  %v303_v51 = vld [vmem:[%s5027_s28 + $0x58] sm:$0xf]  ;;  %v5187_v58 = vrot.slane %v1418_v13, 4  ;;  %v4303_v63 = vrot.slane %v1807_v27, 9 }
  0x45   : > { %v5180_v46 = vld [vmem:[#allocation2 + $0xa0] sm:$0xf]  ;;  %v649_v47 = vsel %vm4993_vm3, %v348_v60, %v648_v30  ;;  %v4403_v31 = vcombine.low %v1862_v18, %v1865_v21  ;;  %v1796_v0 = vld [vmem:[#allocation2 + $0x18] sm:$0xe]  ;;  %v5191_v2 = vrot.slane %v1703_v20, 5  ;;  %v5195_v15 = vrot.slane %v1449_v36, 4 }
  0x46   : > { %650 = vst [vmem:[#allocation2 + $0x20] sm:$0x1] %v649_v47  ;;  %v4383_v4 = vcombine.low %v1387_v9, %v5180_v46  ;;  %v1945_v8 = vrot.slane %v5180_v46, 5  ;;  %v304_v7 = vld [vmem:[%s5027_s28 + $0x5c] sm:$0xf]  ;;  %v1442_v60 = vor.u32 %v5173_v40, %v5150_v54  ;;  %v1868_v13 = vrot.slane %v5127_v26, 5 }
  0x47   : > { %2996 = vrot.lane.b32.xlu0 %v4403_v31, %s4917_s30  ;;  %v217_v14 = vsel %vm4993_vm3, 0, %v216_v32  ;;  %v267_v18 = vsel %vm5001_vm5, 0, %v266_v41  ;;  %v1713_v19 = vshrl.u32 %v5180_v46, 16  ;;  %v4292_v20 = vrot.slane %v1796_v0, 9  ;;  %v1185_v11 = vld [vmem:[#allocation2 + $0xc] sm:$0xe] }
  0x48   : > { %2892 = vrot.lane.b32.xlu1 %v4383_v4, %s4918_s4  ;;  %v1947_v36 = vrot.slane %v1945_v8, 4  ;;  %218 = vst [vmem:[#allocation2 + $0x90] sm:$0x1] %v217_v14  ;;  %268 = vst [vmem:[#allocation2 + $0x98] sm:$0x1] %v267_v18  ;;  %v1946_v54 = vsel %vm5020_vm9, %v4303_v63, %v1945_v8  ;;  %v503_v30 = vshrl.u32 %v303_v51, 16  ;;  %v2027_v47 = vor.u32 %v5125_v25, %v5123_v24 }
  0x49   : > { %v5209_v27 = vld [vmem:[#allocation2 + $0xa4] sm:$0x1]  ;;  %v506_v32 = vshll.u32 %v303_v51, 16  ;;  %v511_v40 = vshrl.u32 %v304_v7, 16  ;;  %v514_v21 = vshll.u32 %v304_v7, 16  ;;  %v2030_v31 = vshll.u32 %v5107_v6, 16 }
  0x4a   : > { %v1948_v41 = vrot.slane %v5209_v27, 5  ;;  %v1870_v4 = vrot.slane %v1868_v13, 4  ;;  %v505_v0 = vrot.slane %v503_v30, 7  ;;  %v2036_v18 = vrot.slane %v2034_v22, 4  ;;  %v5231_v50 = vld [vmem:[#allocation2 + $0x10] sm:$0xf] }
  0x4b   : > { %v513_v14 = vrot.slane %v511_v40, 7  ;;  %v1706_v63 = vor.u32 %v5191_v2, %v5189_v61  ;;  %v2028_v25 = vrot.slane %v2027_v47, 4  ;;  %v2032_v7 = vrot.slane %v2030_v31, 5  ;;  %v272_v61 = vld [vmem:[#allocation2 + $0xb0] sm:$0x1] }
  0x4c   : > { %v1949_v51 = vsel %vm5020_vm9, %v1947_v36, %v1948_v41  ;;  %2870 = vrot.lane.b32.xlu1 %v4372_v28, %s4918_s4  ;;  %v1869_v40 = vsel %vm5020_vm9, %v4292_v20, %v1868_v13  ;;  %v508_v23 = vor.u32 %v506_v32, %v505_v0  ;;  %v509_v2 = vrot.slane %v505_v0, 4  ;;  %v5233_v28 = vld [vmem:[#allocation2 + $0x14] sm:$0x1]  ;;  %v775_v29 = vld [vmem:[#allocation2 + $0x9c] sm:$0xf] }
  0x4d   : > { %v5224_v8 = vld [vmem:[#allocation2 + $0x20] sm:$0x1]  ;;  %v4415_v30 = vcombine.low %v1946_v54, %v1949_v51  ;;  %v516_v36 = vor.u32 %v514_v21, %v513_v14  ;;  %v518_v41 = vrot.slane %v513_v14, 4  ;;  %v4276_v57 = vrot.slane %v1185_v11, 9  ;;  %v239_v14 = vld [vmem:[#allocation2 + $0x2c] sm:$0x1] }
  0x4e   : > { %v5226_v24 = vld [vmem:[#allocation2 + $0x20] sm:$0x1]  ;;  %v1871_v22 = vrot.slane %v5224_v8, 5  ;;  %v2033_v13 = vsel %vm5047_vm13, %v2028_v25, %v2032_v7  ;;  %v2037_v20 = vor.u32 %v2036_v18, %v2032_v7  ;;  %v1260_v18 = vrot.slane %v5231_v50, 5  ;;  %v242_v9 = vld [vmem:[#allocation2 + $0x38] sm:$0x1] }
  0x4f   : > { %7554 = vst [vmem:[#allocation10_spill] sm:$0xff] %v5226_v24  ;;  %3020 = vrot.lane.b32.xlu0 %v4415_v30, %s4917_s30  ;;  %v714_v47 = vld [vmem:[#allocation2 + $0x90] sm:$0xf]  ;;  %v718_v31 = vld [vmem:[#allocation2 + $0x98] sm:$0x1]  ;;  %v2040_v32 = vshll.u32 %v5226_v24, 16  ;;  %v517_v21 = vsel %vm5056_vm14, %v509_v2, %v516_v36 }
  0x50   : > { %v1872_v54 = vsel %vm5020_vm9, %v1870_v4, %v1871_v22  ;;  %v715_v11 = vsel %vm5040_vm12, %v508_v23, %v714_v47  ;;  %v719_v0 = vsel %vm4993_vm3, %v518_v41, %v718_v31  ;;  %717 = vst.msk [vmem:[#allocation2 + $0x94] sm:$0xf] %vm170_vm0, %v517_v21  ;;  %v2038_v4 = vrot.slane %v2037_v20, 4  ;;  %v751_v2 = vld [vmem:[#allocation2 + $0xc] sm:$0xf] }
  0x51   : > { %v4404_v51 = vcombine.low %v1869_v40, %v1872_v54  ;;  %716 = vst [vmem:[#allocation2 + $0x90] sm:$0xf] %v715_v11  ;;  %720 = vst [vmem:[#allocation2 + $0x98] sm:$0x1] %v719_v0  ;;  %v2042_v25 = vrot.slane %v2040_v32, 5  ;;  %v1263_v7 = vrot.slane %v5233_v28, 5  ;;  %v2315_v23 = vor.u32 %v5114_v17, %v5111_v12 }
  0x52   : > { %v5250_v30 = vrot.slane %v1442_v60, 4  ;;  %v273_v40 = vsel %vm5001_vm5, 0, %v272_v61  ;;  %v2318_v22 = vshll.u32 %v5089_v48, 16  ;;  %v5257_v36 = vrot.slane %v1706_v63, 4 }
  0x53   : > { %2998 = vrot.lane.b32.xlu0 %v4404_v51, %s4917_s30  ;;  %v2043_v41 = vsel %vm5047_vm13, %v2038_v4, %v2042_v25  ;;  %v1262_v54 = vrot.slane %v1260_v18, 4  ;;  %274 = vst [vmem:[#allocation2 + $0xb0] sm:$0x1] %v273_v40  ;;  %v240_v60 = vsel %vm5001_vm5, 0, %v239_v14  ;;  %v2324_v12 = vrot.slane %v2322_v5, 4 }
  0x54   : > { %v4435_v47 = vcombine.low %v2033_v13, %v2043_v41  ;;  %v5264_v61 = vrot.slane %v2318_v22, 5  ;;  %241 = vst [vmem:[#allocation2 + $0x2c] sm:$0x1] %v240_v60  ;;  %v2054_v17 = vshll.u32 %v5133_v33, 16  ;;  %v5271_v63 = vsel %vm5020_vm9, %v4276_v57, %v1260_v18 }
  0x55   : > { %v5275_v31 = vsel %vm5020_vm9, %v1262_v54, %v1263_v7  ;;  %v825_v20 = vshrl.u32 %v751_v2, 16  ;;  %v828_v32 = vshll.u32 %v751_v2, 16  ;;  %v5279_v13 = vrot.slane %v1713_v19, 4 }
  0x56   : > { %v5283_v21 = vrot.slane %v2315_v23, 4  ;;  %v5286_v57 = vrot.slane %v2054_v17, 5  ;;  %v2060_v11 = vrot.slane %v2058_v49, 4  ;;  %v4356_v19 = vcombine.low %v5271_v63, %v5275_v31 }
  0x57   : > { %3172 = vrot.lane.b32.xlu0 %v4435_v47, %s4918_s4  ;;  %v827_v0 = vrot.slane %v825_v20, 4  ;;  %v830_v14 = vrot.slane %v828_v32, 5  ;;  %v774_v4 = vld [vmem:[#allocation2 + $0x94] sm:$0xf]  ;;  %v2325_v7 = vor.u32 %v2324_v12, %v5264_v61  ;;  %v2051_v40 = vor.u32 %v5170_v38, %v5157_v10 }
  0x58   : > { %v793_v25 = vld [vmem:[#allocation2 + $0x98] sm:$0x1]  ;;  %v1196_v18 = vld [vmem:[#allocation2 + $0x90] sm:$0xe]  ;;  %v1337_v22 = vrot.slane %v774_v4, 5  ;;  %v834_v54 = vshll.u32 %v5231_v50, 16 }
  0x59   : > { %v4287_v23 = vrot.slane %v1196_v18, 9  ;;  %v1340_v2 = vrot.slane %v793_v25, 5  ;;  %v773_v41 = vld [vmem:[#allocation2 + $0x90] sm:$0xf]  ;;  %v1098_v17 = vshll.u32 %v774_v4, 16  ;;  %v1102_v20 = vshrl.u32 %v774_v4, 16 }
  0x5a   : > { %v732_v49 = vld [vmem:[#allocation2 + $0xb0] sm:$0x1]  ;;  %v1089_v60 = vshrl.u32 %v773_v41, 16  ;;  %v1092_v47 = vshll.u32 %v773_v41, 16  ;;  %v1339_v63 = vrot.slane %v1337_v22, 4  ;;  %v1108_v38 = vshll.u32 %v793_v25, 16 }
  0x5b   : > { %v1338_v32 = vsel %vm5020_vm9, %v4287_v23, %v1337_v22  ;;  %v733_v10 = vsel %vm4993_vm3, %v552_v56, %v732_v49  ;;  %v655_v12 = vld [vmem:[#allocation2 + $0x2c] sm:$0x1]  ;;  %v1100_v5 = vrot.slane %v1098_v17, 5  ;;  %v1104_v35 = vrot.slane %v1102_v20, 4 }
  0x5c   : > { %734 = vst [vmem:[#allocation2 + $0xb0] sm:$0x1] %v733_v10  ;;  %v1091_v31 = vrot.slane %v1089_v60, 4  ;;  %v1094_v18 = vrot.slane %v1092_v47, 5  ;;  %v1341_v41 = vsel %vm5020_vm9, %v1339_v63, %v1340_v2  ;;  %v1110_v4 = vrot.slane %v1108_v38, 5 }
  0x5d   : > { %v656_v23 = vsel %vm4993_vm3, %v365_v62, %v655_v12  ;;  %v5308_v55 = vrot.slane %v2051_v40, 4  ;;  %v4367_v22 = vcombine.low %v1338_v32, %v1341_v41  ;;  %v1105_v25 = vor.u32 %v1104_v35, %v1100_v5  ;;  %v5311_v60 = vld [vmem:[#allocation2 + $0xac] sm:$0xf] }
  0x5e   : > { %v1095_v56 = vor.u32 %v1094_v18, %v1091_v31  ;;  %657 = vst [vmem:[#allocation2 + $0x2c] sm:$0x1] %v656_v23  ;;  %v2061_v49 = vor.u32 %v2060_v11, %v5286_v57  ;;  %v831_v47 = vor.u32 %v830_v14, %v827_v0  ;;  %v836_v17 = vrot.slane %v834_v54, 5  ;;  %v1808_v11 = vld [vmem:[#allocation2 + $0xa8] sm:$0xe] }
  0x5f   : > { %v838_v2 = vshrl.u32 %v5231_v50, 16  ;;  %v844_v20 = vshll.u32 %v5233_v28, 16  ;;  %2796 = vrot.lane.b32.xlu1 %v4367_v22, %s4916_s29  ;;  %v2321_v62 = vsel %vm5047_vm13, %v5283_v21, %v5264_v61  ;;  %v2326_v35 = vrot.slane %v2325_v7, 4  ;;  %v5325_v54 = vld [vmem:[#allocation2 + $0xa0] sm:$0xf] }
  0x60   : > { %v1096_v40 = vrot.slane %v1095_v56, 4  ;;  %v1106_v32 = vrot.slane %v1105_v25, 4  ;;  %v2062_v63 = vrot.slane %v2061_v49, 4  ;;  %v832_v10 = vrot.slane %v831_v47, 4  ;;  %v225_v47 = vld [vmem:[#allocation2 + $0xb4] sm:$0x1] }
  0x61   : > { %v840_v0 = vrot.slane %v838_v2, 4  ;;  %v1952_v14 = vrot.slane %v5311_v60, 5  ;;  %v1113_v38 = vshrl.u32 %v775_v29, 16  ;;  %v1116_v12 = vshll.u32 %v775_v29, 16 }
  0x62   : > { %v1101_v50 = vsel %vm5047_vm13, %v1096_v40, %v1100_v5  ;;  %v1111_v28 = vsel %vm5047_vm13, %v1106_v32, %v1110_v4  ;;  %v2057_v21 = vsel %vm5047_vm13, %v5308_v55, %v5286_v57  ;;  %v846_v31 = vrot.slane %v844_v20, 5  ;;  %v309_v40 = vld [vmem:[%s5027_s28 + $0x70] sm:$0xf] }
  0x63   : > { %v5327_v61 = vld [vmem:[#allocation2 + $0xb0] sm:$0x1]  ;;  %v841_v7 = vor.u32 %v840_v0, %v836_v17  ;;  %v4304_v41 = vrot.slane %v1808_v11, 9  ;;  %2774 = vrot.lane.b32.xlu1 %v4356_v19, %s4916_s29  ;;  %v4351_v4 = vcombine.low %v1101_v50, %v1111_v28  ;;  %v837_v23 = vsel %vm5047_vm13, %v832_v10, %v836_v17  ;;  %v5348_v11 = vld [vmem:[#allocation2 + $0xa4] sm:$0x1] }
  0x64   : > { %7555 = vst [vmem:[#allocation11_spill] sm:$0xff] %v5327_v61  ;;  %v5333_v18 = vld [vmem:[#allocation2 + $0xb0] sm:$0x1]  ;;  %v2328_v5 = vshll.u32 %v5327_v61, 16  ;;  %v1954_v22 = vrot.slane %v1952_v14, 4  ;;  %v1115_v55 = vrot.slane %v1113_v38, 4 }
  0x65   : > { %7556 = vst [vmem:[#allocation12_spill] sm:$0xff] %v5333_v18  ;;  %v2005_v56 = vld [vmem:[#allocation2 + $0x2c] sm:$0x1]  ;;  %v842_v25 = vrot.slane %v841_v7, 4  ;;  %v1955_v57 = vrot.slane %v5333_v18, 5  ;;  %v1118_v49 = vrot.slane %v1116_v12, 5  ;;  %v5346_v17 = vsel %vm5020_vm9, %v4304_v41, %v1952_v14 }
  0x66   : > { %v2330_v2 = vrot.slane %v2328_v5, 5  ;;  %v2064_v20 = vshll.u32 %v2005_v56, 16  ;;  %v2480_v29 = vrot.slane %v2005_v56, 5  ;;  %v1122_v19 = vshll.u32 %v5325_v54, 16  ;;  %v310_v50 = vld [vmem:[%s5027_s28 + $0x74] sm:$0xf] }
  0x67   : > { %v847_v32 = vsel %vm5047_vm13, %v842_v25, %v846_v31  ;;  %v1119_v10 = vor.u32 %v1118_v49, %v1115_v55  ;;  %v1126_v0 = vshrl.u32 %v5325_v54, 16  ;;  %v4749_v28 = vld [vmem:[%s7478_s1 + $0x40] sm:$0xff]   ;;  %2716 = vrot.lane.b32.xlu1 %v4351_v4, %s4917_s30  ;;  %v1197_v31 = vld [vmem:[#allocation2 + $0x9c] sm:$0xe]  ;;  %v5368_v56 = vsel %vm5020_vm9, %v1954_v22, %v1955_v57 }
  0x68   : > { %v2331_v38 = vsel %vm5047_vm13, %v2326_v35, %v2330_v2  ;;  %v2066_v12 = vrot.slane %v2064_v20, 5  ;;  %v5361_v14 = vsel %vm5020_vm9, %v5168_v37, %v2480_v29  ;;  %v4340_v7 = vcombine.low %v837_v23, %v847_v32  ;;  %v4750_v41 = vld [vmem:[%s7478_s1] sm:$0xff]   ;;  %4509 = vmatprep.subr.bf16.mxu0 %v4749_v28  ;;  %4675 = vmatprep.subr.bf16.mxu1 %v4749_v28  ;;  %v275_v2 = vld [vmem:[#allocation2 + $0xbc] sm:$0x1]  ;;  %v5382_v32 = vld [vmem:[#allocation2 + $0xa8] sm:$0xf] }
  0x69   : > { %7557 = vst [vmem:[#allocation13_spill] sm:$0xff] %v5361_v14  ;;  %v4447_v5 = vcombine.low %v2321_v62, %v2331_v38  ;;  %v1120_v35 = vrot.slane %v1119_v10, 4  ;;  %v1124_v25 = vrot.slane %v1122_v19, 5  ;;  %v1128_v37 = vrot.slane %v1126_v0, 4  ;;  %4510 = vmatpush3.bf16.msra.mxu0 %v4750_v41  ;;  %v4752_v62 = vld [vmem:[%s7478_s1 + $0x48] sm:$0xff]   ;;  %4683 = vmatpush3.bf16.msra.mxu1 %v4750_v41 }
  0x6a   : > { %v2067_v4 = vsel %vm5047_vm13, %v2062_v63, %v2066_v12  ;;  %v1132_v23 = vshll.u32 %v5348_v11, 16  ;;  %v226_v55 = vsel %vm4993_vm3, 0, %v225_v47  ;;  %v554_v63 = vshrl.u32 %v309_v40, 16  ;;  %4511 = vmatprep.subr.bf16.mxu0 %v4752_v62  ;;  %4676 = vmatprep.subr.bf16.mxu1 %v4752_v62  ;;  %v5394_v41 = vld [vmem:[#allocation2 + $0x28] sm:$0xf] }
  0x6b   : > { %3196 = vrot.lane.b32.xlu0 %v4447_v5, %s4918_s4  ;;  %v4436_v22 = vcombine.low %v2057_v21, %v2067_v4  ;;  %v1125_v57 = vsel %vm5047_vm13, %v1120_v35, %v1124_v25  ;;  %227 = vst [vmem:[#allocation2 + $0xb4] sm:$0x1] %v226_v55  ;;  %v557_v49 = vshll.u32 %v309_v40, 16  ;;  %2694 = vrot.lane.b32.xlu1 %v4340_v7, %s4917_s30  ;;  %v562_v29 = vshrl.u32 %v310_v50, 16  ;;  %v4753_v21 = vld [vmem:[%s7478_s1 + $0x8] sm:$0xff]  }
  0x6c   : > { %v1129_v20 = vor.u32 %v1128_v37, %v1124_v25  ;;  %v1134_v47 = vrot.slane %v1132_v23, 5  ;;  %v565_v19 = vshll.u32 %v310_v50, 16  ;;  %v556_v10 = vrot.slane %v554_v63, 7  ;;  %v753_v5 = vld [vmem:[#allocation2 + $0x18] sm:$0xf] }
  0x6d   : > { %v4288_v0 = vrot.slane %v1197_v31, 9  ;;  %v1344_v28 = vrot.slane %v5325_v54, 5  ;;  %v1347_v40 = vrot.slane %v5348_v11, 5  ;;  %v5389_v12 = vrot.slane %v562_v29, 7  ;;  %4512 = vmatpush3.bf16.msra.mxu0 %v4753_v21  ;;  %4684 = vmatpush3.bf16.msra.mxu1 %v4753_v21  ;;  %v5399_v25 = vld [vmem:[#allocation2 + $0x1c] sm:$0xf] }
  0x6e   : > { %v1130_v38 = vrot.slane %v1129_v20, 4  ;;  %v276_v50 = vsel %vm5001_vm5, 0, %v275_v2  ;;  %v1724_v7 = vshrl.u32 %v5382_v32, 16  ;;  %v4416_v54 = vcombine.low %v5346_v17, %v5368_v56  ;;  %v5407_v62 = vld [vmem:[#allocation2 + $0x20] sm:$0x1] }
  0x6f   : > { %3174 = vrot.lane.b32.xlu0 %v4436_v22, %s4918_s4  ;;  %v559_v11 = vor.u32 %v557_v49, %v556_v10  ;;  %v560_v31 = vrot.slane %v556_v10, 4  ;;  %v1346_v35 = vrot.slane %v1344_v28, 4  ;;  %277 = vst [vmem:[#allocation2 + $0xbc] sm:$0x1] %v276_v50  ;;  %v567_v23 = vor.u32 %v565_v19, %v5389_v12  ;;  %v192_v49 = vld [vmem:[#allocation2 + $0x30] sm:$0x1] }
  0x70   : > { %v1135_v37 = vsel %vm5047_vm13, %v1130_v38, %v1134_v47  ;;  %v1345_v55 = vsel %vm5020_vm9, %v4288_v0, %v1344_v28  ;;  %v1727_v63 = vshll.u32 %v5382_v32, 16  ;;  %v569_v20 = vrot.slane %v5389_v12, 4  ;;  %v5418_v19 = vld [vmem:[#allocation2 + $0x2c] sm:$0x1]  ;;  %v5420_v21 = vld [vmem:[#allocation2 + $0x24] sm:$0xe] }
  0x71   : > { %v4352_v56 = vcombine.low %v1125_v57, %v1135_v37  ;;  %v1348_v22 = vsel %vm5020_vm9, %v1346_v35, %v1347_v40  ;;  %v568_v2 = vsel %vm5056_vm14, %v560_v31, %v567_v23  ;;  %v5416_v29 = vrot.slane %v1724_v7, 4  ;;  %7558 = vst [vmem:[#allocation14_spill] sm:$0xff] %v5418_v19  ;;  %v5429_v40 = vld [vmem:[%s5027_s28 + $0x18] sm:$0xf]  ;;  %v4754_v38 = vld [vmem:[%s7478_s1 + $0x50] sm:$0xff]  }
  0x72   : > { %v735_v47 = vld [vmem:[#allocation2 + $0xb4] sm:$0xf]  ;;  %738 = vst.msk [vmem:[#allocation2 + $0xb8] sm:$0xf] %vm170_vm0, %v568_v2  ;;  %v4368_v10 = vcombine.low %v1345_v55, %v1348_v22  ;;  %v1875_v0 = vrot.slane %v5394_v41, 5  ;;  %v849_v28 = vshrl.u32 %v753_v5, 16  ;;  %v4384_v50 = vcombine.low %v5382_v32, %v5311_v60  ;;  %4513 = vmatprep.subr.bf16.mxu0 %v4754_v38  ;;  %4677 = vmatprep.subr.bf16.mxu1 %v4754_v38 }
  0x73   : > { %3022 = vrot.lane.b32.xlu0 %v4416_v54, %s4917_s30  ;;  %2718 = vrot.lane.b32.xlu1 %v4352_v56, %s4917_s30  ;;  %v736_v57 = vsel %vm5040_vm12, %v559_v11, %v735_v47  ;;  %v5434_v12 = vrot.slane %v1727_v63, 5  ;;  %v852_v7 = vshll.u32 %v753_v5, 16  ;;  %v858_v54 = vshll.u32 %v5399_v25, 16  ;;  %v5440_v11 = vld [vmem:[%s5027_s28 + $0x1c] sm:$0xf]  ;;  %v4755_v31 = vld [vmem:[%s7478_s1 + $0x10] sm:$0xff]  }
  0x74   : > { %737 = vst [vmem:[#allocation2 + $0xb4] sm:$0xf] %v736_v57  ;;  %v851_v37 = vrot.slane %v849_v28, 4  ;;  %v862_v23 = vshrl.u32 %v5399_v25, 16  ;;  %v868_v55 = vshll.u32 %v5407_v62, 16  ;;  %v193_v63 = vsel %vm4993_vm3, 0, %v192_v49  ;;  %4514 = vmatpush3.bf16.msra.mxu0 %v4755_v31  ;;  %4685 = vmatpush3.bf16.msra.mxu1 %v4755_v31 }
  0x75   : > { %v5448_v56 = vld [vmem:[#allocation2 + $0x18] sm:$0xe]  ;;  %v854_v5 = vrot.slane %v852_v7, 5  ;;  %v860_v22 = vrot.slane %v858_v54, 5  ;;  %v4293_v47 = vrot.slane %v5420_v21, 9  ;;  %v1878_v57 = vrot.slane %v5418_v19, 5 }
  0x76   : > { %v739_v60 = vld [vmem:[#allocation2 + $0xbc] sm:$0x1]  ;;  %v864_v28 = vrot.slane %v862_v23, 4  ;;  %194 = vst [vmem:[#allocation2 + $0x30] sm:$0x1] %v193_v63  ;;  %v1730_v49 = vor.u32 %v5434_v12, %v5416_v29  ;;  %v870_v31 = vrot.slane %v868_v55, 5 }
  0x77   : > { %2798 = vrot.lane.b32.xlu1 %v4368_v10, %s4916_s29  ;;  %v740_v2 = vsel %vm4993_vm3, %v569_v20, %v739_v60  ;;  %v4756_v38 = vld [vmem:[%s7478_s1 + $0x58] sm:$0xff]   ;;  %v1877_v10 = vrot.slane %v1875_v0, 4  ;;  %v855_v7 = vor.u32 %v854_v5, %v851_v37  ;;  %v367_v20 = vshrl.u32 %v5429_v40, 16  ;;  %v1187_v14 = vld [vmem:[#allocation2 + $0x24] sm:$0xe] }
  0x78   : > { %741 = vst [vmem:[#allocation2 + $0xbc] sm:$0x1] %v740_v2  ;;  %v4757_v21 = vld [vmem:[%s7478_s1 + $0x18] sm:$0xff]   ;;  %v865_v54 = vor.u32 %v864_v28, %v860_v22  ;;  %v370_v23 = vshll.u32 %v5429_v40, 16  ;;  %v375_v60 = vshrl.u32 %v5440_v11, 16  ;;  %4515 = vmatprep.subr.bf16.mxu0 %v4756_v38  ;;  %4678 = vmatprep.subr.bf16.mxu1 %v4756_v38  ;;  %v378_v37 = vshll.u32 %v5440_v11, 16 }
  0x79   : > { %v5471_v63 = vld [vmem:[#allocation2 + $0xb8] sm:$0xf]  ;;  %v856_v2 = vrot.slane %v855_v7, 4  ;;  %v369_v17 = vrot.slane %v367_v20, 7  ;;  %v4277_v5 = vrot.slane %v5448_v56, 9  ;;  %4516 = vmatpush3.bf16.msra.mxu0 %v4757_v21  ;;  %4686 = vmatpush3.bf16.msra.mxu1 %v4757_v21  ;;  %v1267_v38 = vrot.slane %v5399_v25, 5 }
  0x7a   : > { %7559 = vst [vmem:[#allocation15_spill] sm:$0xff] %v5471_v63  ;;  %v2346_v28 = vshrl.u32 %v5471_v63, 16  ;;  %v2342_v55 = vshll.u32 %v5471_v63, 16  ;;  %v866_v40 = vrot.slane %v865_v54, 4  ;;  %v1270_v54 = vrot.slane %v5407_v62, 5 }
  0x7b   : > { %v1998_v4 = vld [vmem:[#allocation2 + $0xb4] sm:$0xf]  ;;  %2894 = vrot.lane.b32.xlu1 %v4384_v50, %s4918_s4  ;;  %v861_v11 = vsel %vm5047_vm13, %v856_v2, %v860_v22  ;;  %v372_v51 = vor.u32 %v370_v23, %v369_v17  ;;  %v1268_v23 = vsel %vm5020_vm9, %v4277_v5, %v1267_v38  ;;  %v1879_v5 = vsel %vm5020_vm9, %v1877_v10, %v1878_v57  ;;  %v5527_v57 = vld [vmem:[#allocation2 + $0xb0] sm:$0x1]  ;;  %v5536_v29 = vld [vmem:[#allocation2 + $0xb8] sm:$0xf] }
  0x7c   : > { %v2333_v32 = vshrl.u32 %v1998_v4, 16  ;;  %v2336_v35 = vshll.u32 %v1998_v4, 16  ;;  %v4432_v7 = vcombine.low %v1998_v4, %v5471_v63  ;;  %v2344_v56 = vrot.slane %v2342_v55, 5  ;;  %v4759_v4 = vld [vmem:[%s7478_s1 + $0x60] sm:$0xff]  }
  0x7d   : > { %v2348_v20 = vrot.slane %v2346_v28, 4  ;;  %v871_v21 = vsel %vm5047_vm13, %v866_v40, %v870_v31  ;;  %v658_v25 = vld [vmem:[#allocation2 + $0x30] sm:$0xf]  ;;  %v373_v28 = vrot.slane %v369_v17, 4  ;;  %v5491_v55 = vrot.slane %v375_v60, 7  ;;  %4517 = vmatprep.subr.bf16.mxu0 %v4759_v4  ;;  %4679 = vmatprep.subr.bf16.mxu1 %v4759_v4 }
  0x7e   : > { %v2335_v44 = vrot.slane %v2333_v32, 4  ;;  %v2338_v39 = vrot.slane %v2336_v35, 5  ;;  %3118 = vrot.lane.b32.xlu0 %v4432_v7, %s4916_s29  ;;  %v4341_v50 = vcombine.low %v861_v11, %v871_v21  ;;  %v659_v32 = vsel %vm5040_vm12, %v372_v51, %v658_v25  ;;  %v4760_v35 = vld [vmem:[%s7478_s1 + $0x20] sm:$0xff]  }
  0x7f   : > { %v5489_v22 = vld [vmem:[#allocation2 + $0xbc] sm:$0x1]  ;;  %v2349_v2 = vor.u32 %v2348_v20, %v2344_v56  ;;  %660 = vst [vmem:[#allocation2 + $0x30] sm:$0xf] %v659_v32  ;;  %v1269_v40 = vrot.slane %v1267_v38, 4  ;;  %v1876_v51 = vsel %vm5020_vm9, %v4293_v47, %v1875_v0  ;;  %v380_v60 = vor.u32 %v378_v37, %v5491_v55  ;;  %4518 = vmatpush3.bf16.msra.mxu0 %v4760_v35 }
  0x80   : > { %7560 = vst [vmem:[#allocation16_spill] sm:$0xff] %v5489_v22  ;;  %v2339_v31 = vor.u32 %v2338_v39, %v2335_v44  ;;  %v2352_v62 = vshll.u32 %v5489_v22, 16  ;;  %2696 = vrot.lane.b32.xlu1 %v4341_v50, %s4917_s30  ;;  %v243_v39 = vsel %vm5001_vm5, 0, %v242_v9  ;;  %v5509_v44 = vld [vmem:[#allocation2 + $0x24] sm:$0xf]  ;;  %4687 = vmatpush3.bf16.msra.mxu1 %v4760_v35  ;;  %v5523_v37 = vrot.slane %v1730_v49, 4 }
  0x81   : > { %v2350_v17 = vrot.slane %v2349_v2, 4  ;;  %v1271_v38 = vsel %vm5020_vm9, %v1269_v40, %v1270_v54  ;;  %244 = vst [vmem:[#allocation2 + $0x38] sm:$0x1] %v243_v39  ;;  %v777_v0 = vld [vmem:[#allocation2 + $0xa8] sm:$0xf]  ;;  %v381_v20 = vsel %vm5056_vm14, %v373_v28, %v380_v60  ;;  %v4373_v25 = vcombine.low %v5509_v44, %v5394_v41 }
  0x82   : > { %v2340_v7 = vrot.slane %v2339_v31, 4  ;;  %v2354_v11 = vrot.slane %v2352_v62, 5  ;;  %v5517_v47 = vld [vmem:[#allocation2 + $0xac] sm:$0xf]  ;;  %7561 = vst [vmem:[#allocation17_spill] sm:$0xff] %v5523_v37  ;;  %v4357_v21 = vcombine.low %v1268_v23, %v1271_v38  ;;  %v4405_v54 = vcombine.low %v1876_v51, %v1879_v5 }
  0x83   : > { %661 = vst.msk [vmem:[#allocation2 + $0x34] sm:$0xf] %vm170_vm0, %v381_v20  ;;  %v382_v4 = vrot.slane %v5491_v55, 4  ;;  %v5541_v2 = vld [vmem:[#allocation2 + $0xb4] sm:$0xe]  ;;  %v1137_v28 = vshrl.u32 %v777_v0, 16 }
  0x84   : > { %v2345_v10 = vsel %vm5047_vm13, %v2340_v7, %v2344_v56  ;;  %v2355_v50 = vsel %vm5047_vm13, %v2350_v17, %v2354_v11  ;;  %2776 = vrot.lane.b32.xlu1 %v4357_v21, %s4916_s29  ;;  %v5543_v56 = vld [vmem:[#allocation2 + $0xbc] sm:$0x1]  ;;  %v1140_v32 = vshll.u32 %v777_v0, 16  ;;  %v1146_v35 = vshll.u32 %v5517_v47, 16  ;;  %v228_v7 = vld [vmem:[#allocation2 + $0xc0] sm:$0x1] }
  0x85   : > { %v4448_v49 = vcombine.low %v2345_v10, %v2355_v50  ;;  %7562 = vst [vmem:[#allocation18_spill] sm:$0xff] %v5543_v56  ;;  %v1150_v41 = vshrl.u32 %v5517_v47, 16  ;;  %v1460_v62 = vshrl.u32 %v5509_v44, 16  ;;  %v1959_v55 = vrot.slane %v5536_v29, 5  ;;  %v4761_v20 = vld [vmem:[%s7478_s1 + $0x68] sm:$0xff]  }
  0x86   : > { %v1976_v31 = vld [vmem:[#allocation2 + $0x30] sm:$0xf]  ;;  %v1156_v40 = vshll.u32 %v5527_v57, 16  ;;  %v1139_v60 = vrot.slane %v1137_v28, 4  ;;  %v1142_v39 = vrot.slane %v1140_v32, 5  ;;  %v1148_v38 = vrot.slane %v1146_v35, 5  ;;  %4519 = vmatprep.subr.bf16.mxu0 %v4761_v20  ;;  %4680 = vmatprep.subr.bf16.mxu1 %v4761_v20 }
  0x87   : > { %3198 = vrot.lane.b32.xlu0 %v4448_v49, %s4918_s4  ;;  %v2069_v17 = vshrl.u32 %v1976_v31, 16  ;;  %v2072_v51 = vshll.u32 %v1976_v31, 16  ;;  %v1152_v0 = vrot.slane %v1150_v41, 4  ;;  %v311_v28 = vld [vmem:[%s5027_s28 + $0x78] sm:$0xf]  ;;  %v229_v12 = vsel %vm4993_vm3, 0, %v228_v7 }
  0x88   : > { %v662_v11 = vld [vmem:[#allocation2 + $0x38] sm:$0x1]  ;;  %2872 = vrot.lane.b32.xlu1 %v4373_v25, %s4918_s4  ;;  %v1143_v32 = vor.u32 %v1142_v39, %v1139_v60  ;;  %v1158_v41 = vrot.slane %v1156_v40, 5  ;;  %v312_v9 = vld [vmem:[%s5027_s28 + $0x7c] sm:$0xf]  ;;  %v574_v49 = vshll.u32 %v311_v28, 16 }
  0x89   : > { %v2071_v21 = vrot.slane %v2069_v17, 4  ;;  %v2074_v10 = vrot.slane %v2072_v51, 5  ;;  %v663_v50 = vsel %vm4993_vm3, %v382_v4, %v662_v11  ;;  %v1153_v35 = vor.u32 %v1152_v0, %v1148_v38  ;;  %230 = vst [vmem:[#allocation2 + $0xc0] sm:$0x1] %v229_v12  ;;  %v278_v23 = vld [vmem:[#allocation2 + $0xc8] sm:$0x1] }
  0x8a   : > { %v5562_v25 = vld [vmem:[#allocation2 + $0x34] sm:$0xf]  ;;  %664 = vst [vmem:[#allocation2 + $0x38] sm:$0x1] %v663_v50  ;;  %v1961_v11 = vrot.slane %v1959_v55, 4  ;;  %v1144_v39 = vrot.slane %v1143_v32, 4 }
  0x8b   : > { %3000 = vrot.lane.b32.xlu0 %v4405_v54, %s4917_s30  ;;  %7563 = vst [vmem:[#allocation19_spill] sm:$0xff] %v5562_v25  ;;  %v2082_v17 = vshrl.u32 %v5562_v25, 16  ;;  %v4421_v4 = vcombine.low %v1976_v31, %v5562_v25  ;;  %v2075_v51 = vor.u32 %v2074_v10, %v2071_v21  ;;  %v1198_v54 = vld [vmem:[#allocation2 + $0xa8] sm:$0xe]  ;;  %v2078_v60 = vshll.u32 %v5562_v25, 16 }
  0x8c   : > { %v1154_v40 = vrot.slane %v1153_v35, 4  ;;  %v571_v0 = vshrl.u32 %v311_v28, 16  ;;  %v579_v5 = vshrl.u32 %v312_v9, 16  ;;  %v1149_v21 = vsel %vm5047_vm13, %v1144_v39, %v1148_v38  ;;  %v4762_v10 = vld [vmem:[%s7478_s1 + $0x28] sm:$0xff]   ;;  %v4763_v28 = vld [vmem:[%s7478_s1 + $0x70] sm:$0xff]  }
  0x8d   : > { %v5572_v50 = vrot.slane %v2075_v51, 4  ;;  %v2084_v7 = vrot.slane %v2082_v17, 4  ;;  %v2080_v31 = vrot.slane %v2078_v60, 5  ;;  %v582_v17 = vshll.u32 %v312_v9, 16  ;;  %4520 = vmatpush3.bf16.msra.mxu0 %v4762_v10  ;;  %4688 = vmatpush3.bf16.msra.mxu1 %v4762_v10 }
  0x8e   : > { %v1159_v12 = vsel %vm5047_vm13, %v1154_v40, %v1158_v41  ;;  %v573_v20 = vrot.slane %v571_v0, 7  ;;  %v5585_v35 = vrot.slane %v579_v5, 7  ;;  %v4764_v41 = vld [vmem:[%s7478_s1 + $0x30] sm:$0xff]   ;;  %v5592_v40 = vrot.slane %v1460_v62, 4  ;;  %4521 = vmatprep.subr.bf16.mxu0 %v4763_v28  ;;  %4681 = vmatprep.subr.bf16.mxu1 %v4763_v28 }
  0x8f   : > { %3096 = vrot.lane.b32.xlu0 %v4421_v4, %s4916_s29  ;;  %v4353_v32 = vcombine.low %v1149_v21, %v1159_v12  ;;  %v4289_v4 = vrot.slane %v1198_v54, 9  ;;  %v2085_v51 = vor.u32 %v2084_v7, %v2080_v31  ;;  %v1351_v9 = vrot.slane %v5517_v47, 5 }
  0x90   : > { %v576_v60 = vor.u32 %v574_v49, %v573_v20  ;;  %v577_v38 = vrot.slane %v573_v20, 4  ;;  %v584_v5 = vor.u32 %v582_v17, %v5585_v35  ;;  %v1354_v54 = vrot.slane %v5527_v57, 5  ;;  %v742_v12 = vld [vmem:[#allocation2 + $0xc0] sm:$0xf]  ;;  %v755_v17 = vld [vmem:[#allocation2 + $0x24] sm:$0xf] }
  0x91   : > { %v5590_v39 = vld [vmem:[#allocation2 + $0x38] sm:$0x1]  ;;  %2720 = vrot.lane.b32.xlu1 %v4353_v32, %s4917_s30  ;;  %v2086_v49 = vrot.slane %v2085_v51, 4  ;;  %v7565_v7 = vshll.u32 %v5509_v44, 16  ;;  %v279_v62 = vsel %vm5001_vm5, 0, %v278_v23  ;;  %v1352_v57 = vsel %vm5020_vm9, %v4289_v4, %v1351_v9  ;;  %4522 = vmatpush3.bf16.msra.mxu0 %v4764_v41 }
  0x92   : > { %7564 = vst [vmem:[#allocation20_spill] sm:$0xff] %v5590_v39  ;;  %v2088_v0 = vshll.u32 %v5590_v39, 16  ;;  %v585_v20 = vsel %vm5056_vm14, %v577_v38, %v584_v5  ;;  %v743_v47 = vsel %vm5040_vm12, %v576_v60, %v742_v12  ;;  %v1353_v10 = vrot.slane %v1351_v9, 4  ;;  %280 = vst [vmem:[#allocation2 + $0xc8] sm:$0x1] %v279_v62  ;;  %v4766_v23 = vld [vmem:[%s7478_s1 + $0x78] sm:$0xff]   ;;  %4689 = vmatpush3.bf16.msra.mxu1 %v4764_v41 }
  0x93   : > { %v5601_v21 = vrot.slane %v7565_v7, 5  ;;  %v1391_v32 = vld [vmem:[#allocation2 + $0xb4] sm:$0xf]  ;;  %v2081_v28 = vsel %vm5047_vm13, %v5572_v50, %v2080_v31  ;;  %v7566_v60 = vrot.slane %v5541_v2, 9  ;;  %v7567_v38 = vrot.slane %v5543_v56, 5  ;;  %v4767_v50 = vld [vmem:[%s7478_s1 + $0x38] sm:$0xff]   ;;  %4523 = vmatprep.subr.bf16.mxu0 %v4766_v23  ;;  %4682 = vmatprep.subr.bf16.mxu1 %v4766_v23 }
  0x94   : > { %v5611_v44 = vld [vmem:[#allocation2 + $0x34] sm:$0xf]  ;;  %v2090_v51 = vrot.slane %v2088_v0, 5  ;;  %744 = vst [vmem:[#allocation2 + $0xc0] sm:$0xf] %v743_v47  ;;  %v1748_v31 = vshrl.u32 %v1391_v32, 16 }
  0x95   : > { %v1960_v4 = vsel %vm5020_vm9, %v7566_v60, %v1959_v55  ;;  %v1963_v5 = vsel %vm5020_vm9, %v1961_v11, %v7567_v38  ;;  %745 = vst.msk [vmem:[#allocation2 + $0xc4] sm:$0xf] %vm170_vm0, %v585_v20  ;;  %v1798_v9 = vld [vmem:[#allocation2 + $0x30] sm:$0xe]  ;;  %v1355_v55 = vsel %vm5020_vm9, %v1353_v10, %v1354_v54  ;;  %v1751_v0 = vshll.u32 %v1391_v32, 16  ;;  %4524 = vmatpush3.bf16.msra.mxu0 %v4767_v50 }
  0x96   : > { %v5636_v7 = vld [vmem:[#allocation2 + $0x28] sm:$0xf]  ;;  %v2091_v11 = vsel %vm5047_vm13, %v2086_v49, %v2090_v51  ;;  %v4369_v62 = vcombine.low %v1352_v57, %v1355_v55  ;;  %v1882_v41 = vrot.slane %v5611_v44, 5  ;;  %v5643_v20 = vld [vmem:[#allocation2 + $0x2c] sm:$0x1]  ;;  %v4417_v54 = vcombine.low %v1960_v4, %v1963_v5  ;;  %4690 = vmatpush3.bf16.msra.mxu1 %v4767_v50 }
  0x97   : > { %v195_v47 = vld [vmem:[#allocation2 + $0x3c] sm:$0x1]  ;;  %v4437_v60 = vcombine.low %v2081_v28, %v2091_v11  ;;  %v586_v10 = vrot.slane %v5585_v35, 4  ;;  %v5646_v38 = vld [vmem:[#allocation2 + $0x38] sm:$0x1]  ;;  %v4294_v2 = vrot.slane %v1798_v9, 9  ;;  %v4385_v49 = vcombine.low %v1391_v32, %v5536_v29 }
  0x98   : > { %7568 = vst [vmem:[#allocation21_spill] sm:$0xff] %v5646_v38  ;;  %2800 = vrot.lane.b32.xlu1 %v4369_v62, %s4916_s29  ;;  %v873_v23 = vshrl.u32 %v755_v17, 16  ;;  %v876_v51 = vshll.u32 %v755_v17, 16  ;;  %v882_v57 = vshll.u32 %v5636_v7, 16  ;;  %v5652_v55 = vrot.slane %v1748_v31, 4 }
  0x99   : > { %3176 = vrot.lane.b32.xlu0 %v4437_v60, %s4918_s4  ;;  %v5654_v28 = vrot.slane %v1751_v0, 5  ;;  %v886_v35 = vshrl.u32 %v5636_v7, 16  ;;  %v196_v4 = vsel %vm4993_vm3, 0, %v195_v47  ;;  %v746_v5 = vld [vmem:[#allocation2 + $0xc8] sm:$0x1]  ;;  %v1884_v9 = vrot.slane %v1882_v41, 4 }
  0x9a   : > { %v875_v29 = vrot.slane %v873_v23, 4  ;;  %v878_v32 = vrot.slane %v876_v51, 5  ;;  %v892_v17 = vshll.u32 %v5643_v20, 16  ;;  %197 = vst [vmem:[#allocation2 + $0x3c] sm:$0x1] %v196_v4  ;;  %v747_v31 = vsel %vm4993_vm3, %v586_v10, %v746_v5 }
  0x9b   : > { %v2000_v11 = vld [vmem:[#allocation2 + $0xc0] sm:$0xf]  ;;  %v5666_v0 = vsel %vm5020_vm9, %v4294_v2, %v1882_v41  ;;  %v884_v50 = vrot.slane %v882_v57, 5  ;;  %v888_v47 = vrot.slane %v886_v35, 4  ;;  %748 = vst [vmem:[#allocation2 + $0xc8] sm:$0x1] %v747_v31 }
  0x9c   : > { %v5660_v62 = vld [vmem:[#allocation2 + $0xc4] sm:$0xf]  ;;  %v2357_v60 = vshrl.u32 %v2000_v11, 16  ;;  %v2360_v23 = vshll.u32 %v2000_v11, 16  ;;  %2896 = vrot.lane.b32.xlu1 %v4385_v49, %s4918_s4  ;;  %v1885_v4 = vrot.slane %v5646_v38, 5  ;;  %v879_v2 = vor.u32 %v878_v32, %v875_v29 }
  0x9d   : > { %7569 = vst [vmem:[#allocation22_spill] sm:$0xff] %v5660_v62  ;;  %v2370_v51 = vshrl.u32 %v5660_v62, 16  ;;  %v289_v12 = vld [vmem:[%s5027_s28 + $0x20] sm:$0xf]  ;;  %3024 = vrot.lane.b32.xlu0 %v4417_v54, %s4917_s30  ;;  %v4433_v10 = vcombine.low %v2000_v11, %v5660_v62  ;;  %v2366_v5 = vshll.u32 %v5660_v62, 16  ;;  %v889_v41 = vor.u32 %v888_v47, %v884_v50 }
  0x9e   : > { %v290_v57 = vld [vmem:[%s5027_s28 + $0x24] sm:$0xf]  ;;  %v2359_v35 = vrot.slane %v2357_v60, 4  ;;  %v2362_v22 = vrot.slane %v2360_v23, 5  ;;  %v894_v61 = vrot.slane %v892_v17, 5  ;;  %v880_v31 = vrot.slane %v879_v2, 4 }
  0x9f   : > { %v2372_v63 = vrot.slane %v2370_v51, 4  ;;  %v2368_v48 = vrot.slane %v2366_v5, 5  ;;  %v890_v24 = vrot.slane %v889_v41, 4  ;;  %v384_v49 = vshrl.u32 %v289_v12, 16 }
  0xa0   : > { %v2363_v6 = vor.u32 %v2362_v22, %v2359_v35  ;;  %v387_v56 = vshll.u32 %v289_v12, 16  ;;  %v392_v34 = vshrl.u32 %v290_v57, 16  ;;  %v395_v54 = vshll.u32 %v290_v57, 16  ;;  %v1369_v35 = vld [vmem:[#allocation2 + $0x30] sm:$0xf] }
  0xa1   : > { %3120 = vrot.lane.b32.xlu0 %v4433_v10, %s4916_s29  ;;  %v2373_v11 = vor.u32 %v2372_v63, %v2368_v48  ;;  %v885_v29 = vsel %vm5047_vm13, %v880_v31, %v884_v50  ;;  %v895_v32 = vsel %vm5047_vm13, %v890_v24, %v894_v61  ;;  %v386_v47 = vrot.slane %v384_v49, 7  ;;  %v665_v51 = vld [vmem:[#allocation2 + $0x3c] sm:$0xf]  ;;  %v245_v50 = vld [vmem:[#allocation2 + $0x44] sm:$0x1] }
  0xa2   : > { %v2364_v17 = vrot.slane %v2363_v6, 4  ;;  %v4342_v60 = vcombine.low %v885_v29, %v895_v32  ;;  %v5681_v23 = vrot.slane %v392_v34, 7  ;;  %v4278_v5 = vrot.slane %v1187_v14, 9  ;;  %v5683_v22 = vld [vmem:[#allocation2 + $0xc8] sm:$0x1] }
  0xa3   : > { %7570 = vst [vmem:[#allocation23_spill] sm:$0xff] %v5683_v22  ;;  %v1754_v12 = vor.u32 %v5654_v28, %v5652_v55  ;;  %v389_v10 = vor.u32 %v387_v56, %v386_v47  ;;  %v390_v63 = vrot.slane %v386_v47, 4  ;;  %v1274_v2 = vrot.slane %v5636_v7, 5  ;;  %v779_v55 = vld [vmem:[#allocation2 + $0xb4] sm:$0xf] }
  0xa4   : > { %v2374_v41 = vrot.slane %v2373_v11, 4  ;;  %v2376_v24 = vshll.u32 %v5683_v22, 16  ;;  %v1886_v6 = vsel %vm5020_vm9, %v1884_v9, %v1885_v4  ;;  %2698 = vrot.lane.b32.xlu1 %v4342_v60, %s4917_s30  ;;  %v397_v34 = vor.u32 %v395_v54, %v5681_v23  ;;  %v5721_v60 = vld [vmem:[#allocation2 + $0xc4] sm:$0xf] }
  0xa5   : > { %v2369_v61 = vsel %vm5047_vm13, %v2364_v17, %v2368_v48  ;;  %v666_v14 = vsel %vm5040_vm12, %v389_v10, %v665_v51  ;;  %v1275_v56 = vsel %vm5020_vm9, %v4278_v5, %v1274_v2  ;;  %v1276_v7 = vrot.slane %v1274_v2, 4  ;;  %v5704_v48 = vld [vmem:[#allocation2 + $0xb8] sm:$0xf]  ;;  %v5723_v51 = vld [vmem:[#allocation2 + $0xc0] sm:$0xe] }
  0xa6   : > { %v2378_v28 = vrot.slane %v2376_v24, 5  ;;  %v398_v57 = vsel %vm5056_vm14, %v390_v63, %v397_v34  ;;  %667 = vst [vmem:[#allocation2 + $0x3c] sm:$0xf] %v666_v14  ;;  %v1277_v9 = vrot.slane %v5643_v20, 5  ;;  %v246_v4 = vsel %vm5001_vm5, 0, %v245_v50 }
  0xa7   : > { %v7571_v54 = vor.u32 %v5601_v21, %v5592_v40  ;;  %668 = vst.msk [vmem:[#allocation2 + $0x40] sm:$0xf] %vm170_vm0, %v398_v57  ;;  %247 = vst [vmem:[#allocation2 + $0x44] sm:$0x1] %v246_v4  ;;  %v5717_v32 = vrot.slane %v1754_v12, 4  ;;  %v1484_v17 = vshrl.u32 %v1369_v35, 16  ;;  %v4406_v21 = vcombine.low %v5666_v0, %v1886_v6 }
  0xa8   : > { %v2379_v20 = vsel %vm5047_vm13, %v2374_v41, %v2378_v28  ;;  %v1278_v47 = vsel %vm5020_vm9, %v1276_v7, %v1277_v9  ;;  %v4374_v10 = vcombine.low %v1369_v35, %v5611_v44  ;;  %v5727_v63 = vld [vmem:[#allocation2 + $0xc8] sm:$0x1]  ;;  %v5729_v2 = vld [vmem:[#allocation2 + $0xcc] sm:$0xf]  ;;  %v399_v12 = vrot.slane %v5681_v23, 4 }
  0xa9   : > { %v5711_v11 = vrot.slane %v7571_v54, 4  ;;  %7573 = vst [vmem:[#allocation25_spill] sm:$0xff] %v5717_v32  ;;  %v4449_v40 = vcombine.low %v2369_v61, %v2379_v20  ;;  %v4358_v5 = vcombine.low %v1275_v56, %v1278_v47  ;;  %7574 = vst [vmem:[#allocation26_spill] sm:$0xff] %v5727_v63  ;;  %v1487_v50 = vshll.u32 %v1369_v35, 16  ;;  %v5732_v41 = vld [vmem:[#allocation2 + $0xbc] sm:$0x1] }
  0xaa   : > { %v1161_v24 = vshrl.u32 %v779_v55, 16  ;;  %v1164_v34 = vshll.u32 %v779_v55, 16  ;;  %v1966_v6 = vrot.slane %v5721_v60, 5  ;;  %v1170_v44 = vshll.u32 %v5704_v48, 16 }
  0xab   : > { %7572 = vst [vmem:[#allocation24_spill] sm:$0xff] %v5711_v11  ;;  %3200 = vrot.lane.b32.xlu0 %v4449_v40, %s4918_s4  ;;  %2778 = vrot.lane.b32.xlu1 %v4358_v5, %s4916_s29  ;;  %v1174_v61 = vshrl.u32 %v5704_v48, 16  ;;  %v5740_v14 = vrot.slane %v1484_v17, 4  ;;  %v1969_v23 = vrot.slane %v5727_v63, 5  ;;  %v1180_v9 = vshll.u32 %v5732_v41, 16 }
  0xac   : > { %v1163_v56 = vrot.slane %v1161_v24, 4  ;;  %v1166_v7 = vrot.slane %v1164_v34, 5  ;;  %v1172_v55 = vrot.slane %v1170_v44, 5  ;;  %v2381_v4 = vshrl.u32 %v5729_v2, 16  ;;  %v5753_v44 = vld [vmem:[#allocation2 + $0xd0] sm:$0xf] }
  0xad   : > { %v1978_v28 = vld [vmem:[#allocation2 + $0x3c] sm:$0xf]  ;;  %v1176_v57 = vrot.slane %v1174_v61, 4  ;;  %v1489_v34 = vrot.slane %v1487_v50, 5  ;;  %7576 = vst [vmem:[#allocation28_spill] sm:$0xff] %v5753_v44  ;;  %v1968_v29 = vrot.slane %v1966_v6, 4 }
  0xae   : > { %v5745_v35 = vld [vmem:[#allocation2 + $0x40] sm:$0xf]  ;;  %v2093_v54 = vshrl.u32 %v1978_v28, 16  ;;  %v2096_v20 = vshll.u32 %v1978_v28, 16  ;;  %v669_v47 = vld [vmem:[#allocation2 + $0x44] sm:$0x1]  ;;  %v1167_v40 = vor.u32 %v1166_v7, %v1163_v56 }
  0xaf   : > { %7575 = vst [vmem:[#allocation27_spill] sm:$0xff] %v5745_v35  ;;  %3002 = vrot.lane.b32.xlu0 %v4406_v21, %s4917_s30  ;;  %v2106_v17 = vshrl.u32 %v5745_v35, 16  ;;  %v4422_v5 = vcombine.low %v1978_v28, %v5745_v35  ;;  %v670_v24 = vsel %vm4993_vm3, %v399_v12, %v669_v47  ;;  %2874 = vrot.lane.b32.xlu1 %v4374_v10, %s4918_s4  ;;  %v2102_v31 = vshll.u32 %v5745_v35, 16  ;;  %v1199_v7 = vld [vmem:[#allocation2 + $0xb4] sm:$0xe] }
  0xb0   : > { %v2095_v61 = vrot.slane %v2093_v54, 4  ;;  %v2098_v49 = vrot.slane %v2096_v20, 5  ;;  %671 = vst [vmem:[#allocation2 + $0x44] sm:$0x1] %v670_v24  ;;  %v1168_v56 = vrot.slane %v1167_v40, 4  ;;  %v1177_v28 = vor.u32 %v1176_v57, %v1172_v55 }
  0xb1   : > { %v2108_v21 = vrot.slane %v2106_v17, 4  ;;  %v1182_v0 = vrot.slane %v1180_v9, 5  ;;  %v2104_v12 = vrot.slane %v2102_v31, 5  ;;  %v2383_v50 = vrot.slane %v2381_v4, 4  ;;  %v5764_v9 = vld [vmem:[#allocation2 + $0xd4] sm:$0x1] }
  0xb2   : > { %v2099_v39 = vor.u32 %v2098_v49, %v2095_v61  ;;  %v2384_v10 = vshll.u32 %v5729_v2, 16  ;;  %v1173_v54 = vsel %vm5047_vm13, %v1168_v56, %v1172_v55  ;;  %v1178_v20 = vrot.slane %v1177_v28, 4  ;;  %7577 = vst [vmem:[#allocation29_spill] sm:$0xff] %v5764_v9  ;;  %v292_v55 = vld [vmem:[%s5027_s28 + $0x2c] sm:$0xf] }
  0xb3   : > { %3098 = vrot.lane.b32.xlu0 %v4422_v5, %s4916_s29  ;;  %v2394_v47 = vshrl.u32 %v5753_v44, 16  ;;  %v4290_v40 = vrot.slane %v1199_v7, 9  ;;  %v2109_v24 = vor.u32 %v2108_v21, %v2104_v12  ;;  %v1358_v57 = vrot.slane %v5704_v48, 5 }
  0xb4   : > { %v2100_v17 = vrot.slane %v2099_v39, 4  ;;  %v2386_v25 = vrot.slane %v2384_v10, 5  ;;  %v1183_v31 = vsel %vm5047_vm13, %v1178_v20, %v1182_v0  ;;  %v1361_v49 = vrot.slane %v5732_v41, 5 }
  0xb5   : > { %v2390_v4 = vshll.u32 %v5753_v44, 16  ;;  %v2396_v5 = vrot.slane %v2394_v47, 4  ;;  %v1490_v61 = vor.u32 %v1489_v34, %v5740_v14  ;;  %v4354_v56 = vcombine.low %v1173_v54, %v1183_v31 }
  0xb6   : > { %v1359_v39 = vsel %vm5020_vm9, %v4290_v40, %v1358_v57  ;;  %v1360_v48 = vrot.slane %v1358_v57, 4  ;;  %v2387_v21 = vor.u32 %v2386_v25, %v2383_v50  ;;  %v2400_v0 = vshll.u32 %v5764_v9, 16  ;;  %v5789_v25 = vld [vmem:[#allocation2 + $0xc0] sm:$0xf] }
  0xb7   : > { %v5774_v7 = vld [vmem:[#allocation2 + $0x44] sm:$0x1]  ;;  %v5776_v28 = vrot.slane %v2390_v4, 5  ;;  %v2110_v41 = vrot.slane %v2109_v24, 4  ;;  %v7579_v20 = vrot.slane %v5723_v51, 9  ;;  %v1970_v34 = vsel %vm5020_vm9, %v1968_v29, %v1969_v23  ;;  %2722 = vrot.lane.b32.xlu1 %v4354_v56, %s4917_s30  ;;  %v5799_v24 = vpop.permute.xlu1 %2772 }
  0xb8   : > { %7578 = vst [vmem:[#allocation30_spill] sm:$0xff] %v5774_v7  ;;  %v2112_v10 = vshll.u32 %v5774_v7, 16  ;;  %v2105_v50 = vsel %vm5047_vm13, %v2100_v17, %v2104_v12  ;;  %v1362_v54 = vsel %vm5020_vm9, %v1360_v48, %v1361_v49  ;;  %v1772_v51 = vshrl.u32 %v5789_v25, 16  ;;  %v5797_v40 = vld [vmem:[#allocation2 + $0x40] sm:$0xf] }
  0xb9   : > { %v1967_v14 = vsel %vm5020_vm9, %v7579_v20, %v1966_v6  ;;  %v2397_v47 = vor.u32 %v2396_v5, %v5776_v28  ;;  %v757_v6 = vld [vmem:[#allocation2 + $0x30] sm:$0xf]  ;;  %v4370_v23 = vcombine.low %v1359_v39, %v1362_v54  ;;  %v5801_v57 = vrot.slane %v2387_v21, 4  ;;  %v1799_v4 = vld [vmem:[#allocation2 + $0x3c] sm:$0xe] }
  0xba   : > { %v2114_v29 = vrot.slane %v2112_v10, 5  ;;  %v5803_v31 = vrot.slane %v2400_v0, 5  ;;  %v5806_v17 = vrot.slane %v1490_v61, 4  ;;  %v4418_v48 = vcombine.low %v1967_v14, %v1970_v34  ;;  %v5815_v0 = vld [vmem:[#allocation2 + $0x34] sm:$0xf] }
  0xbb   : > { %v2398_v5 = vrot.slane %v2397_v47, 4  ;;  %2802 = vrot.lane.b32.xlu1 %v4370_v23, %s4916_s29  ;;  %v4386_v39 = vcombine.low %v5789_v25, %v5721_v60  ;;  %v1889_v21 = vrot.slane %v5797_v40, 5  ;;  %v198_v10 = vld [vmem:[#allocation2 + $0x48] sm:$0x1]  ;;  %v4434_v20 = vcombine.low %v5729_v2, %v5753_v44  ;;  %v5819_v54 = vld [vmem:[#allocation2 + $0x44] sm:$0x1]  ;;  %v5838_v47 = vpop.permute.xlu1 %3092 }
  0xbc   : > { %7580 = vst [vmem:[#allocation31_spill] sm:$0xff] %v5806_v17  ;;  %v2115_v56 = vsel %vm5047_vm13, %v2110_v41, %v2114_v29  ;;  %7581 = vst [vmem:[#allocation32_spill] sm:$0xff] %v5819_v54  ;;  %v4295_v41 = vrot.slane %v1799_v4, 9  ;;  %v5821_v14 = vld [vmem:[#allocation2 + $0x38] sm:$0x1]  ;;  %v897_v34 = vshrl.u32 %v757_v6, 16  ;;  %v2393_v60 = vsel %vm5047_vm13, %v5801_v57, %v5776_v28 }
  0xbd   : > { %v4438_v61 = vcombine.low %v2105_v50, %v2115_v56  ;;  %v2403_v50 = vsel %vm5047_vm13, %v2398_v5, %v5803_v31  ;;  %v5831_v29 = vrot.slane %v1772_v51, 4  ;;  %v291_v2 = vld [vmem:[%s5027_s28 + $0x28] sm:$0xf]  ;;  %v900_v4 = vshll.u32 %v757_v6, 16  ;;  %v1188_v5 = vld [vmem:[#allocation2 + $0x30] sm:$0xe] }
  0xbe   : > { %v899_v23 = vrot.slane %v897_v34, 4  ;;  %v906_v56 = vshll.u32 %v5815_v0, 16  ;;  %v910_v12 = vshrl.u32 %v5815_v0, 16  ;;  %v1891_v28 = vrot.slane %v1889_v21, 4  ;;  %v248_v17 = vld [vmem:[#allocation2 + $0x50] sm:$0x1] }
  0xbf   : > { %3178 = vrot.lane.b32.xlu0 %v4438_v61, %s4918_s4  ;;  %2898 = vrot.lane.b32.xlu1 %v4386_v39, %s4918_s4  ;;  %v1892_v57 = vrot.slane %v5819_v54, 5  ;;  %v916_v51 = vshll.u32 %v5821_v14, 16  ;;  %v199_v31 = vsel %vm4993_vm3, 0, %v198_v10  ;;  %v5845_v61 = vpop.permute.xlu0 %2692  ;;  %v5849_v6 = vsel %vm5020_vm9, %v4295_v41, %v1889_v21 }
  0xc0   : > { %v902_v34 = vrot.slane %v900_v4, 5  ;;  %v908_v49 = vrot.slane %v906_v56, 5  ;;  %v912_v22 = vrot.slane %v910_v12, 4  ;;  %200 = vst [vmem:[#allocation2 + $0x48] sm:$0x1] %v199_v31  ;;  %v401_v62 = vshrl.u32 %v291_v2, 16 }
  0xc1   : > { %v918_v39 = vrot.slane %v916_v51, 5  ;;  %v404_v35 = vshll.u32 %v291_v2, 16  ;;  %v409_v63 = vshrl.u32 %v292_v55, 16  ;;  %v412_v32 = vshll.u32 %v292_v55, 16 }
  0xc2   : > { %v903_v38 = vor.u32 %v902_v34, %v899_v23  ;;  %v913_v10 = vor.u32 %v912_v22, %v908_v49  ;;  %v4279_v33 = vrot.slane %v1188_v5, 9  ;;  %v5854_v11 = vsel %vm5020_vm9, %v1891_v28, %v1892_v57  ;;  %v759_v28 = vld [vmem:[#allocation2 + $0x3c] sm:$0xf]  ;;  %v201_v57 = vld [vmem:[#allocation2 + $0x54] sm:$0x1] }
  0xc3   : > { %3026 = vrot.lane.b32.xlu0 %v4418_v48, %s4917_s30  ;;  %v403_v21 = vrot.slane %v401_v62, 7  ;;  %v411_v41 = vrot.slane %v409_v63, 7  ;;  %v1281_v12 = vrot.slane %v5815_v0, 5  ;;  %v1284_v2 = vrot.slane %v5821_v14, 5  ;;  %v5860_v48 = vpop.permute.xlu1 %2868  ;;  %v5862_v62 = vpop.permute.xlu0 %3116  ;;  %v5871_v0 = vld [vmem:[#allocation2 + $0x3c] sm:$0xf] }
  0xc4   : > { %v904_v4 = vrot.slane %v903_v38, 4  ;;  %v914_v56 = vrot.slane %v913_v10, 4  ;;  %v249_v51 = vsel %vm5001_vm5, 0, %v248_v17  ;;  %v4450_v22 = vcombine.low %v2393_v60, %v2403_v50  ;;  %v5880_v5 = vld [vmem:[#allocation2 + $0x44] sm:$0x1] }
  0xc5   : > { %v406_v55 = vor.u32 %v404_v35, %v403_v21  ;;  %v407_v23 = vrot.slane %v403_v21, 4  ;;  %v414_v31 = vor.u32 %v412_v32, %v411_v41  ;;  %250 = vst [vmem:[#allocation2 + $0x50] sm:$0x1] %v249_v51  ;;  %v1282_v17 = vsel %vm5020_vm9, %v4279_v33, %v1281_v12  ;;  %v5873_v32 = vld [vmem:[#allocation2 + $0x40] sm:$0xf] }
  0xc6   : > { %v909_v38 = vsel %vm5047_vm13, %v904_v4, %v908_v49  ;;  %v919_v63 = vsel %vm5047_vm13, %v914_v56, %v918_v39  ;;  %v1283_v35 = vrot.slane %v1281_v12, 4  ;;  %v1775_v14 = vshll.u32 %v5789_v25, 16  ;;  %v294_v4 = vld [vmem:[%s5027_s28 + $0x34] sm:$0xf] }
  0xc7   : > { %3122 = vrot.lane.b32.xlu0 %v4434_v20, %s4916_s29  ;;  %v4407_v20 = vcombine.low %v5849_v6, %v5854_v11  ;;  %v4343_v60 = vcombine.low %v909_v38, %v919_v63  ;;  %v415_v49 = vsel %vm5056_vm14, %v407_v23, %v414_v31  ;;  %v672_v50 = vld [vmem:[#allocation2 + $0x48] sm:$0xf]  ;;  %v1508_v25 = vshrl.u32 %v5871_v0, 16  ;;  %v293_v11 = vld [vmem:[%s5027_s28 + $0x30] sm:$0xf]  ;;  %v5897_v23 = vpop.permute.xlu1 %2892  ;;  %v5903_v63 = vpop.permute.xlu0 %3094 }
  0xc8   : > { %v673_v33 = vsel %vm5040_vm12, %v406_v55, %v672_v50  ;;  %675 = vst.msk [vmem:[#allocation2 + $0x4c] sm:$0xf] %vm170_vm0, %v415_v49  ;;  %v1285_v34 = vsel %vm5020_vm9, %v1283_v35, %v1284_v2  ;;  %v921_v39 = vshrl.u32 %v759_v28, 16  ;;  %v416_v6 = vrot.slane %v411_v41, 4  ;;  %7582 = vst [vmem:[#allocation33_spill] sm:$0xff] %v5897_v23 }
  0xc9   : > { %2700 = vrot.lane.b32.xlu1 %v4343_v60, %s4917_s30  ;;  %674 = vst [vmem:[#allocation2 + $0x48] sm:$0xf] %v673_v33  ;;  %v4359_v10 = vcombine.low %v1282_v17, %v1285_v34  ;;  %v924_v21 = vshll.u32 %v759_v28, 16  ;;  %v930_v12 = vshll.u32 %v5873_v32, 16  ;;  %v934_v51 = vshrl.u32 %v5873_v32, 16  ;;  %7583 = vst [vmem:[#allocation34_spill] sm:$0xff] %v5903_v63 }
  0xca   : > { %v923_v56 = vrot.slane %v921_v39, 4  ;;  %v940_v2 = vshll.u32 %v5880_v5, 16  ;;  %v202_v55 = vsel %vm4993_vm3, 0, %v201_v57  ;;  %v5899_v31 = vrot.slane %v1775_v14, 5 }
  0xcb   : > { %3202 = vrot.lane.b32.xlu0 %v4450_v22, %s4918_s4  ;;  %v926_v41 = vrot.slane %v924_v21, 5  ;;  %v5901_v38 = vrot.slane %v930_v12, 5  ;;  %203 = vst [vmem:[#allocation2 + $0x54] sm:$0x1] %v202_v55  ;;  %v418_v28 = vshrl.u32 %v293_v11, 16  ;;  %v936_v35 = vrot.slane %v934_v51, 4 }
  0xcc   : > { %v676_v17 = vld [vmem:[#allocation2 + $0x50] sm:$0x1]  ;;  %v421_v60 = vshll.u32 %v293_v11, 16  ;;  %v426_v49 = vshrl.u32 %v294_v4, 16  ;;  %v4375_v14 = vcombine.low %v5871_v0, %v5797_v40  ;;  %v5913_v39 = vrot.slane %v1508_v25, 4 }
  0xcd   : > { %2780 = vrot.lane.b32.xlu1 %v4359_v10, %s4916_s29  ;;  %v677_v57 = vsel %vm4993_vm3, %v416_v6, %v676_v17  ;;  %v927_v50 = vor.u32 %v926_v41, %v923_v56  ;;  %v420_v33 = vrot.slane %v418_v28, 7  ;;  %v1511_v11 = vshll.u32 %v5871_v0, 16 }
  0xce   : > { %678 = vst [vmem:[#allocation2 + $0x50] sm:$0x1] %v677_v57  ;;  %v942_v21 = vrot.slane %v940_v2, 5  ;;  %v937_v40 = vor.u32 %v936_v35, %v5901_v38  ;;  %v5923_v56 = vrot.slane %v426_v49, 7  ;;  %v429_v51 = vshll.u32 %v294_v4, 16  ;;  %v5927_v2 = vpop.permute.xlu1 %2870  ;;  %v5931_v49 = vpop.permute.xlu0 %2996 }
  0xcf   : > { %3004 = vrot.lane.b32.xlu0 %v4407_v20, %s4917_s30  ;;  %v5918_v12 = vld [vmem:[#allocation2 + $0x4c] sm:$0xf]  ;;  %v928_v41 = vrot.slane %v927_v50, 4  ;;  %v423_v0 = vor.u32 %v421_v60, %v420_v33  ;;  %7585 = vst [vmem:[#allocation36_spill] sm:$0xff] %v5927_v2  ;;  %v424_v22 = vrot.slane %v420_v33, 4  ;;  %v1513_v10 = vrot.slane %v1511_v11, 5 }
  0xd0   : > { %7584 = vst [vmem:[#allocation35_spill] sm:$0xff] %v5918_v12  ;;  %v5920_v6 = vld [vmem:[#allocation2 + $0x4c] sm:$0xf]  ;;  %v1980_v55 = vld [vmem:[#allocation2 + $0x48] sm:$0xf]  ;;  %v2130_v20 = vshrl.u32 %v5918_v12, 16 }
  0xd1   : > { %v2126_v25 = vshll.u32 %v5918_v12, 16  ;;  %v2117_v28 = vshrl.u32 %v1980_v55, 16  ;;  %v2120_v17 = vshll.u32 %v1980_v55, 16  ;;  %v4423_v57 = vcombine.low %v1980_v55, %v5918_v12  ;;  %2876 = vrot.lane.b32.xlu1 %v4375_v14, %s4918_s4  ;;  %v1189_v35 = vld [vmem:[#allocation2 + $0x3c] sm:$0xe] }
  0xd2   : > { %v2132_v34 = vrot.slane %v2130_v20, 4  ;;  %v1896_v44 = vrot.slane %v5920_v6, 5  ;;  %v679_v7 = vld [vmem:[#allocation2 + $0x54] sm:$0xf]  ;;  %v1800_v19 = vld [vmem:[#allocation2 + $0x48] sm:$0xe]  ;;  %v431_v55 = vor.u32 %v429_v51, %v5923_v56  ;;  %v933_v14 = vsel %vm5047_vm13, %v928_v41, %v5901_v38 }
  0xd3   : > { %v2128_v4 = vrot.slane %v2126_v25, 5  ;;  %v2119_v50 = vrot.slane %v2117_v28, 4  ;;  %v2122_v60 = vrot.slane %v2120_v17, 5  ;;  %3100 = vrot.lane.b32.xlu0 %v4423_v57, %s4916_s29  ;;  %v938_v37 = vrot.slane %v937_v40, 4  ;;  %v5952_v57 = vpop.permute.xlu1 %2796 }
  0xd4   : > { %v680_v33 = vsel %vm5040_vm12, %v423_v0, %v679_v7  ;;  %v4280_v11 = vrot.slane %v1189_v35, 9  ;;  %v432_v40 = vsel %vm5056_vm14, %v424_v22, %v431_v55  ;;  %v4296_v41 = vrot.slane %v1800_v19, 9  ;;  %v251_v0 = vld [vmem:[#allocation2 + $0x5c] sm:$0x1]  ;;  %7588 = vst [vmem:[#allocation39_spill] sm:$0xff] %v5952_v57  ;;  %v5956_v22 = vpop.permute.xlu0 %3020 }
  0xd5   : > { %v2133_v18 = vor.u32 %v2132_v34, %v2128_v4  ;;  %v5941_v20 = vld [vmem:[#allocation2 + $0x50] sm:$0x1]  ;;  %v2123_v25 = vor.u32 %v2122_v60, %v2119_v50  ;;  %v943_v17 = vsel %vm5047_vm13, %v938_v37, %v942_v21  ;;  %681 = vst [vmem:[#allocation2 + $0x54] sm:$0xf] %v680_v33  ;;  %v1288_v34 = vrot.slane %v5873_v32, 5 }
  0xd6   : > { %7586 = vst [vmem:[#allocation37_spill] sm:$0xff] %v5941_v20  ;;  %v5943_v28 = vld [vmem:[#allocation2 + $0x50] sm:$0x1]  ;;  %v2136_v38 = vshll.u32 %v5941_v20, 16  ;;  %v1898_v7 = vrot.slane %v1896_v44, 4  ;;  %v1514_v50 = vor.u32 %v1513_v10, %v5913_v39  ;;  %v4344_v21 = vcombine.low %v933_v14, %v943_v17 }
  0xd7   : > { %7587 = vst [vmem:[#allocation38_spill] sm:$0xff] %v5943_v28  ;;  %v2134_v51 = vrot.slane %v2133_v18, 4  ;;  %682 = vst.msk [vmem:[#allocation2 + $0x58] sm:$0xf] %vm170_vm0, %v432_v40  ;;  %v2124_v35 = vrot.slane %v2123_v25, 4  ;;  %v1899_v37 = vrot.slane %v5943_v28, 5  ;;  %v1289_v18 = vsel %vm5020_vm9, %v4280_v11, %v1288_v34 }
  0xd8   : > { %v2138_v60 = vrot.slane %v2136_v38, 5  ;;  %v1290_v32 = vrot.slane %v1288_v34, 4  ;;  %v1291_v19 = vrot.slane %v5880_v5, 5  ;;  %2702 = vrot.lane.b32.xlu1 %v4344_v21, %s4917_s30  ;;  %v252_v39 = vsel %vm5001_vm5, 0, %v251_v0  ;;  %v761_v10 = vld [vmem:[#allocation2 + $0x48] sm:$0xf] }
  0xd9   : > { %v2129_v25 = vsel %vm5047_vm13, %v2124_v35, %v2128_v4  ;;  %v1897_v11 = vsel %vm5020_vm9, %v4296_v41, %v1896_v44  ;;  %v1900_v5 = vsel %vm5020_vm9, %v1898_v7, %v1899_v37  ;;  %253 = vst [vmem:[#allocation2 + $0x5c] sm:$0x1] %v252_v39  ;;  %v1373_v4 = vld [vmem:[#allocation2 + $0x48] sm:$0xf]  ;;  %v7589_v0 = vor.u32 %v5899_v31, %v5831_v29  ;;  %v5983_v41 = vld [vmem:[#allocation2 + $0x4] sm:$0xf] }
  0xda   : > { %v2139_v14 = vsel %vm5047_vm13, %v2134_v51, %v2138_v60  ;;  %v1292_v17 = vsel %vm5020_vm9, %v1290_v32, %v1291_v19  ;;  %v1532_v38 = vshrl.u32 %v1373_v4, 16  ;;  %v1535_v35 = vshll.u32 %v1373_v4, 16  ;;  %v5985_v7 = vld [vmem:[#allocation2] sm:$0xf]  ;;  %v5989_v32 = vpop.permute.xlu1 %2774 }
  0xdb   : > { %v4439_v40 = vcombine.low %v2129_v25, %v2139_v14  ;;  %v4360_v34 = vcombine.low %v1289_v18, %v1292_v17  ;;  %v5979_v21 = vrot.slane %v7589_v0, 4  ;;  %v5981_v51 = vrot.slane %v1514_v50, 4  ;;  %7592 = vst [vmem:[#allocation42_spill] sm:$0xff] %v5989_v32  ;;  %v5996_v25 = vpop.permute.xlu0 %2998 }
  0xdc   : > { %v1982_v44 = vld [vmem:[#allocation2 + $0x54] sm:$0xf]  ;;  %v945_v60 = vshrl.u32 %v761_v10, 16  ;;  %v4408_v18 = vcombine.low %v1897_v11, %v1900_v5  ;;  %v4376_v50 = vcombine.low %v1373_v4, %v5920_v6  ;;  %7594 = vst [vmem:[#allocation44_spill] sm:$0xff] %v5996_v25  ;;  %v433_v14 = vrot.slane %v5923_v56, 4 }
  0xdd   : > { %7590 = vst [vmem:[#allocation40_spill] sm:$0xff] %v5979_v21  ;;  %7591 = vst [vmem:[#allocation41_spill] sm:$0xff] %v5981_v51  ;;  %3180 = vrot.lane.b32.xlu0 %v4439_v40, %s4918_s4  ;;  %v2141_v29 = vshrl.u32 %v1982_v44, 16  ;;  %v2144_v31 = vshll.u32 %v1982_v44, 16  ;;  %2782 = vrot.lane.b32.xlu1 %v4360_v34, %s4916_s29  ;;  %v6002_v11 = vld [vmem:[#allocation2 + $0x4c] sm:$0xf] }
  0xde   : > { %v5992_v19 = vld [vmem:[#allocation2 + $0x58] sm:$0xf]  ;;  %v204_v5 = vld [vmem:[#allocation2 + $0x60] sm:$0x1]  ;;  %v6004_v33 = vrot.slane %v1532_v38, 4  ;;  %v6006_v34 = vrot.slane %v1535_v35, 5 }
  0xdf   : > { %7593 = vst [vmem:[#allocation43_spill] sm:$0xff] %v5992_v19  ;;  %v2154_v17 = vshrl.u32 %v5992_v19, 16  ;;  %v2150_v40 = vshll.u32 %v5992_v19, 16  ;;  %v2143_v0 = vrot.slane %v2141_v29, 4  ;;  %v2146_v55 = vrot.slane %v2144_v31, 5 }
  0xe0   : > { %v1801_v6 = vld [vmem:[#allocation2 + $0x54] sm:$0xe]  ;;  %v295_v4 = vld [vmem:[%s5027_s28 + $0x38] sm:$0xf]  ;;  %v6011_v56 = vld [vmem:[#allocation2 + $0x50] sm:$0x1]  ;;  %v4424_v51 = vcombine.low %v1982_v44, %v5992_v19 }
  0xe1   : > { %v947_v9 = vrot.slane %v945_v60, 4  ;;  %v948_v12 = vshll.u32 %v761_v10, 16  ;;  %3006 = vrot.lane.b32.xlu0 %v4408_v18, %s4917_s30  ;;  %v683_v29 = vld [vmem:[#allocation2 + $0x5c] sm:$0x1]  ;;  %v2147_v38 = vor.u32 %v2146_v55, %v2143_v0  ;;  %v6015_v31 = vrot.slane %v2150_v40, 5  ;;  %2878 = vrot.lane.b32.xlu1 %v4376_v50, %s4918_s4  ;;  %v6023_v18 = vpop.permute.xlu1 %2716  ;;  %v6032_v0 = vpop.permute.xlu0 %3172 }
  0xe2   : > { %v2156_v35 = vrot.slane %v2154_v17, 4  ;;  %v6018_v54 = vld [vmem:[#allocation2 + $0x58] sm:$0xf]  ;;  %v684_v37 = vsel %vm4993_vm3, %v433_v14, %v683_v29  ;;  %v4297_v39 = vrot.slane %v1801_v6, 9  ;;  %v954_v10 = vshll.u32 %v6002_v11, 16 }
  0xe3   : > { %v950_v60 = vrot.slane %v948_v12, 5  ;;  %685 = vst [vmem:[#allocation2 + $0x5c] sm:$0x1] %v684_v37  ;;  %v958_v44 = vshrl.u32 %v6002_v11, 16  ;;  %v964_v17 = vshll.u32 %v6011_v56, 16  ;;  %v205_v50 = vsel %vm4993_vm3, 0, %v204_v5 }
  0xe4   : > { %v296_v40 = vld [vmem:[%s5027_s28 + $0x3c] sm:$0xf]  ;;  %v1903_v12 = vrot.slane %v6018_v54, 5  ;;  %v956_v6 = vrot.slane %v954_v10, 5  ;;  %206 = vst [vmem:[#allocation2 + $0x60] sm:$0x1] %v205_v50  ;;  %v2157_v20 = vor.u32 %v2156_v35, %v6015_v31 }
  0xe5   : > { %v951_v14 = vor.u32 %v950_v60, %v947_v9  ;;  %v435_v29 = vshrl.u32 %v295_v4, 16  ;;  %v1190_v37 = vld [vmem:[#allocation2 + $0x48] sm:$0xe]  ;;  %3102 = vrot.lane.b32.xlu0 %v4424_v51, %s4916_s29  ;;  %v2148_v55 = vrot.slane %v2147_v38, 4  ;;  %v960_v28 = vrot.slane %v958_v44, 4  ;;  %v6041_v38 = vpop.permute.xlu1 %2694 }
  0xe6   : > { %v438_v21 = vshll.u32 %v295_v4, 16  ;;  %v443_v5 = vshrl.u32 %v296_v40, 16  ;;  %v446_v63 = vshll.u32 %v296_v40, 16  ;;  %v966_v23 = vrot.slane %v964_v17, 5  ;;  %v6047_v17 = vpop.permute.xlu0 %3196 }
  0xe7   : > { %v952_v2 = vrot.slane %v951_v14, 4  ;;  %v437_v32 = vrot.slane %v435_v29, 7  ;;  %v961_v25 = vor.u32 %v960_v28, %v956_v6  ;;  %v4281_v57 = vrot.slane %v1190_v37, 9 }
  0xe8   : > { %v1295_v9 = vrot.slane %v6002_v11, 5  ;;  %v6038_v50 = vrot.slane %v443_v5, 7  ;;  %v1298_v51 = vrot.slane %v6011_v56, 5  ;;  %vm3252_vm15 = vcmask 261120   ;;  %v254_v5 = vld [vmem:[#allocation2 + $0x68] sm:$0x1] }
  0xe9   : > { %v440_v60 = vor.u32 %v438_v21, %v437_v32  ;;  %v441_v10 = vrot.slane %v437_v32, 4  ;;  %v6045_v4 = vsel %vm5020_vm9, %v4297_v39, %v1903_v12  ;;  %v1905_v35 = vrot.slane %v1903_v12, 4 }
  0xea   : > { %v962_v44 = vrot.slane %v961_v25, 4  ;;  %v1297_v28 = vrot.slane %v1295_v9, 4  ;;  %v6049_v40 = vld [vmem:[#allocation2 + $0x5c] sm:$0x1]  ;;  %v2158_v21 = vrot.slane %v2157_v20, 4  ;;  %v957_v11 = vsel %vm5047_vm13, %v952_v2, %v956_v6 }
  0xeb   : > { %7595 = vst [vmem:[#allocation45_spill] sm:$0xff] %v6049_v40  ;;  %v6051_v32 = vld [vmem:[#allocation2 + $0x5c] sm:$0x1]  ;;  %v448_v56 = vor.u32 %v446_v63, %v6038_v50  ;;  %v7597_v14 = vshll.u32 %v5142_v43, 16  ;;  %v2153_v25 = vsel %vm5047_vm13, %v2148_v55, %v6015_v31  ;;  %v2160_v39 = vshll.u32 %v6049_v40, 16 }
  0xec   : > { %7596 = vst [vmem:[#allocation46_spill] sm:$0xff] %v6051_v32  ;;  %v1906_v12 = vrot.slane %v6051_v32, 5  ;;  %v686_v37 = vld [vmem:[#allocation2 + $0x60] sm:$0xf]  ;;  %v1296_v20 = vsel %vm5020_vm9, %v4281_v57, %v1295_v9  ;;  %v967_v2 = vsel %vm5047_vm13, %v962_v44, %v966_v23  ;;  %v1299_v31 = vsel %vm5020_vm9, %v1297_v28, %v1298_v51  ;;  %v1375_v44 = vld [vmem:[#allocation2 + $0x54] sm:$0xf]  ;;  %v6084_v28 = vpop.permute.xlu1 %2718 }
  0xed   : > { %v1423_v29 = vrot.slane %v7597_v14, 5  ;;  %v449_v43 = vsel %vm5056_vm14, %v441_v10, %v448_v56  ;;  %v687_v63 = vsel %vm5040_vm12, %v440_v60, %v686_v37  ;;  %v2162_v55 = vrot.slane %v2160_v39, 5  ;;  %v763_v39 = vld [vmem:[#allocation2 + $0x54] sm:$0xf]  ;;  %v298_v32 = vld [vmem:[%s5027_s28 + $0x44] sm:$0xf] }
  0xee   : > { %v1907_v6 = vsel %vm5020_vm9, %v1905_v35, %v1906_v12  ;;  %v4345_v14 = vcombine.low %v957_v11, %v967_v2  ;;  %688 = vst [vmem:[#allocation2 + $0x60] sm:$0xf] %v687_v63  ;;  %689 = vst.msk [vmem:[#allocation2 + $0x64] sm:$0xf] %vm170_vm0, %v449_v43  ;;  %v7598_v57 = vshll.u32 %v5148_v53, 16  ;;  %v4361_v9 = vcombine.low %v1296_v20, %v1299_v31  ;;  %v6091_v12 = vpop.permute.xlu0 %3174 }
  0xef   : > { %v1428_v10 = vor.u32 %v5175_v42, %v1423_v29  ;;  %v1424_v60 = vsel %vm5047_vm13, %v5187_v58, %v1423_v29  ;;  %v255_v51 = vsel %vm5001_vm5, 0, %v254_v5  ;;  %v2163_v35 = vsel %vm5047_vm13, %v2158_v21, %v2162_v55 }
  0xf0   : > { %v1433_v23 = vrot.slane %v7598_v57, 5  ;;  %2704 = vrot.lane.b32.xlu1 %v4345_v14, %s4917_s30  ;;  %256 = vst [vmem:[#allocation2 + $0x68] sm:$0x1] %v255_v51  ;;  %v1556_v53 = vshrl.u32 %v1375_v44, 16  ;;  %v1559_v11 = vshll.u32 %v1375_v44, 16  ;;  %v7599_v42 = vshll.u32 %v5180_v46, 16 }
  0xf1   : > { %v4440_v29 = vcombine.low %v2153_v25, %v2163_v35  ;;  %v7600_v37 = vor.u32 %v6006_v34, %v6004_v33  ;;  %v1429_v21 = vrot.slane %v1428_v10, 4  ;;  %v450_v5 = vrot.slane %v6038_v50, 4  ;;  %v6110_v34 = vld [vmem:[#allocation2 + $0x58] sm:$0xf]  ;;  %v4781_v51 = vld [vmem:[#allocation2 + $0x90] sm:$0xf]  ;;  %v6135_v35 = vpop.permute.xlu1 %2798 }
  0xf2   : > { %v1711_v56 = vrot.slane %v7599_v42, 5  ;;  %v4377_v2 = vcombine.low %v1375_v44, %v6018_v54  ;;  %v4409_v25 = vcombine.low %v6045_v4, %v1907_v6  ;;  %v969_v50 = vshrl.u32 %v763_v39, 16  ;;  %v6115_v54 = vld [vmem:[%s7478_s1 + $0x80] sm:$0xff]  }
  0xf3   : > { %v6097_v20 = vrot.slane %v7600_v37, 4  ;;  %3182 = vrot.lane.b32.xlu0 %v4440_v29, %s4918_s4  ;;  %v1434_v33 = vsel %vm5047_vm13, %v1429_v21, %v1433_v23  ;;  %v6122_v31 = vrot.slane %v1559_v11, 5  ;;  %v7602_v4 = vshll.u32 %v5209_v27, 16  ;;  %4639 = vmatprep.subr.bf16.mxu1 %v6115_v54 }
  0xf4   : > { %v1712_v46 = vsel %vm5047_vm13, %v5257_v36, %v1711_v56  ;;  %v1716_v43 = vor.u32 %v5279_v13, %v1711_v56  ;;  %2784 = vrot.lane.b32.xlu1 %v4361_v9, %s4916_s29  ;;  %v6118_v36 = vcombine.low %v1424_v60, %v1434_v33  ;;  %v6120_v13 = vrot.slane %v1556_v53, 4  ;;  %v4780_v60 = vld [vmem:[#allocation2 + $0x94] sm:$0xf] }
  0xf5   : > { %7601 = vst [vmem:[#allocation47_spill] sm:$0xff] %v6097_v20  ;;  %v1721_v55 = vrot.slane %v7602_v4, 5  ;;  %v7603_v6 = vcombine.low %v5985_v7, %v5983_v41  ;;  %v1984_v57 = vld [vmem:[#allocation2 + $0x60] sm:$0xf]  ;;  %v6133_v23 = vld [vmem:[#allocation2 + $0x64] sm:$0xf]  ;;  %v4335_v44 = vcombine.low %v4781_v51, %v4780_v60  ;;  %v6142_v7 = vpop.permute.xlu0 %3022  ;;  %v6172_v58 = vpop.permute.xlu1 %2894 }
  0xf6   : > { %v1717_v9 = vrot.slane %v1716_v43, 4  ;;  %v972_v10 = vshll.u32 %v763_v39, 16  ;;  %v2165_v27 = vshrl.u32 %v1984_v57, 16  ;;  %v2168_v53 = vshll.u32 %v1984_v57, 16  ;;  %v6139_v41 = vld [vmem:[#allocation2 + $0x64] sm:$0xf] }
  0xf7   : > { %v6131_v14 = vsel %vm3252_vm15, %v7603_v6, %v5845_v61  ;;  %v2178_v11 = vshrl.u32 %v6133_v23, 16  ;;  %v978_v61 = vshll.u32 %v6110_v34, 16  ;;  %3008 = vrot.lane.b32.xlu0 %v4409_v25, %s4917_s30  ;;  %v4425_v42 = vcombine.low %v1984_v57, %v6133_v23  ;;  %v690_v56 = vld [vmem:[#allocation2 + $0x68] sm:$0x1]  ;;  %v1802_v57 = vld [vmem:[#allocation2 + $0x60] sm:$0xe] }
  0xf8   : > { %v2174_v39 = vshll.u32 %v6133_v23, 16  ;;  %v971_v29 = vrot.slane %v969_v50, 4  ;;  %v982_v37 = vshrl.u32 %v6110_v34, 16  ;;  %v2167_v21 = vrot.slane %v2165_v27, 4  ;;  %2880 = vrot.lane.b32.xlu1 %v4377_v2, %s4918_s4  ;;  %v6156_v50 = vld [vmem:[#allocation2 + $0x5c] sm:$0x1] }
  0xf9   : > { %v2170_v43 = vrot.slane %v2168_v53, 5  ;;  %v691_v33 = vsel %vm4993_vm3, %v450_v5, %v690_v56  ;;  %v2180_v4 = vrot.slane %v2178_v11, 4  ;;  %v1722_v25 = vsel %vm5047_vm13, %v1717_v9, %v1721_v55  ;;  %v6158_v51 = vld [vmem:[#allocation2 + $0x10] sm:$0xf]  ;;  %v6160_v27 = vld [vmem:[#allocation2 + $0xc] sm:$0xf] }
  0xfa   : > { %692 = vst [vmem:[#allocation2 + $0x68] sm:$0x1] %v691_v33  ;;  %v6151_v6 = vrot.slane %v2174_v39, 5  ;;  %v1910_v60 = vrot.slane %v6139_v41, 5  ;;  %v4399_v53 = vcombine.low %v1712_v46, %v1722_v25  ;;  %v974_v11 = vrot.slane %v972_v10, 5 }
  0xfb   : > { %v2171_v2 = vor.u32 %v2170_v43, %v2167_v21  ;;  %v980_v56 = vrot.slane %v978_v61, 5  ;;  %3104 = vrot.lane.b32.xlu0 %v4425_v42, %s4916_s29  ;;  %v984_v9 = vrot.slane %v982_v37, 4  ;;  %v207_v33 = vld [vmem:[#allocation2 + $0x6c] sm:$0x1]  ;;  %v6170_v63 = vsel %vm3252_vm15, %v4335_v44, %v6023_v18  ;;  %v297_v43 = vld [vmem:[%s5027_s28 + $0x40] sm:$0xf]  ;;  %v6177_v42 = vpop.permute.xlu0 %3118 }
  0xfc   : > { %v2181_v46 = vor.u32 %v2180_v4, %v6151_v6  ;;  %v4298_v10 = vrot.slane %v1802_v57, 9  ;;  %v975_v61 = vor.u32 %v974_v11, %v971_v29  ;;  %v988_v21 = vshll.u32 %v6156_v50, 16 }
  0xfd   : > { %v2172_v25 = vrot.slane %v2171_v2, 4  ;;  %v1912_v39 = vrot.slane %v1910_v60, 4  ;;  %v985_v5 = vor.u32 %v984_v9, %v980_v56  ;;  %v7604_v37 = vshll.u32 %v5127_v26, 16 }
  0xfe   : > { %v976_v18 = vrot.slane %v975_v61, 4  ;;  %v990_v44 = vrot.slane %v988_v21, 5  ;;  %v7605_v40 = vshll.u32 %v5224_v8, 16  ;;  %v208_v29 = vsel %vm4993_vm3, 0, %v207_v33  ;;  %v6203_v21 = vpop.permute.xlu1 %2696 }
  0xff   : > { %v1447_v55 = vrot.slane %v7604_v37, 5  ;;  %v986_v4 = vrot.slane %v985_v5, 4  ;;  %209 = vst [vmem:[#allocation2 + $0x6c] sm:$0x1] %v208_v29  ;;  %v452_v11 = vshrl.u32 %v297_v43, 16  ;;  %v3385_v26 = vsel %vm3252_vm15, %v6118_v36, %v5931_v49  ;;  %7606 = vst [vmem:[#allocation48_spill] sm:$0xff] %v6203_v21 }
 0x100   : > { %v1457_v19 = vrot.slane %v7605_v40, 5  ;;  %v981_v40 = vsel %vm5047_vm13, %v976_v18, %v980_v56  ;;  %v455_v5 = vshll.u32 %v297_v43, 16  ;;  %v460_v33 = vshrl.u32 %v298_v32, 16  ;;  %v6209_v56 = vpop.permute.xlu0 %3198 }
 0x101   : > { %v1448_v57 = vsel %vm5047_vm13, %v5250_v30, %v1447_v55  ;;  %v1452_v2 = vor.u32 %v5195_v15, %v1447_v55  ;;  %v6193_v9 = vld [vmem:[#allocation2 + $0x68] sm:$0x1]  ;;  %v2182_v61 = vrot.slane %v2181_v46, 4  ;;  %v1911_v15 = vsel %vm5020_vm9, %v4298_v10, %v1910_v60  ;;  %v1191_v10 = vld [vmem:[#allocation2 + $0x54] sm:$0xe] }
 0x102   : > { %v6195_v8 = vld [vmem:[#allocation2 + $0x68] sm:$0x1]  ;;  %v2184_v30 = vshll.u32 %v6193_v9, 16  ;;  %v991_v49 = vsel %vm5047_vm13, %v986_v4, %v990_v44  ;;  %v454_v37 = vrot.slane %v452_v11, 7  ;;  %v6207_v29 = vrot.slane %v460_v33, 7 }
 0x103   : > { %v1913_v55 = vrot.slane %v6195_v8, 5  ;;  %v1453_v36 = vrot.slane %v1452_v2, 4  ;;  %v2177_v46 = vsel %vm5047_vm13, %v2172_v25, %v6151_v6  ;;  %v4346_v18 = vcombine.low %v981_v40, %v991_v49  ;;  %v257_v11 = vld [vmem:[#allocation2 + $0x74] sm:$0x1]  ;;  %v6226_v25 = vld [vmem:[#allocation2 + $0x60] sm:$0xf] }
 0x104   : > { %v2186_v43 = vrot.slane %v2184_v30, 5  ;;  %v463_v60 = vshll.u32 %v298_v32, 16  ;;  %v457_v4 = vor.u32 %v455_v5, %v454_v37  ;;  %v458_v2 = vrot.slane %v454_v37, 4 }
 0x105   : > { %v1914_v20 = vsel %vm5020_vm9, %v1912_v39, %v1913_v55  ;;  %v1458_v44 = vsel %vm5047_vm13, %v1453_v36, %v1457_v19  ;;  %v3421_v21 = vsel %vm3252_vm15, %v4399_v53, %v5956_v22  ;;  %2706 = vrot.lane.b32.xlu1 %v4346_v18, %s4917_s30  ;;  %v4282_v19 = vrot.slane %v1191_v10, 9  ;;  %v6254_v18 = vld [vmem:[#allocation2 + $0x64] sm:$0xf] }
 0x106   : > { %v2187_v33 = vsel %vm5047_vm13, %v2182_v61, %v2186_v43  ;;  %v6223_v6 = vcombine.low %v1448_v57, %v1458_v44  ;;  %v465_v32 = vor.u32 %v463_v60, %v6207_v29  ;;  %v693_v40 = vld [vmem:[#allocation2 + $0x6c] sm:$0xf]  ;;  %v1302_v5 = vrot.slane %v6110_v34, 5  ;;  %v6236_v57 = vpop.permute.xlu1 %2776  ;;  %v765_v43 = vld [vmem:[#allocation2 + $0x60] sm:$0xf] }
 0x107   : > { %v4441_v39 = vcombine.low %v2177_v46, %v2187_v33  ;;  %v1305_v30 = vrot.slane %v6156_v50, 5  ;;  %v4410_v55 = vcombine.low %v1911_v15, %v1914_v20  ;;  %v694_v22 = vsel %vm5040_vm12, %v457_v4, %v693_v40  ;;  %v6242_v50 = vpop.permute.xlu0 %3000  ;;  %v7622_v3 = vld [vmem:[#allocation48_spill] sm:$0xff] }
 0x108   : > { %v466_v61 = vsel %vm5056_vm14, %v458_v2, %v465_v32  ;;  %v258_v53 = vsel %vm5001_vm5, 0, %v257_v11  ;;  %695 = vst [vmem:[#allocation2 + $0x6c] sm:$0xf] %v694_v22  ;;  %v1303_v34 = vsel %vm5020_vm9, %v4282_v19, %v1302_v5  ;;  %v1304_v20 = vrot.slane %v1302_v5, 4 }
 0x109   : > { %3184 = vrot.lane.b32.xlu0 %v4441_v39, %s4918_s4  ;;  %696 = vst.msk [vmem:[#allocation2 + $0x70] sm:$0xf] %vm170_vm0, %v466_v61  ;;  %259 = vst [vmem:[#allocation2 + $0x74] sm:$0x1] %v258_v53  ;;  %vm3301_vm1 = vcmask 523264   ;;  %vm3334_vm2 = vcmask 785408   ;;  %v7607_v49 = vor.u32 %v6122_v31, %v6120_v13  ;;  %v4378_v46 = vcombine.low %v6226_v25, %v6139_v41 }
 0x10a   : > { %v3432_v37 = vsel %vm3301_vm1, %v3385_v26, %v5838_v47  ;;  %v1306_v60 = vsel %vm5020_vm9, %v1304_v20, %v1305_v30  ;;  %v3303_v13 = vsel %vm3301_vm1, %v6131_v14, %v5799_v24  ;;  %v3456_v31 = vsel %vm3301_vm1, %v3421_v21, %v5862_v62  ;;  %v210_v47 = vld [vmem:[#allocation2 + $0x78] sm:$0x1]  ;;  %v6283_v33 = vpop.permute.xlu1 %2872  ;;  %v7609_v61 = vld [vmem:[#allocation33_spill] sm:$0xff]  ;;  %v6301_v20 = vld [vmem:[#allocation2 + $0x9c] sm:$0xf] }
 0x10b   : > { %v6248_v36 = vrot.slane %v7607_v49, 4  ;;  %v3464_v10 = vsel %vm3334_vm2, %v3432_v37, %v6032_v0  ;;  %v467_v26 = vrot.slane %v6207_v29, 4  ;;  %v4362_v41 = vcombine.low %v1303_v34, %v1306_v60  ;;  %v7608_v29 = vld [vmem:[#allocation39_spill] sm:$0xff]  ;;  %v6287_v5 = vpop.permute.xlu0 %3096 }
 0x10c   : > { %3742 = vmatprep.mubr.bf16.mxu0 %v3464_v10  ;;  %v3336_v44 = vsel %vm3334_vm2, %v3303_v13, %v5860_v48  ;;  %v3500_v4 = vsel %vm3334_vm2, %v3456_v31, %v6047_v17  ;;  %v993_v0 = vshrl.u32 %v765_v43, 16  ;;  %v996_v2 = vshll.u32 %v765_v43, 16  ;;  %v6276_v48 = vld [vmem:[#allocation2 + $0x68] sm:$0x1]  ;;  %v6303_v49 = vld [vmem:[#allocation2 + $0xa0] sm:$0xf] }
 0x10d   : > { %3010 = vrot.lane.b32.xlu0 %v4410_v55, %s4917_s30  ;;  %3743 = vmatmul.mubr.bf16.vlgmr.msra.gmra.mrb[0].mxu0 %v3336_v44  ;;  %v1002_v24 = vshll.u32 %v6254_v18, 16  ;;  %v1006_v62 = vshrl.u32 %v6254_v18, 16  ;;  %v1580_v14 = vshrl.u32 %v6226_v25, 16  ;;  %v1583_v21 = vshll.u32 %v6226_v25, 16  ;;  %v4775_v25 = vld [vmem:[%s7478_s1 + $0x88] sm:$0xff]  }
 0x10e   : > { %2786 = vrot.lane.b32.xlu1 %v4362_v41, %s4916_s29  ;;  %3838 = vmatprep.mubr.bf16.mxu1 %v3500_v4  ;;  %v3327_v17 = vsel %vm3301_vm1, %v6170_v63, %v7608_v29  ;;  %v211_v11 = vsel %vm4993_vm3, 0, %v210_v47  ;;  %v995_v32 = vrot.slane %v993_v0, 4  ;;  %v998_v39 = vrot.slane %v996_v2, 5  ;;  %v7611_v31 = vld [vmem:[#allocation44_spill] sm:$0xff] }
 0x10f   : > { %v6285_v40 = vrot.slane %v1002_v24, 5  ;;  %v1008_v19 = vrot.slane %v1006_v62, 4  ;;  %212 = vst [vmem:[#allocation2 + $0x78] sm:$0x1] %v211_v11  ;;  %v1986_v30 = vld [vmem:[#allocation2 + $0x6c] sm:$0xf]  ;;  %v3372_v22 = vsel %vm3334_vm2, %v3327_v17, %v7609_v61  ;;  %v7610_v53 = vcombine.low %v6160_v27, %v6158_v51  ;;  %v6332_v61 = vpop.permute.xlu0 %3176 }
 0x110   : > { %v6292_v55 = vld [vmem:[#allocation2 + $0x70] sm:$0xf]  ;;  %v697_v63 = vld [vmem:[#allocation2 + $0x74] sm:$0x1]  ;;  %v4336_v37 = vcombine.low %v6301_v20, %v6303_v49  ;;  %v2189_v43 = vshrl.u32 %v1986_v30, 16  ;;  %v2192_v60 = vshll.u32 %v1986_v30, 16  ;;  %3839 = vmatmul.mubr.bf16.vlgmr.msra.gmra.mrb[0].mxu1 %v3372_v22  ;;  %v3388_v51 = vsel %vm3252_vm15, %v6223_v6, %v7611_v31 }
 0x111   : > { %v3258_v34 = vsel %vm3252_vm15, %v7610_v53, %v6041_v38  ;;  %v2202_v10 = vshrl.u32 %v6292_v55, 16  ;;  %v1012_v13 = vshll.u32 %v6276_v48, 16  ;;  %v4426_v38 = vcombine.low %v1986_v30, %v6292_v55  ;;  %v299_v41 = vld [vmem:[%s5027_s28 + $0x48] sm:$0xf]  ;;  %4640 = vmatpush3.bf16.msra.mxu1 %v6115_v54  ;;  %v6321_v6 = vld [vmem:[#allocation2 + $0x70] sm:$0xf]  ;;  %v6330_v54 = vpop.permute.xlu1 %2720 }
 0x112   : > { %v698_v27 = vsel %vm4993_vm3, %v467_v26, %v697_v63  ;;  %v2198_v47 = vshll.u32 %v6292_v55, 16  ;;  %2882 = vrot.lane.b32.xlu1 %v4378_v46, %s4918_s4  ;;  %v2191_v44 = vrot.slane %v2189_v43, 4  ;;  %v2194_v4 = vrot.slane %v2192_v60, 5  ;;  %4641 = vmatprep.subr.bf16.mxu1 %v4775_v25  ;;  %v300_v29 = vld [vmem:[%s5027_s28 + $0x4c] sm:$0xf]  ;;  %v7612_v43 = vld [vmem:[#allocation34_spill] sm:$0xff] }
 0x113   : > { %699 = vst [vmem:[#allocation2 + $0x74] sm:$0x1] %v698_v27  ;;  %v2204_v0 = vrot.slane %v2202_v10, 4  ;;  %v6319_v2 = vrot.slane %v1580_v14, 4  ;;  %3106 = vrot.lane.b32.xlu0 %v4426_v38, %s4916_s29  ;;  %v6326_v24 = vrot.slane %v1583_v21, 5  ;;  %v999_v62 = vor.u32 %v998_v39, %v995_v32  ;;  %v7613_v60 = vld [vmem:[#allocation42_spill] sm:$0xff] }
 0x114   : > { %v6324_v26 = vrot.slane %v2198_v47, 5  ;;  %v1009_v46 = vor.u32 %v1008_v19, %v6285_v40  ;;  %v2195_v17 = vor.u32 %v2194_v4, %v2191_v44  ;;  %v1803_v11 = vld [vmem:[#allocation2 + $0x6c] sm:$0xe]  ;;  %v1014_v30 = vrot.slane %v1012_v13, 5  ;;  %v1192_v13 = vld [vmem:[#allocation2 + $0x60] sm:$0xe] }
 0x115   : > { %v469_v14 = vshrl.u32 %v299_v41, 16  ;;  %v472_v63 = vshll.u32 %v299_v41, 16  ;;  %v1917_v22 = vrot.slane %v6321_v6, 5  ;;  %v1000_v53 = vrot.slane %v999_v62, 4  ;;  %4642 = vmatpush3.bf16.msra.mxu1 %v4775_v25  ;;  %v6405_v49 = vld [vmem:[#allocation2 + $0x70] sm:$0xf] }
 0x116   : > { %v3434_v21 = vsel %vm3301_vm1, %v3388_v51, %v7612_v43  ;;  %v3305_v32 = vsel %vm3301_vm1, %v3258_v34, %v7613_v60  ;;  %v2205_v39 = vor.u32 %v2204_v0, %v6324_v26  ;;  %v1010_v19 = vrot.slane %v1009_v46, 4  ;;  %v700_v4 = vld [vmem:[#allocation2 + $0x78] sm:$0xf]  ;;  %v6359_v43 = vpop.permute.xlu0 %3024 }
 0x117   : > { %v471_v10 = vrot.slane %v469_v14, 7  ;;  %v477_v31 = vshrl.u32 %v300_v29, 16  ;;  %v4299_v38 = vrot.slane %v1803_v11, 9  ;;  %v1005_v27 = vsel %vm5047_vm13, %v1000_v53, %v6285_v40 }
 0x118   : > { %v480_v47 = vshll.u32 %v300_v29, 16  ;;  %v3467_v41 = vsel %vm3334_vm2, %v3434_v21, %v6091_v12  ;;  %v2196_v51 = vrot.slane %v2195_v17, 4  ;;  %v1015_v34 = vsel %vm5047_vm13, %v1010_v19, %v1014_v30  ;;  %v7615_v29 = vld [vmem:[#allocation36_spill] sm:$0xff]  ;;  %v6355_v12 = vpop.permute.xlu1 %2800 }
 0x119   : > { %v474_v25 = vor.u32 %v472_v63, %v471_v10  ;;  %v475_v44 = vrot.slane %v471_v10, 4  ;;  %3750 = vmatprep.mubr.bf16.mxu0 %v3467_v41  ;;  %v4347_v46 = vcombine.low %v1005_v27, %v1015_v34  ;;  %v6351_v11 = vrot.slane %v477_v31, 7 }
 0x11a   : > { %v6347_v0 = vld [vmem:[#allocation2 + $0x74] sm:$0x1]  ;;  %v4283_v40 = vrot.slane %v1192_v13, 9  ;;  %v3339_v14 = vsel %vm3334_vm2, %v3305_v32, %v7615_v29  ;;  %v2206_v17 = vrot.slane %v2205_v39, 4  ;;  %v1919_v63 = vrot.slane %v1917_v22, 4 }
 0x11b   : > { %v6349_v62 = vld [vmem:[#allocation2 + $0x74] sm:$0x1]  ;;  %v2208_v30 = vshll.u32 %v6347_v0, 16  ;;  %3751 = vmatmul.mubr.bf16.gmra.mrb[4].mxu0 %v3339_v14  ;;  %v1586_v21 = vor.u32 %v6326_v24, %v6319_v2  ;;  %2708 = vrot.lane.b32.xlu1 %v4347_v46, %s4917_s30  ;;  %v482_v60 = vor.u32 %v480_v47, %v6351_v11  ;;  %v701_v32 = vsel %vm5040_vm12, %v474_v25, %v700_v4  ;;  %v4786_v13 = vld [vmem:[#allocation2 + $0xac] sm:$0xf] }
 0x11c   : > { %7614 = vst [vmem:[#allocation39_spill] sm:$0xff] %v6349_v62  ;;  %v1920_v53 = vrot.slane %v6349_v62, 5  ;;  %v1309_v39 = vrot.slane %v6254_v18, 5  ;;  %v2201_v19 = vsel %vm5047_vm13, %v2196_v51, %v6324_v26  ;;  %702 = vst [vmem:[#allocation2 + $0x78] sm:$0xf] %v701_v32  ;;  %v1312_v31 = vrot.slane %v6276_v48, 5 }
 0x11d   : > { %v2210_v10 = vrot.slane %v2208_v30, 5  ;;  %v1733_v27 = vshll.u32 %v4786_v13, 16  ;;  %v260_v2 = vld [vmem:[#allocation2 + $0x80] sm:$0x1]  ;;  %v1918_v24 = vsel %vm5020_vm9, %v4299_v38, %v1917_v22  ;;  %v483_v47 = vsel %vm5056_vm14, %v475_v44, %v482_v60  ;;  %v767_v25 = vld [vmem:[#allocation2 + $0x6c] sm:$0xf] }
 0x11e   : > { %v1310_v18 = vsel %vm5020_vm9, %v4283_v40, %v1309_v39  ;;  %v1311_v41 = vrot.slane %v1309_v39, 4  ;;  %v1921_v51 = vsel %vm5020_vm9, %v1919_v63, %v1920_v53  ;;  %703 = vst.msk [vmem:[#allocation2 + $0x7c] sm:$0xf] %vm170_vm0, %v483_v47  ;;  %v1737_v34 = vshrl.u32 %v4786_v13, 16  ;;  %v1379_v46 = vld [vmem:[#allocation2 + $0x6c] sm:$0xf]  ;;  %v6388_v40 = vpop.permute.xlu1 %2896  ;;  %v6396_v63 = vpop.permute.xlu0 %3120 }
 0x11f   : > { %v2211_v26 = vsel %vm5047_vm13, %v2206_v17, %v2210_v10  ;;  %v1735_v48 = vrot.slane %v1733_v27, 5  ;;  %v261_v4 = vsel %vm5001_vm5, 0, %v260_v2  ;;  %v3294_v30 = vsel %vm3252_vm15, %v4336_v37, %v6084_v28  ;;  %v7617_v27 = vld [vmem:[#allocation12_spill] sm:$0xff] }
 0x120   : > { %v4442_v38 = vcombine.low %v2201_v19, %v2211_v26  ;;  %v1313_v44 = vsel %vm5020_vm9, %v1311_v41, %v1312_v31  ;;  %v1739_v17 = vrot.slane %v1737_v34, 4  ;;  %262 = vst [vmem:[#allocation2 + $0x80] sm:$0x1] %v261_v4  ;;  %v6400_v60 = vrot.slane %v1586_v21, 4  ;;  %v7619_v41 = vld [vmem:[#allocation17_spill] sm:$0xff] }
 0x121   : > { %v4363_v14 = vcombine.low %v1310_v18, %v1313_v44  ;;  %v4411_v32 = vcombine.low %v1918_v24, %v1921_v51  ;;  %v1017_v39 = vshrl.u32 %v767_v25, 16  ;;  %v4379_v20 = vcombine.low %v1379_v46, %v6321_v6  ;;  %v213_v19 = vld [vmem:[#allocation2 + $0x84] sm:$0x1] }
 0x122   : > { %3186 = vrot.lane.b32.xlu0 %v4442_v38, %s4918_s4  ;;  %7616 = vst [vmem:[#allocation33_spill] sm:$0xff] %v6400_v60  ;;  %v1740_v10 = vor.u32 %v1739_v17, %v1735_v48  ;;  %v1020_v28 = vshll.u32 %v767_v25, 16  ;;  %v484_v31 = vrot.slane %v6351_v11, 4  ;;  %v7618_v21 = vshll.u32 %v7617_v27, 16  ;;  %v6418_v44 = vpop.permute.xlu1 %2698 }
 0x123   : > { %2788 = vrot.lane.b32.xlu1 %v4363_v14, %s4916_s29  ;;  %v1988_v13 = vld [vmem:[#allocation2 + $0x78] sm:$0xf]  ;;  %v1604_v24 = vshrl.u32 %v1379_v46, 16  ;;  %v1736_v26 = vsel %vm5047_vm13, %v7619_v41, %v1735_v48  ;;  %v1607_v34 = vshll.u32 %v1379_v46, 16  ;;  %v1019_v25 = vrot.slane %v1017_v39, 4 }
 0x124   : > { %v1745_v2 = vrot.slane %v7618_v21, 5  ;;  %v2213_v47 = vshrl.u32 %v1988_v13, 16  ;;  %v2216_v18 = vshll.u32 %v1988_v13, 16  ;;  %v1741_v51 = vrot.slane %v1740_v10, 4  ;;  %v6437_v29 = vld [vmem:[#allocation2 + $0x78] sm:$0xe] }
 0x125   : > { %v6415_v6 = vld [vmem:[#allocation2 + $0x7c] sm:$0xf]  ;;  %v1022_v38 = vrot.slane %v1020_v28, 5  ;;  %v1026_v11 = vshll.u32 %v6405_v49, 16  ;;  %v1030_v48 = vshrl.u32 %v6405_v49, 16  ;;  %v6431_v21 = vrot.slane %v1604_v24, 4 }
 0x126   : > { %3012 = vrot.lane.b32.xlu0 %v4411_v32, %s4917_s30  ;;  %v2215_v4 = vrot.slane %v2213_v47, 4  ;;  %v2218_v14 = vrot.slane %v2216_v18, 5  ;;  %v2226_v17 = vshrl.u32 %v6415_v6, 16  ;;  %v6422_v27 = vld [vmem:[#allocation2 + $0x7c] sm:$0xf]  ;;  %v6425_v32 = vpop.permute.xlu0 %3200  ;;  %v4427_v46 = vcombine.low %v1988_v13, %v6415_v6 }
 0x127   : > { %2884 = vrot.lane.b32.xlu1 %v4379_v20, %s4918_s4  ;;  %v1746_v39 = vsel %vm5047_vm13, %v1741_v51, %v1745_v2  ;;  %v704_v10 = vld [vmem:[#allocation2 + $0x80] sm:$0x1]  ;;  %v2222_v28 = vshll.u32 %v6415_v6, 16  ;;  %v6433_v47 = vld [vmem:[#allocation2 + $0x74] sm:$0x1]  ;;  %v1924_v2 = vrot.slane %v6422_v27, 5  ;;  %v1023_v24 = vor.u32 %v1022_v38, %v1019_v25 }
 0x128   : > { %v4400_v18 = vcombine.low %v1736_v26, %v1746_v39  ;;  %v705_v20 = vsel %vm4993_vm3, %v484_v31, %v704_v10  ;;  %v2219_v41 = vor.u32 %v2218_v14, %v2215_v4  ;;  %v2228_v37 = vrot.slane %v2226_v17, 4  ;;  %v301_v17 = vld [vmem:[%s5027_s28 + $0x50] sm:$0xf]  ;;  %v1194_v62 = vld [vmem:[#allocation2 + $0x78] sm:$0xe] }
 0x129   : > { %706 = vst [vmem:[#allocation2 + $0x80] sm:$0x1] %v705_v20  ;;  %v6440_v13 = vrot.slane %v2222_v28, 5  ;;  %v1028_v51 = vrot.slane %v1026_v11, 5  ;;  %v6443_v26 = vrot.slane %v1607_v34, 5  ;;  %v3329_v31 = vsel %vm3301_vm1, %v3294_v30, %v6135_v35  ;;  %v6457_v34 = vpop.permute.xlu1 %2778 }
 0x12a   : > { %3108 = vrot.lane.b32.xlu0 %v4427_v46, %s4916_s29  ;;  %v1032_v4 = vrot.slane %v1030_v48, 4  ;;  %v1036_v14 = vshll.u32 %v6433_v47, 16  ;;  %v3424_v46 = vsel %vm3252_vm15, %v4400_v18, %v6142_v7  ;;  %v6451_v39 = vrot.slane %v2219_v41, 4  ;;  %v302_v28 = vld [vmem:[%s5027_s28 + $0x54] sm:$0xf]  ;;  %v6460_v20 = vpop.permute.xlu0 %3002 }
 0x12b   : > { %v4300_v10 = vrot.slane %v6437_v29, 9  ;;  %v3375_v25 = vsel %vm3334_vm2, %v3329_v31, %v6172_v58  ;;  %v2229_v38 = vor.u32 %v2228_v37, %v6440_v13  ;;  %v1024_v35 = vrot.slane %v1023_v24, 4  ;;  %v1193_v48 = vld [vmem:[#allocation2 + $0x6c] sm:$0xe] }
 0x12c   : > { %v1033_v30 = vor.u32 %v1032_v4, %v1028_v51  ;;  %v1038_v11 = vrot.slane %v1036_v14, 5  ;;  %v3458_v7 = vsel %vm3301_vm1, %v3424_v46, %v6177_v42  ;;  %v1926_v18 = vrot.slane %v1924_v2, 4 }
 0x12d   : > { %v214_v29 = vsel %vm4993_vm3, 0, %v213_v19  ;;  %v486_v41 = vshrl.u32 %v301_v17, 16  ;;  %v489_v58 = vshll.u32 %v301_v17, 16  ;;  %v494_v31 = vshrl.u32 %v302_v28, 16 }
 0x12e   : > { %v1034_v22 = vrot.slane %v1033_v30, 4  ;;  %215 = vst [vmem:[#allocation2 + $0x84] sm:$0x1] %v214_v29  ;;  %v497_v53 = vshll.u32 %v302_v28, 16  ;;  %v1029_v37 = vsel %vm5047_vm13, %v1024_v35, %v1028_v51  ;;  %v3503_v4 = vsel %vm3334_vm2, %v3458_v7, %v6209_v56  ;;  %v4787_v28 = vld [vmem:[#allocation2 + $0x18] sm:$0xf]  ;;  %v6482_v7 = vpop.permute.xlu1 %2874 }
 0x12f   : > { %v488_v24 = vrot.slane %v486_v41, 7  ;;  %v4284_v14 = vrot.slane %v1193_v48, 9  ;;  %v6476_v46 = vrot.slane %v494_v31, 7  ;;  %3846 = vmatprep.mubr.bf16.mxu1 %v3503_v4  ;;  %v1316_v17 = vrot.slane %v6405_v49, 5  ;;  %v4788_v30 = vld [vmem:[#allocation2 + $0x1c] sm:$0xf]  ;;  %v6485_v49 = vpop.permute.xlu0 %3098 }
 0x130   : > { %v6470_v15 = vld [vmem:[#allocation2 + $0x80] sm:$0x1]  ;;  %v1039_v19 = vsel %vm5047_vm13, %v1034_v22, %v1038_v11  ;;  %v4325_v51 = vcombine.low %v4787_v28, %v4788_v30  ;;  %v2230_v35 = vrot.slane %v2229_v38, 4  ;;  %v1319_v48 = vrot.slane %v6433_v47, 5  ;;  %3847 = vmatmul.mubr.bf16.gmra.mrb[4].mxu1 %v3375_v25  ;;  %v263_v4 = vld [vmem:[#allocation2 + $0x8c] sm:$0x1] }
 0x131   : > { %7620 = vst [vmem:[#allocation44_spill] sm:$0xff] %v6470_v15  ;;  %v6472_v42 = vld [vmem:[#allocation2 + $0x80] sm:$0x1]  ;;  %v2232_v29 = vshll.u32 %v6470_v15, 16  ;;  %v4348_v41 = vcombine.low %v1029_v37, %v1039_v19  ;;  %v491_v22 = vor.u32 %v489_v58, %v488_v24  ;;  %v492_v11 = vrot.slane %v488_v24, 4 }
 0x132   : > { %7621 = vst [vmem:[#allocation34_spill] sm:$0xff] %v6472_v42  ;;  %v1927_v56 = vrot.slane %v6472_v42, 5  ;;  %v499_v31 = vor.u32 %v497_v53, %v6476_v46  ;;  %v2225_v38 = vsel %vm5047_vm13, %v6451_v39, %v6440_v13  ;;  %v1610_v47 = vor.u32 %v6443_v26, %v6431_v21  ;;  %v4789_v24 = vld [vmem:[#allocation2 + $0x28] sm:$0xf]  ;;  %v769_v30 = vld [vmem:[#allocation2 + $0x78] sm:$0xf] }
 0x133   : > { %v2234_v28 = vrot.slane %v2232_v29, 5  ;;  %v1925_v25 = vsel %vm5020_vm9, %v4300_v10, %v1924_v2  ;;  %2710 = vrot.lane.b32.xlu1 %v4348_v41, %s4917_s30  ;;  %v1317_v58 = vsel %vm5020_vm9, %v4284_v14, %v1316_v17  ;;  %v1318_v37 = vrot.slane %v1316_v17, 4  ;;  %v6507_v39 = vld [vmem:[#allocation2 + $0x7c] sm:$0xf]  ;;  %v6513_v29 = vld [vmem:[#allocation2 + $0x78] sm:$0xf] }
 0x134   : > { %v500_v53 = vsel %vm5056_vm14, %v492_v11, %v499_v31  ;;  %v1469_v19 = vshll.u32 %v4789_v24, 16  ;;  %v1928_v21 = vsel %vm5020_vm9, %v1926_v18, %v1927_v56  ;;  %v1473_v2 = vshrl.u32 %v4789_v24, 16  ;;  %v6518_v31 = vpop.permute.xlu1 %2722  ;;  %v6529_v24 = vld [vmem:[#allocation2 + $0x80] sm:$0x1] }
 0x135   : > { %v2235_v13 = vsel %vm5047_vm13, %v2230_v35, %v2234_v28  ;;  %v707_v26 = vld [vmem:[#allocation2 + $0x84] sm:$0xf]  ;;  %710 = vst.msk [vmem:[#allocation2 + $0x88] sm:$0xf] %vm170_vm0, %v500_v53  ;;  %v264_v59 = vsel %vm5001_vm5, 0, %v263_v4  ;;  %v1320_v17 = vsel %vm5020_vm9, %v1318_v37, %v1319_v48  ;;  %v3261_v11 = vsel %vm3252_vm15, %v4325_v51, %v7622_v3  ;;  %v7623_v53 = vld [vmem:[#allocation14_spill] sm:$0xff] }
 0x136   : > { %v4443_v10 = vcombine.low %v2225_v38, %v2235_v13  ;;  %v708_v14 = vsel %vm5040_vm12, %v491_v22, %v707_v26  ;;  %v1471_v35 = vrot.slane %v1469_v19, 5  ;;  %265 = vst [vmem:[#allocation2 + $0x8c] sm:$0x1] %v264_v59  ;;  %v4364_v56 = vcombine.low %v1317_v58, %v1320_v17  ;;  %v6522_v38 = vpop.permute.xlu0 %3178  ;;  %v7627_v17 = vld [vmem:[#allocation8_spill] sm:$0xff] }
 0x137   : > { %709 = vst [vmem:[#allocation2 + $0x84] sm:$0xf] %v708_v14  ;;  %v1475_v41 = vrot.slane %v1473_v2, 4  ;;  %v4412_v45 = vcombine.low %v1925_v25, %v1928_v21  ;;  %v1041_v22 = vshrl.u32 %v769_v30, 16  ;;  %v1044_v4 = vshll.u32 %v769_v30, 16  ;;  %v7626_v2 = vld [vmem:[#allocation24_spill] sm:$0xff] }
 0x138   : > { %3188 = vrot.lane.b32.xlu0 %v4443_v10, %s4918_s4  ;;  %v1050_v48 = vshll.u32 %v6507_v39, 16  ;;  %2790 = vrot.lane.b32.xlu1 %v4364_v56, %s4916_s29  ;;  %v7624_v58 = vshll.u32 %v7623_v53, 16  ;;  %v4380_v51 = vcombine.low %v6513_v29, %v6422_v27  ;;  %v1054_v19 = vshrl.u32 %v6507_v39, 16  ;;  %v6541_v27 = vld [vmem:[#allocation2 + $0x90] sm:$0xf] }
 0x139   : > { %v1476_v28 = vor.u32 %v1475_v41, %v1471_v35  ;;  %v6532_v25 = vrot.slane %v1610_v47, 4  ;;  %v501_v30 = vrot.slane %v6476_v46, 4  ;;  %v1043_v13 = vrot.slane %v1041_v22, 4  ;;  %v7629_v41 = vld [vmem:[#allocation9_spill] sm:$0xff] }
 0x13a   : > { %v1481_v37 = vrot.slane %v7624_v58, 5  ;;  %v1046_v21 = vrot.slane %v1044_v4, 5  ;;  %v1472_v59 = vsel %vm5047_vm13, %v7626_v2, %v1471_v35  ;;  %v6539_v14 = vrot.slane %v1050_v48, 5 }
 0x13b   : > { %7625 = vst [vmem:[#allocation42_spill] sm:$0xff] %v6532_v25  ;;  %v1477_v10 = vrot.slane %v1476_v28, 4  ;;  %v7628_v56 = vrot.slane %v7627_v17, 5  ;;  %v7630_v47 = vrot.slane %v7629_v41, 9  ;;  %v3307_v35 = vsel %vm3301_vm1, %v3261_v11, %v6236_v57  ;;  %v6564_v17 = vpop.permute.xlu1 %2802 }
 0x13c   : > { %3014 = vrot.lane.b32.xlu0 %v4412_v45, %s4917_s30  ;;  %v6552_v3 = vld [vmem:[#allocation2 + $0x88] sm:$0xf]  ;;  %v1056_v4 = vrot.slane %v1054_v19, 4  ;;  %v1060_v48 = vshll.u32 %v6529_v24, 16  ;;  %2886 = vrot.lane.b32.xlu1 %v4380_v51, %s4918_s4  ;;  %v1047_v45 = vor.u32 %v1046_v21, %v1043_v13  ;;  %v2261_v41 = vshrl.u32 %v6541_v27, 16 }
 0x13d   : > { %v6549_v46 = vsel %vm5020_vm9, %v7630_v47, %v7628_v56  ;;  %7631 = vst [vmem:[#allocation36_spill] sm:$0xff] %v6552_v3  ;;  %v6556_v22 = vld [vmem:[#allocation2 + $0x88] sm:$0xf]  ;;  %v2250_v28 = vshrl.u32 %v6552_v3, 16  ;;  %v1482_v53 = vsel %vm5047_vm13, %v1477_v10, %v1481_v37  ;;  %v711_v58 = vld [vmem:[#allocation2 + $0x8c] sm:$0x1]  ;;  %v6570_v47 = vpop.permute.xlu0 %3026  ;;  %v3342_v25 = vsel %vm3334_vm2, %v3307_v35, %v6283_v33 }
 0x13e   : > { %7632 = vst [vmem:[#allocation12_spill] sm:$0xff] %v6556_v22  ;;  %v2246_v2 = vshll.u32 %v6552_v3, 16  ;;  %v1990_v56 = vld [vmem:[#allocation2 + $0x84] sm:$0xf]  ;;  %v4389_v57 = vcombine.low %v1472_v59, %v1482_v53  ;;  %v712_v11 = vsel %vm4993_vm3, %v501_v30, %v711_v58  ;;  %v1931_v19 = vrot.slane %v6556_v22, 5 }
 0x13f   : > { %v2237_v37 = vshrl.u32 %v1990_v56, 16  ;;  %v2240_v10 = vshll.u32 %v1990_v56, 16  ;;  %v4428_v26 = vcombine.low %v1990_v56, %v6552_v3  ;;  %713 = vst [vmem:[#allocation2 + $0x8c] sm:$0x1] %v712_v11  ;;  %v1805_v13 = vld [vmem:[#allocation2 + $0x84] sm:$0xe] }
 0x140   : > { %v6573_v51 = vrot.slane %v2246_v2, 5  ;;  %v2252_v21 = vrot.slane %v2250_v28, 4  ;;  %v1628_v59 = vshrl.u32 %v6513_v29, 16  ;;  %v1062_v53 = vrot.slane %v1060_v48, 5 }
 0x141   : > { %v2264_v1 = vshll.u32 %v6541_v27, 16  ;;  %v2239_v30 = vrot.slane %v2237_v37, 4  ;;  %v2242_v58 = vrot.slane %v2240_v10, 5  ;;  %3110 = vrot.lane.b32.xlu0 %v4428_v26, %s4916_s29  ;;  %v1048_v18 = vrot.slane %v1047_v45, 4  ;;  %v6586_v26 = vpop.permute.xlu1 %2898  ;;  %v6591_v45 = vld [vmem:[#allocation2 + $0x94] sm:$0xf] }
 0x142   : > { %v3391_v2 = vsel %vm3252_vm15, %v4389_v57, %v6242_v50  ;;  %v4301_v56 = vrot.slane %v1805_v13, 9  ;;  %v1933_v11 = vrot.slane %v1931_v19, 4  ;;  %v1057_v28 = vor.u32 %v1056_v4, %v6539_v14  ;;  %7633 = vst [vmem:[#allocation17_spill] sm:$0xff] %v6591_v45  ;;  %v6593_v13 = vpop.permute.xlu0 %3122 }
 0x143   : > { %v2243_v60 = vor.u32 %v2242_v58, %v2239_v30  ;;  %v2253_v48 = vor.u32 %v2252_v21, %v6573_v51  ;;  %v3436_v37 = vsel %vm3301_vm1, %v3391_v2, %v6287_v5  ;;  %v2263_v10 = vrot.slane %v2261_v41, 4 }
 0x144   : > { %v1053_v33 = vsel %vm5047_vm13, %v1048_v18, %v6539_v14  ;;  %v1058_v35 = vrot.slane %v1057_v28, 4  ;;  %v2266_v50 = vrot.slane %v2264_v1, 5  ;;  %v4285_v57 = vrot.slane %v1194_v62, 9  ;;  %v4790_v14 = vld [vmem:[#allocation2 + $0xb8] sm:$0xf] }
 0x145   : > { %v2244_v4 = vrot.slane %v2243_v60, 4  ;;  %v1323_v21 = vrot.slane %v6507_v39, 5  ;;  %v1326_v30 = vrot.slane %v6529_v24, 5  ;;  %v3470_v5 = vsel %vm3334_vm2, %v3436_v37, %v6332_v61  ;;  %v6616_v15 = vpop.permute.xlu1 %2700 }
 0x146   : > { %v6599_v41 = vld [vmem:[#allocation2 + $0x8c] sm:$0x1]  ;;  %v1063_v18 = vsel %vm5047_vm13, %v1058_v35, %v1062_v53  ;;  %3758 = vmatprep.mubr.bf16.mxu0 %v3470_v5  ;;  %v1757_v60 = vshll.u32 %v4790_v14, 16  ;;  %v1761_v1 = vshrl.u32 %v4790_v14, 16  ;;  %v2254_v39 = vrot.slane %v2253_v48, 4 }
 0x147   : > { %v6601_v58 = vld [vmem:[#allocation2 + $0x8c] sm:$0x1]  ;;  %v2256_v24 = vshll.u32 %v6599_v41, 16  ;;  %v1631_v2 = vshll.u32 %v6513_v29, 16  ;;  %v2274_v61 = vshrl.u32 %v6591_v45, 16  ;;  %3759 = vmatmul.mubr.bf16.gmra.mrb[8].mxu0 %v3342_v25  ;;  %v4349_v37 = vcombine.low %v1053_v33, %v1063_v18 }
 0x148   : > { %7634 = vst [vmem:[#allocation48_spill] sm:$0xff] %v6601_v58  ;;  %v1934_v28 = vrot.slane %v6601_v58, 5  ;;  %v1324_v53 = vsel %vm5020_vm9, %v4285_v57, %v1323_v21  ;;  %v1325_v35 = vrot.slane %v1323_v21, 4  ;;  %v2249_v5 = vsel %vm5047_vm13, %v2244_v4, %v6573_v51  ;;  %v6625_v57 = vld [vmem:[#allocation2 + $0x98] sm:$0x1]  ;;  %v6627_v51 = vpop.permute.xlu0 %3202 }
 0x149   : > { %v2258_v14 = vrot.slane %v2256_v24, 5  ;;  %v1759_v48 = vrot.slane %v1757_v60, 5  ;;  %v1763_v62 = vrot.slane %v1761_v1, 4  ;;  %v1932_v29 = vsel %vm5020_vm9, %v4301_v56, %v1931_v19  ;;  %2712 = vrot.lane.b32.xlu1 %v4349_v37, %s4917_s30  ;;  %v6635_v56 = vld [vmem:[#allocation2 + $0x84] sm:$0xf]  ;;  %v7637_v24 = vld [vmem:[#allocation18_spill] sm:$0xff] }
 0x14a   : > { %v1935_v25 = vsel %vm5020_vm9, %v1933_v11, %v1934_v28  ;;  %v1327_v33 = vsel %vm5020_vm9, %v1325_v35, %v1326_v30  ;;  %v2267_v21 = vor.u32 %v2266_v50, %v2263_v10  ;;  %v6631_v18 = vrot.slane %v1628_v59, 4  ;;  %v7639_v50 = vld [vmem:[#allocation25_spill] sm:$0xff] }
 0x14b   : > { %v2259_v4 = vsel %vm5047_vm13, %v2254_v39, %v2258_v14  ;;  %v6633_v60 = vrot.slane %v1631_v2, 5  ;;  %v4365_v19 = vcombine.low %v1324_v53, %v1327_v33  ;;  %v1764_v1 = vor.u32 %v1763_v62, %v1759_v48  ;;  %v6644_v2 = vld [vmem:[#allocation2 + $0x94] sm:$0xf]  ;;  %v6646_v53 = vld [vmem:[#allocation2 + $0x98] sm:$0x1] }
 0x14c   : > { %7635 = vst [vmem:[#allocation14_spill] sm:$0xff] %v6631_v18  ;;  %v4444_v11 = vcombine.low %v2249_v5, %v2259_v4  ;;  %v7638_v28 = vshll.u32 %v7637_v24, 16  ;;  %v2270_v37 = vshll.u32 %v6591_v45, 16  ;;  %v4413_v10 = vcombine.low %v1932_v29, %v1935_v25  ;;  %7640 = vst [vmem:[#allocation8_spill] sm:$0xff] %v6646_v53  ;;  %v1806_v25 = vld [vmem:[#allocation2 + $0x90] sm:$0xe] }
 0x14d   : > { %7636 = vst [vmem:[#allocation24_spill] sm:$0xff] %v6633_v60  ;;  %v1760_v35 = vsel %vm5047_vm13, %v7639_v50, %v1759_v48  ;;  %v2276_v39 = vrot.slane %v2274_v61, 4  ;;  %v2280_v59 = vshll.u32 %v6625_v57, 16  ;;  %2792 = vrot.lane.b32.xlu1 %v4365_v19, %s4916_s29  ;;  %v1765_v62 = vrot.slane %v1764_v1, 4  ;;  %v4791_v4 = vld [vmem:[#allocation2 + $0xa8] sm:$0xf]  ;;  %v6658_v19 = vpop.permute.xlu1 %2780  ;;  %v6665_v61 = vpop.permute.xlu0 %3004 }
 0x14e   : > { %v1769_v30 = vrot.slane %v7638_v28, 5  ;;  %3190 = vrot.lane.b32.xlu0 %v4444_v11, %s4918_s4  ;;  %v2268_v5 = vrot.slane %v2267_v21, 4  ;;  %v2272_v14 = vrot.slane %v2270_v37, 5  ;;  %v4381_v29 = vcombine.low %v6635_v56, %v6556_v22  ;;  %v4792_v24 = vld [vmem:[#allocation2 + $0xac] sm:$0xf] }
 0x14f   : > { %v4337_v28 = vcombine.low %v4791_v4, %v4792_v24  ;;  %v6656_v11 = vld [vmem:[#allocation2 + $0x84] sm:$0xf]  ;;  %v2282_v50 = vrot.slane %v2280_v59, 5  ;;  %v6663_v48 = vld [vmem:[#allocation2 + $0x88] sm:$0xf]  ;;  %v4302_v33 = vrot.slane %v1806_v25, 9 }
 0x150   : > { %7641 = vst [vmem:[#allocation9_spill] sm:$0xff] %v6656_v11  ;;  %v1770_v1 = vsel %vm5047_vm13, %v1765_v62, %v1769_v30  ;;  %v2277_v37 = vor.u32 %v2276_v39, %v2272_v14  ;;  %7642 = vst [vmem:[#allocation18_spill] sm:$0xff] %v6663_v48  ;;  %v1938_v42 = vrot.slane %v6644_v2, 5  ;;  %v1941_v4 = vrot.slane %v6646_v53, 5  ;;  %v6675_v59 = vld [vmem:[#allocation2 + $0x9c] sm:$0xf] }
 0x151   : > { %v4401_v22 = vcombine.low %v1760_v35, %v1770_v1  ;;  %v2273_v24 = vsel %vm5047_vm13, %v2268_v5, %v2272_v14  ;;  %2888 = vrot.lane.b32.xlu1 %v4381_v29, %s4918_s4  ;;  %v1065_v30 = vshrl.u32 %v6656_v11, 16  ;;  %v1068_v39 = vshll.u32 %v6656_v11, 16  ;;  %v792_v1 = vld [vmem:[#allocation2 + $0x8c] sm:$0x1]  ;;  %v6690_v58 = vpop.permute.xlu1 %2876  ;;  %v6705_v18 = vld [vmem:[#allocation2 + $0xa0] sm:$0xf] }
 0x152   : > { %3016 = vrot.lane.b32.xlu0 %v4413_v10, %s4917_s30  ;;  %v2278_v21 = vrot.slane %v2277_v37, 4  ;;  %v3297_v35 = vsel %vm3252_vm15, %v4337_v28, %v6330_v54  ;;  %v1652_v62 = vshrl.u32 %v6635_v56, 16  ;;  %v1940_v25 = vrot.slane %v1938_v42, 4 }
 0x153   : > { %v1074_v10 = vshll.u32 %v6663_v48, 16  ;;  %v3427_v5 = vsel %vm3252_vm15, %v4401_v22, %v6359_v43  ;;  %v1655_v29 = vshll.u32 %v6635_v56, 16  ;;  %v1067_v37 = vrot.slane %v1065_v30, 4  ;;  %v6698_v30 = vpop.permute.xlu0 %3100 }
 0x154   : > { %v2283_v14 = vsel %vm5047_vm13, %v2278_v21, %v2282_v50  ;;  %v1939_v53 = vsel %vm5020_vm9, %v4302_v33, %v1938_v42  ;;  %v1942_v54 = vsel %vm5020_vm9, %v1940_v25, %v1941_v4  ;;  %v1070_v28 = vrot.slane %v1068_v39, 5 }
 0x155   : > { %v4445_v11 = vcombine.low %v2273_v24, %v2283_v14  ;;  %v7643_v43 = vcombine.low %v6541_v27, %v6591_v45  ;;  %v1076_v22 = vrot.slane %v1074_v10, 5  ;;  %v1078_v21 = vshrl.u32 %v6663_v48, 16  ;;  %v1195_v24 = vld [vmem:[#allocation2 + $0x84] sm:$0xe] }
 0x156   : > { %v1084_v56 = vshll.u32 %v792_v1, 16  ;;  %v2285_v50 = vshrl.u32 %v6675_v59, 16  ;;  %v3460_v42 = vsel %vm3301_vm1, %v3427_v5, %v6396_v63  ;;  %v3331_v33 = vsel %vm3301_vm1, %v3297_v35, %v6355_v12 }
 0x157   : > { %3112 = vrot.lane.b32.xlu0 %v7643_v43, %s4916_s29  ;;  %v1071_v4 = vor.u32 %v1070_v28, %v1067_v37  ;;  %v2288_v39 = vshll.u32 %v6675_v59, 16  ;;  %v4414_v27 = vcombine.low %v1939_v53, %v1942_v54  ;;  %v1080_v25 = vrot.slane %v1078_v21, 4  ;;  %v4793_v28 = vld [vmem:[#allocation2 + $0x34] sm:$0xf] }
 0x158   : > { %v1086_v10 = vrot.slane %v1084_v56, 5  ;;  %v2287_v14 = vrot.slane %v2285_v50, 4  ;;  %v4286_v45 = vrot.slane %v1195_v24, 9  ;;  %v1330_v3 = vrot.slane %v6663_v48, 5  ;;  %v6717_v56 = vpop.permute.xlu1 %2702  ;;  %v6722_v24 = vpop.permute.xlu0 %3180 }
 0x159   : > { %v1072_v43 = vrot.slane %v1071_v4, 4  ;;  %v2290_v60 = vrot.slane %v2288_v39, 5  ;;  %v1081_v63 = vor.u32 %v1080_v25, %v1076_v22  ;;  %v1333_v5 = vrot.slane %v792_v1, 5 }
 0x15a   : > { %v3506_v12 = vsel %vm3334_vm2, %v3460_v42, %v6425_v32  ;;  %v3378_v53 = vsel %vm3334_vm2, %v3331_v33, %v6388_v40  ;;  %v6713_v35 = vrot.slane %v1652_v62, 4  ;;  %v6715_v37 = vrot.slane %v1655_v29, 5  ;;  %v6726_v29 = vld [vmem:[#allocation2 + $0xa4] sm:$0x1] }
 0x15b   : > { %3192 = vrot.lane.b32.xlu0 %v4445_v11, %s4918_s4  ;;  %v1332_v54 = vrot.slane %v1330_v3, 4  ;;  %3854 = vmatprep.mubr.bf16.mxu1 %v3506_v12  ;;  %v1493_v21 = vshll.u32 %v4793_v28, 16  ;;  %v1077_v11 = vsel %vm5047_vm13, %v1072_v43, %v1076_v22  ;;  %v1082_v1 = vrot.slane %v1081_v63, 4  ;;  %v4795_v63 = vld [vmem:[#allocation2 + $0x28] sm:$0xf] }
 0x15c   : > { %v2298_v50 = vshrl.u32 %v6705_v18, 16  ;;  %3855 = vmatmul.mubr.bf16.gmra.mrb[8].mxu1 %v3378_v53  ;;  %v1497_v32 = vshrl.u32 %v4793_v28, 16  ;;  %v4430_v40 = vcombine.low %v6675_v59, %v6705_v18  ;;  %v2291_v42 = vor.u32 %v2290_v60, %v2287_v14  ;;  %v4794_v59 = vld [vmem:[#allocation2 + $0x24] sm:$0xf]  ;;  %v7644_v28 = vld [vmem:[#allocation21_spill] sm:$0xff] }
 0x15d   : > { %v1495_v62 = vrot.slane %v1493_v21, 5  ;;  %v2294_v33 = vshll.u32 %v6705_v18, 16  ;;  %v1087_v22 = vsel %vm5047_vm13, %v1082_v1, %v1086_v10  ;;  %v1331_v4 = vsel %vm5020_vm9, %v4286_v45, %v1330_v3 }
 0x15e   : > { %v1334_v39 = vsel %vm5020_vm9, %v1332_v54, %v1333_v5  ;;  %v1499_v25 = vrot.slane %v1497_v32, 4  ;;  %v4350_v43 = vcombine.low %v1077_v11, %v1087_v22  ;;  %v4326_v12 = vcombine.low %v4794_v59, %v4795_v63  ;;  %v6744_v54 = vld [vmem:[#allocation2 + $0x90] sm:$0xf]  ;;  %v6746_v11 = vpop.permute.xlu1 %2782  ;;  %v7646_v32 = vld [vmem:[#allocation31_spill] sm:$0xff] }
 0x15f   : > { %3018 = vrot.lane.b32.xlu0 %v4414_v27, %s4917_s30  ;;  %v2292_v53 = vrot.slane %v2291_v42, 4  ;;  %v2296_v60 = vrot.slane %v2294_v33, 5  ;;  %v7645_v21 = vshll.u32 %v7644_v28, 16  ;;  %v2300_v48 = vrot.slane %v2298_v50, 4 }
 0x160   : > { %v1500_v14 = vor.u32 %v1499_v25, %v1495_v62  ;;  %v2304_v10 = vshll.u32 %v6726_v29, 16  ;;  %v2536_v1 = vrot.slane %v6599_v41, 5  ;;  %v2543_v3 = vrot.slane %v6625_v57, 5  ;;  %2714 = vrot.lane.b32.xlu1 %v4350_v43, %s4917_s30  ;;  %v6752_v25 = vpop.permute.xlu0 %3006  ;;  %v4796_v43 = vld [vmem:[#allocation2 + $0xc4] sm:$0xf] }
 0x161   : > { %v1505_v27 = vrot.slane %v7645_v21, 5  ;;  %v4366_v5 = vcombine.low %v1331_v4, %v1334_v39  ;;  %v1496_v50 = vsel %vm5047_vm13, %v7646_v32, %v1495_v62  ;;  %v2301_v33 = vor.u32 %v2300_v48, %v2296_v60  ;;  %v2417_v57 = vld [vmem:[#allocation2 + $0xb4] sm:$0xe] }
 0x162   : > { %v1501_v42 = vrot.slane %v1500_v14, 4  ;;  %v2306_v22 = vrot.slane %v2304_v10, 5  ;;  %v3264_v59 = vsel %vm3252_vm15, %v4326_v12, %v6418_v44  ;;  %v2297_v4 = vsel %vm5047_vm13, %v2292_v53, %v2296_v60  ;;  %v4797_v53 = vld [vmem:[#allocation2 + $0xb4] sm:$0xf]  ;;  %v4798_v60 = vld [vmem:[#allocation2 + $0xb8] sm:$0xf] }
 0x163   : > { %3114 = vrot.lane.b32.xlu0 %v4430_v40, %s4916_s29  ;;  %v1676_v39 = vshrl.u32 %v6744_v54, 16  ;;  %v1781_v63 = vshll.u32 %v4796_v43, 16  ;;  %v2302_v28 = vrot.slane %v2301_v33, 4  ;;  %v4382_v48 = vcombine.low %v6744_v54, %v6644_v2 }
 0x164   : > { %v1506_v40 = vsel %vm5047_vm13, %v1501_v42, %v1505_v27  ;;  %v1785_v62 = vshrl.u32 %v4796_v43, 16  ;;  %2794 = vrot.lane.b32.xlu1 %v4366_v5, %s4916_s29  ;;  %v3309_v44 = vsel %vm3301_vm1, %v3264_v59, %v6457_v34  ;;  %v4338_v21 = vcombine.low %v4797_v53, %v4798_v60  ;;  %v4799_v27 = vld [vmem:[#allocation2 + $0x40] sm:$0xf]  ;;  %v2404_v53 = vld [vmem:[#allocation2 + $0x18] sm:$0xe]  ;;  %v6780_v60 = vpop.permute.xlu0 %3102 }
 0x165   : > { %v4390_v14 = vcombine.low %v1496_v50, %v1506_v40  ;;  %v1783_v12 = vrot.slane %v1781_v63, 5  ;;  %v2307_v10 = vsel %vm5047_vm13, %v2302_v28, %v2306_v22  ;;  %v1517_v42 = vshll.u32 %v4799_v27, 16  ;;  %v7647_v50 = vld [vmem:[#allocation26_spill] sm:$0xff]  ;;  %v6774_v63 = vpop.permute.xlu1 %2878 }
 0x166   : > { %v1787_v32 = vrot.slane %v1785_v62, 4  ;;  %v1521_v33 = vshrl.u32 %v4799_v27, 16  ;;  %v4446_v45 = vcombine.low %v2297_v4, %v2307_v10  ;;  %v3345_v5 = vsel %vm3334_vm2, %v3309_v44, %v6482_v7  ;;  %v7649_v7 = vld [vmem:[#allocation40_spill] sm:$0xff] }
 0x167   : > { %v3394_v43 = vsel %vm3252_vm15, %v4390_v14, %v6460_v20  ;;  %v7648_v34 = vshll.u32 %v7647_v50, 16  ;;  %v3300_v28 = vsel %vm3252_vm15, %v4338_v21, %v6518_v31  ;;  %v1519_v62 = vrot.slane %v1517_v42, 5  ;;  %v7650_v21 = vld [vmem:[#allocation32_spill] sm:$0xff] }
 0x168   : > { %v3438_v40 = vsel %vm3301_vm1, %v3394_v43, %v6485_v49  ;;  %v1788_v22 = vor.u32 %v1787_v32, %v1783_v12  ;;  %3194 = vrot.lane.b32.xlu0 %v4446_v45, %s4918_s4  ;;  %2890 = vrot.lane.b32.xlu1 %v4382_v48, %s4918_s4  ;;  %v1784_v4 = vsel %vm5047_vm13, %v7649_v7, %v1783_v12  ;;  %v1523_v14 = vrot.slane %v1521_v33, 4  ;;  %v4800_v48 = vld [vmem:[#allocation2 + $0x30] sm:$0xf]  ;;  %v4801_v32 = vld [vmem:[#allocation2 + $0x34] sm:$0xf]  ;;  %v7652_v43 = vld [vmem:[#allocation7_spill] sm:$0xff] }
 0x169   : > { %v1793_v59 = vrot.slane %v7648_v34, 5  ;;  %v3473_v20 = vsel %vm3334_vm2, %v3438_v40, %v6522_v38  ;;  %v3333_v49 = vsel %vm3301_vm1, %v3300_v28, %v6564_v17  ;;  %v7651_v45 = vshll.u32 %v7650_v21, 16  ;;  %v7654_v34 = vld [vmem:[#allocation13_spill] sm:$0xff]  ;;  %v6810_v21 = vpop.permute.xlu1 %2704  ;;  %s161_s4 = sand.u32 1, %s4905_s13  }
 0x16a   : > { %3766 = vmatprep.mubr.bf16.mxu0 %v3473_v20  ;;  %v1789_v31 = vrot.slane %v1788_v22, 4  ;;  %v3381_v44 = vsel %vm3334_vm2, %v3333_v49, %v6586_v26  ;;  %v4327_v27 = vcombine.low %v4800_v48, %v4801_v32  ;;  %v1524_v38 = vor.u32 %v1523_v14, %v1519_v62  ;;  %v7655_v40 = vld [vmem:[#allocation41_spill] sm:$0xff]  ;;  %v4802_v22 = vld [vmem:[#allocation2 + $0x4c] sm:$0xf]  ;;  %s4272_s19 = sshll.u32 %s161_s4, 8  ;;  %s7436_s16 = scalar_lea.sflag [#allocation4], %s161_s4 }
 0x16b   : > { %v1529_v10 = vrot.slane %v7651_v45, 5  ;;  %3767 = vmatmul.mubr.bf16.gmra.mrb[12].mxu0 %v3345_v5  ;;  %v4307_v42 = vrot.slane %v2404_v53, 9  ;;  %v7653_v12 = vrot.slane %v7652_v43, 5  ;;  %v4452_v17 = vcombine.low %v6549_v46, %v7654_v34  ;;  %v2406_v32 = vld [vmem:[#allocation2 + $0x30] sm:$0xe]  ;;  %v7659_v43 = vld [vmem:[#allocation38_spill] sm:$0xff] }
 0x16c   : > { %v1794_v33 = vsel %vm5047_vm13, %v1789_v31, %v1793_v59  ;;  %v1520_v26 = vsel %vm5047_vm13, %v7655_v40, %v1519_v62  ;;  %v1541_v28 = vshll.u32 %v4802_v22, 16  ;;  %v1545_v20 = vshrl.u32 %v4802_v22, 16  ;;  %v7657_v31 = vld [vmem:[#allocation10_spill] sm:$0xff]  ;;  %v4808_v46 = vld [vmem:[#allocation2 + $0x64] sm:$0xf]  ;;  %s7271_s20 = scalar_lea.vmem [#allocation3], %s4272_s19 }
 0x16d   : > { %v2472_v50 = vrot.slane %v7653_v12, 4  ;;  %v4402_v7 = vcombine.low %v1784_v4, %v1794_v33  ;;  %v1525_v5 = vrot.slane %v1524_v38, 4  ;;  %v3267_v53 = vsel %vm3252_vm15, %v4327_v27, %v6616_v15  ;;  %v3183_v38 = vpop.permute.xlu0 %3182  ;;  %s4206_s25 = sshll.u32 %s7271_s20, 4  ;;  %s7430_s25 = int_to_ptr.vmem [resolvable:$true] %s4206_s25 }
 0x16e   : > { %v7656_v49 = vmov %v7653_v12  ;;  %v3311_v59 = vsel %vm3301_vm1, %v3267_v53, %v6658_v19  ;;  %v7658_v62 = vrot.slane %v7657_v31, 5  ;;  %v1543_v4 = vrot.slane %v1541_v28, 5  ;;  %v2407_v19 = vld [vmem:[#allocation2 + $0x3c] sm:$0xe]  ;;  %v4804_v53 = vld [vmem:[#allocation2 + $0x40] sm:$0xf]  ;;  %p4858_p0 = scmp.lt.s32.totalorder %s7430_s25, %s4856_s7 }
 0x16f   : > { %v2471_v14 = vsel %vm5020_vm9, %v4307_v42, %v7656_v49  ;;  %v1547_v48 = vrot.slane %v1545_v20, 4  ;;  %v3430_v15 = vsel %vm3252_vm15, %v4402_v7, %v6570_v47  ;;  %v1530_v27 = vsel %vm5047_vm13, %v1525_v5, %v1529_v10  ;;  %v4803_v7 = vld [vmem:[#allocation2 + $0x3c] sm:$0xf]  ;;  %v7662_v49 = vld [vmem:[#allocation19_spill] sm:$0xff]  ;;  %s4851_s5 = scalar_lea.vmem %s7430_s25, 4096 }
 0x170   : > { %v2474_v45 = vsel %vm5020_vm9, %v2472_v50, %v7658_v62  ;;  %v7660_v12 = vshll.u32 %v7659_v43, 16  ;;  %v3462_v40 = vsel %vm3301_vm1, %v3430_v15, %v6593_v13  ;;  %v4391_v22 = vcombine.low %v1520_v26, %v1530_v27  ;;  %v7661_v50 = vld [vmem:[#allocation47_spill] sm:$0xff]  ;;  %p4852_p11 = scmp.ne.s32.totalorder %s7430_s25, %s4851_s5  ;;  %p4859_p1 = scmp.lt.s32.totalorder %s4857_s8, %s4851_s5 }
 0x171   : > { %v4451_v42 = vcombine.low %v2471_v14, %v2474_v45  ;;  %v1544_v28 = vsel %vm5047_vm13, %v7661_v50, %v1543_v4  ;;  %v1548_v20 = vor.u32 %v1547_v48, %v1543_v4  ;;  %v3509_v47 = vsel %vm3334_vm2, %v3462_v40, %v6627_v51  ;;  %v7664_v45 = vld [vmem:[#allocation27_spill] sm:$0xff]  ;;  %v2408_v4 = vld [vmem:[#allocation2 + $0x48] sm:$0xe]  ;;  %v2409_v40 = vld [vmem:[#allocation2 + $0x54] sm:$0xe] }
 0x172   : > { %v1553_v33 = vrot.slane %v7660_v12, 5  ;;  %v4328_v10 = vcombine.low %v4803_v7, %v4804_v53  ;;  %v4309_v5 = vrot.slane %v2406_v32, 9  ;;  %v7663_v14 = vrot.slane %v7662_v49, 5  ;;  %3862 = vmatprep.mubr.bf16.mxu1 %v3509_v47  ;;  %v7667_v12 = vld [vmem:[#allocation20_spill] sm:$0xff]  ;;  %p4853_p12 = pnand %p4852_p11, %p4980_p5  ;;  %p4860_p2 = por %p4859_p1, %p4858_p0 }
 0x173   : > { %v3397_v13 = vsel %vm3252_vm15, %v4391_v22, %v6665_v61  ;;  %v1549_v26 = vrot.slane %v1548_v20, 4  ;;  %v4310_v62 = vrot.slane %v2407_v19, 9  ;;  %v7665_v15 = vrot.slane %v7664_v45, 5  ;;  %3863 = vmatmul.mubr.bf16.gmra.mrb[12].mxu1 %v3381_v44  ;;  %v6849_v22 = vpop.permute.xlu1 %2784  ;;  %v6862_v20 = vpop.permute.xlu0 %3008 }
 0x174   : > { %v2486_v31 = vrot.slane %v7663_v14, 4  ;;  %v3440_v51 = vsel %vm3301_vm1, %v3397_v13, %v6698_v30  ;;  %v3348_v48 = vsel %vm3334_vm2, %v3311_v59, %v6690_v58  ;;  %v7666_v32 = vmov %v7663_v14  ;;  %4643 = vmatprep.mubr.msk.bf16.mxu1 %vm3252_vm15, %v4451_v42  ;;  %v7670_v42 = vld [vmem:[#allocation30_spill] sm:$0xff]  ;;  %v7672_v14 = vld [vmem:[#allocation35_spill] sm:$0xff]  ;;  %p4854_p13 = pneg %p4853_p12 }
 0x175   : > { %v2493_v27 = vrot.slane %v7665_v15, 4  ;;  %v2485_v43 = vsel %vm5020_vm9, %v4309_v5, %v7666_v32  ;;  %v7668_v61 = vrot.slane %v7667_v12, 5  ;;  %v3476_v30 = vsel %vm3334_vm2, %v3440_v51, %v6722_v24 }
 0x176   : > { %v1554_v58 = vsel %vm5047_vm13, %v1549_v26, %v1553_v33  ;;  %v7669_v59 = vmov %v7665_v15  ;;  %v1679_v47 = vshll.u32 %v6744_v54, 16  ;;  %3774 = vmatprep.mubr.bf16.mxu0 %v3476_v30  ;;  %v7671_v53 = vrot.slane %v7670_v42, 5  ;;  %v7675_v15 = vld [vmem:[#allocation43_spill] sm:$0xff]  ;;  %v4811_v54 = vld [vmem:[#allocation2 + $0x70] sm:$0xf]  ;;  %p4861_p3 = pnand %p4860_p2, %p4854_p13 }
 0x177   : > { %v2488_v19 = vsel %vm5020_vm9, %v2486_v31, %v7668_v61  ;;  %v6860_v50 = vsel %vm5020_vm9, %v4310_v62, %v7669_v59  ;;  %v4392_v7 = vcombine.low %v1544_v28, %v1554_v58  ;;  %v4311_v33 = vrot.slane %v2408_v4, 9  ;;  %3775 = vmatmul.mubr.bf16.gmra.mrb[16].mxu0 %v3348_v48  ;;  %v7677_v48 = vld [vmem:[#allocation37_spill] sm:$0xff] }
 0x178   : > { %v4453_v44 = vcombine.low %v2485_v43, %v2488_v19  ;;  %v6869_v24 = vsel %vm5020_vm9, %v2493_v27, %v7671_v53  ;;  %v3270_v5 = vsel %vm3252_vm15, %v4328_v10, %v6717_v56  ;;  %v7673_v31 = vrot.slane %v7672_v14, 5  ;;  %v4805_v56 = vld [vmem:[#allocation2 + $0x58] sm:$0xf]  ;;  %v2410_v19 = vld [vmem:[#allocation2 + $0x60] sm:$0xe]  ;;  %v7680_v58 = vld [vmem:[#allocation45_spill] sm:$0xff]  ;;  %v2881_v53 = vpop.permute.xlu1 %2880 }
 0x179   : > { %v4454_v49 = vcombine.low %v6860_v50, %v6869_v24  ;;  %v4312_v26 = vrot.slane %v2409_v40, 9  ;;  %v3400_v28 = vsel %vm3252_vm15, %v4392_v7, %v6752_v25  ;;  %v7676_v27 = vrot.slane %v7675_v15, 5  ;;  %v2411_v40 = vld [vmem:[#allocation2 + $0x6c] sm:$0xe]  ;;  %v7698_v50 = vld [vmem:[#allocation33_spill] sm:$0xff] }
 0x17a   : > { %v2500_v13 = vrot.slane %v7673_v31, 4  ;;  %v7674_v62 = vmov %v7673_v31  ;;  %v1565_v10 = vshll.u32 %v4805_v56, 16  ;;  %v3442_v51 = vsel %vm3301_vm1, %v3400_v28, %v6780_v60  ;;  %v3105_v28 = vpop.permute.xlu0 %3104 }
 0x17b   : > { %v6883_v45 = vsel %vm5020_vm9, %v4311_v33, %v7674_v62  ;;  %v2507_v4 = vrot.slane %v7676_v27, 4  ;;  %v7678_v32 = vrot.slane %v7677_v48, 5  ;;  %v7679_v25 = vmov %v7676_v27  ;;  %4644 = vmatmul.mubr.msk.bf16.vlgmr.msra.gmra.mrb[16].mxu1 %vm3252_vm15, %v4452_v17 }
 0x17c   : > { %v6899_v12 = vsel %vm5020_vm9, %v4312_v26, %v7679_v25  ;;  %v1569_v61 = vshrl.u32 %v4805_v56, 16  ;;  %v3479_v30 = vsel %vm3334_vm2, %v3442_v51, %v3183_v38  ;;  %v7681_v59 = vrot.slane %v7680_v58, 5  ;;  %v4806_v38 = vld [vmem:[#allocation2 + $0x48] sm:$0xf]  ;;  %4647 = vmatprep.mubr.msk.bf16.mxu1 %vm3252_vm15, %v4453_v44 }
 0x17d   : > { %v6893_v43 = vsel %vm5020_vm9, %v2500_v13, %v7678_v32  ;;  %v1567_v42 = vrot.slane %v1565_v10, 5  ;;  %v3313_v33 = vsel %vm3301_vm1, %v3270_v5, %v6746_v11  ;;  %3782 = vmatprep.mubr.bf16.mxu0 %v3479_v30  ;;  %v4807_v13 = vld [vmem:[#allocation2 + $0x4c] sm:$0xf]  ;;  %v7682_v11 = vrot.slane %v6133_v23, 5 }
 0x17e   : > { %v4455_v60 = vcombine.low %v6883_v45, %v6893_v43  ;;  %v6908_v7 = vsel %vm5020_vm9, %v2507_v4, %v7681_v59  ;;  %v1571_v31 = vrot.slane %v1569_v61, 4  ;;  %v4329_v26 = vcombine.low %v4806_v38, %v4807_v13  ;;  %v7683_v4 = vld [vmem:[#allocation46_spill] sm:$0xff]  ;;  %v3185_v38 = vpop.permute.xlu0 %3184 }
 0x17f   : > { %v4456_v14 = vcombine.low %v6899_v12, %v6908_v7  ;;  %v3351_v62 = vsel %vm3334_vm2, %v3313_v33, %v6774_v63  ;;  %v4313_v45 = vrot.slane %v2410_v19, 9  ;;  %v2514_v5 = vrot.slane %v7682_v11, 4  ;;  %v2412_v19 = vld [vmem:[#allocation2 + $0x78] sm:$0xe] }
 0x180   : > { %v4314_v15 = vrot.slane %v2411_v40, 9  ;;  %v1572_v27 = vor.u32 %v1571_v31, %v1567_v42  ;;  %v7684_v56 = vshll.u32 %v7683_v4, 16  ;;  %v7685_v51 = vrot.slane %v6292_v55, 5  ;;  %3783 = vmatmul.mubr.bf16.gmra.mrb[20].mxu0 %v3351_v62  ;;  %v2413_v55 = vld [vmem:[#allocation2 + $0x84] sm:$0xe]  ;;  %v2707_v31 = vpop.permute.xlu1 %2706 }
 0x181   : > { %v1589_v34 = vshll.u32 %v4808_v46, 16  ;;  %v1568_v63 = vsel %vm5047_vm13, %v6248_v36, %v1567_v42  ;;  %v7686_v17 = vmov %v7682_v11  ;;  %v7687_v44 = vrot.slane %v6193_v9, 5  ;;  %v4809_v4 = vld [vmem:[#allocation2 + $0x54] sm:$0xf] }
 0x182   : > { %v1577_v10 = vrot.slane %v7684_v56, 5  ;;  %v2521_v48 = vrot.slane %v7685_v51, 4  ;;  %v6934_v32 = vsel %vm5020_vm9, %v4313_v45, %v7686_v17  ;;  %v7688_v25 = vmov %v7685_v51  ;;  %v4810_v56 = vld [vmem:[#allocation2 + $0x58] sm:$0xf] }
 0x183   : > { %v6940_v43 = vsel %vm5020_vm9, %v2514_v5, %v7687_v44  ;;  %v6946_v61 = vsel %vm5020_vm9, %v4314_v15, %v7688_v25  ;;  %v1573_v36 = vrot.slane %v1572_v27, 4  ;;  %v3273_v23 = vsel %vm3252_vm15, %v4329_v26, %v6810_v21  ;;  %v2414_v27 = vld [vmem:[#allocation2 + $0x90] sm:$0xe]  ;;  %4648 = vmatmul.mubr.msk.bf16.gmra.mrb[20].mxu1 %vm3252_vm15, %v4454_v49 }
 0x184   : > { %v4457_v40 = vcombine.low %v6934_v32, %v6940_v43  ;;  %v7689_v9 = vrot.slane %v6347_v0, 5  ;;  %v3315_v58 = vsel %vm3301_vm1, %v3273_v23, %v6849_v22  ;;  %v1591_v42 = vrot.slane %v1589_v34, 5  ;;  %4651 = vmatprep.mubr.msk.bf16.mxu1 %vm3252_vm15, %v4455_v60  ;;  %v2787_v60 = vpop.permute.xlu1 %2786 }
 0x185   : > { %v1593_v33 = vshrl.u32 %v4808_v46, 16  ;;  %v1578_v21 = vsel %vm5047_vm13, %v1573_v36, %v1577_v10  ;;  %v3354_v0 = vsel %vm3334_vm2, %v3315_v58, %v2881_v53  ;;  %v4315_v13 = vrot.slane %v2412_v19, 9  ;;  %v7693_v53 = vld [vmem:[#allocation44_spill] sm:$0xff] }
 0x186   : > { %v6956_v30 = vsel %vm5020_vm9, %v2521_v48, %v7689_v9  ;;  %v7690_v26 = vrot.slane %v6415_v6, 5  ;;  %v4393_v45 = vcombine.low %v1568_v63, %v1578_v21  ;;  %v7691_v22 = vshll.u32 %v6195_v8, 16  ;;  %v7695_v63 = vld [vmem:[#allocation36_spill] sm:$0xff] }
 0x187   : > { %v4458_v59 = vcombine.low %v6946_v61, %v6956_v30  ;;  %v1595_v11 = vrot.slane %v1593_v33, 4  ;;  %v4316_v15 = vrot.slane %v2413_v55, 9  ;;  %v4330_v51 = vcombine.low %v4809_v4, %v4810_v56  ;;  %v7699_v33 = vld [vmem:[#allocation17_spill] sm:$0xff]  ;;  %v7705_v4 = vld [vmem:[#allocation48_spill] sm:$0xff]  ;;  %v2415_v30 = vld [vmem:[#allocation2 + $0x9c] sm:$0xe] }
 0x188   : > { %v2528_v62 = vrot.slane %v7690_v26, 4  ;;  %v1601_v5 = vrot.slane %v7691_v22, 5  ;;  %v7692_v48 = vmov %v7690_v26  ;;  %v7694_v46 = vrot.slane %v7693_v53, 5  ;;  %v7702_v26 = vld [vmem:[#allocation14_spill] sm:$0xff] }
 0x189   : > { %v6973_v10 = vsel %vm5020_vm9, %v4315_v13, %v7692_v48  ;;  %v7696_v8 = vrot.slane %v7695_v63, 5  ;;  %v3403_v6 = vsel %vm3252_vm15, %v4393_v45, %v6862_v20  ;;  %v1596_v44 = vor.u32 %v1595_v11, %v1591_v42  ;;  %v7701_v13 = vld [vmem:[#allocation24_spill] sm:$0xff] }
 0x18a   : > { %v6979_v34 = vsel %vm5020_vm9, %v2528_v62, %v7694_v46  ;;  %v3444_v23 = vsel %vm3301_vm1, %v3403_v6, %v3105_v28  ;;  %v1592_v24 = vsel %vm5047_vm13, %v7698_v50, %v1591_v42  ;;  %v4317_v49 = vrot.slane %v2414_v27, 9  ;;  %v2416_v27 = vld [vmem:[#allocation2 + $0xa8] sm:$0xe]  ;;  %v7709_v50 = vld [vmem:[#allocation42_spill] sm:$0xff] }
 0x18b   : > { %v2535_v17 = vrot.slane %v7696_v8, 4  ;;  %v4459_v25 = vcombine.low %v6973_v10, %v6979_v34  ;;  %v7697_v19 = vmov %v7696_v8  ;;  %v3482_v9 = vsel %vm3334_vm2, %v3444_v23, %v3185_v38  ;;  %v3011_v38 = vpop.permute.xlu0 %3010  ;;  %4652 = vmatmul.mubr.msk.bf16.gmra.mrb[24].mxu1 %vm3252_vm15, %v4456_v14  ;;  %v2883_v23 = vpop.permute.xlu1 %2882  ;;  %v7713_v14 = vld [vmem:[#allocation11_spill] sm:$0xff] }
 0x18c   : > { %v6995_v36 = vsel %vm5020_vm9, %v4316_v15, %v7697_v19  ;;  %v1597_v55 = vrot.slane %v1596_v44, 4  ;;  %v7700_v28 = vrot.slane %v7699_v33, 5  ;;  %v7703_v42 = vor.u32 %v7701_v13, %v7702_v26  ;;  %3790 = vmatprep.mubr.bf16.mxu0 %v3482_v9  ;;  %4655 = vmatprep.mubr.msk.bf16.mxu1 %vm3252_vm15, %v4457_v40 }
 0x18d   : > { %v7006_v20 = vsel %vm5020_vm9, %v2535_v17, %v2536_v1  ;;  %v7020_v41 = vrot.slane %v1676_v39, 4  ;;  %v7024_v1 = vrot.slane %v1679_v47, 5  ;;  %3791 = vmatmul.mubr.bf16.gmra.mrb[24].mxu0 %v3354_v0  ;;  %v1613_v47 = vshll.u32 %v4811_v54, 16 }
 0x18e   : > { %v4460_v58 = vcombine.low %v6995_v36, %v7006_v20  ;;  %v2542_v21 = vrot.slane %v7700_v28, 4  ;;  %v7016_v62 = vrot.slane %v7703_v42, 4  ;;  %v7704_v45 = vmov %v7700_v28  ;;  %v4812_v42 = vld [vmem:[#allocation2 + $0x7c] sm:$0xf] }
 0x18f   : > { %v7030_v11 = vsel %vm5020_vm9, %v4317_v49, %v7704_v45  ;;  %v1602_v22 = vsel %vm5047_vm13, %v1597_v55, %v1601_v5  ;;  %v1617_v15 = vshrl.u32 %v4811_v54, 16  ;;  %v1671_v56 = vshll.u32 %v7705_v4, 16 }
 0x190   : > { %v7038_v39 = vsel %vm5020_vm9, %v2542_v21, %v2543_v3  ;;  %v7706_v48 = vor.u32 %v6715_v37, %v6713_v35  ;;  %v4394_v0 = vcombine.low %v1592_v24, %v1602_v22  ;;  %v2547_v46 = vrot.slane %v6705_v18, 5  ;;  %v7707_v35 = vld [vmem:[#allocation6_spill] sm:$0xff]  ;;  %v7710_v24 = vld [vmem:[#allocation39_spill] sm:$0xff] }
 0x191   : > { %v4461_v5 = vcombine.low %v7030_v11, %v7038_v39  ;;  %v3276_v3 = vsel %vm3252_vm15, %v4330_v51, %v2707_v31  ;;  %v1615_v63 = vrot.slane %v1613_v47, 5  ;;  %v1619_v8 = vrot.slane %v1617_v15, 4  ;;  %v7715_v21 = vld [vmem:[#allocation15_spill] sm:$0xff] }
 0x192   : > { %v7044_v53 = vrot.slane %v7706_v48, 4  ;;  %v1682_v17 = vor.u32 %v7024_v1, %v7020_v41  ;;  %v3317_v6 = vsel %vm3301_vm1, %v3276_v3, %v2787_v60  ;;  %v4319_v44 = vrot.slane %v2416_v27, 9  ;;  %v3107_v60 = vpop.permute.xlu0 %3106  ;;  %v2418_v47 = vld [vmem:[#allocation2 + $0xc0] sm:$0xe]  ;;  %v7718_v48 = vld [vmem:[#allocation16_spill] sm:$0xff] }
 0x193   : > { %v7708_v37 = vrot.slane %v7707_v35, 5  ;;  %v1616_v31 = vsel %vm5047_vm13, %v7709_v50, %v1615_v63  ;;  %v1620_v51 = vor.u32 %v1619_v8, %v1615_v63  ;;  %v7711_v49 = vshll.u32 %v7710_v24, 16  ;;  %v2419_v8 = vld [vmem:[#allocation2 + $0xcc] sm:$0xe]  ;;  %4656 = vmatmul.mubr.msk.bf16.gmra.mrb[28].mxu1 %vm3252_vm15, %v4458_v59  ;;  %v4813_v18 = vld [vmem:[#allocation2 + $0x60] sm:$0xf] }
 0x194   : > { %v4320_v55 = vrot.slane %v2417_v57, 9  ;;  %v7714_v33 = vrot.slane %v7713_v14, 5  ;;  %v7716_v13 = vrot.slane %v7715_v21, 5  ;;  %v1637_v32 = vshll.u32 %v4812_v42, 16  ;;  %v7724_v14 = vld [vmem:[#allocation28_spill] sm:$0xff]  ;;  %4659 = vmatprep.mubr.msk.bf16.mxu1 %vm3252_vm15, %v4459_v25 }
 0x195   : > { %v2556_v19 = vrot.slane %v7708_v37, 4  ;;  %v1625_v9 = vrot.slane %v7711_v49, 5  ;;  %v7712_v12 = vmov %v7708_v37  ;;  %v1621_v43 = vrot.slane %v1620_v51, 4  ;;  %v7722_v51 = vld [vmem:[#allocation22_spill] sm:$0xff]  ;;  %v7726_v21 = vld [vmem:[#allocation12_spill] sm:$0xff] }
 0x196   : > { %v7072_v7 = vsel %vm5020_vm9, %v4319_v44, %v7712_v12  ;;  %v2563_v26 = vrot.slane %v7716_v13, 4  ;;  %v7717_v45 = vmov %v7716_v13  ;;  %v1641_v54 = vshrl.u32 %v4812_v42, 16  ;;  %v7728_v42 = vld [vmem:[#allocation23_spill] sm:$0xff] }
 0x197   : > { %v7078_v28 = vsel %vm5020_vm9, %v2556_v19, %v7714_v33  ;;  %v7088_v22 = vsel %vm5020_vm9, %v4320_v55, %v7717_v45  ;;  %v3406_v15 = vsel %vm3252_vm15, %v4394_v0, %v3011_v38  ;;  %v3357_v27 = vsel %vm3334_vm2, %v3317_v6, %v2883_v23  ;;  %v7720_v0 = vld [vmem:[#allocation34_spill] sm:$0xff] }
 0x198   : > { %v4463_v40 = vcombine.low %v7072_v7, %v7078_v28  ;;  %v7719_v57 = vrot.slane %v7718_v48, 5  ;;  %v1639_v63 = vrot.slane %v1637_v32, 5  ;;  %v3446_v44 = vsel %vm3301_vm1, %v3406_v15, %v3107_v60 }
 0x199   : > { %v1626_v35 = vsel %vm5047_vm13, %v1621_v43, %v1625_v9  ;;  %v1643_v19 = vrot.slane %v1641_v54, 4  ;;  %v7721_v6 = vshll.u32 %v7720_v0, 16  ;;  %v4321_v50 = vrot.slane %v2418_v47, 9  ;;  %v7733_v0 = vld [vmem:[#allocation8_spill] sm:$0xff] }
 0x19a   : > { %v7096_v3 = vsel %vm5020_vm9, %v2563_v26, %v7719_v57  ;;  %v7103_v38 = vcombine.low %v1616_v31, %v1626_v35  ;;  %v7723_v24 = vrot.slane %v7722_v51, 5  ;;  %v4322_v12 = vrot.slane %v2419_v8, 9  ;;  %v7731_v57 = vld [vmem:[#allocation29_spill] sm:$0xff] }
 0x19b   : > { %v4464_v37 = vcombine.low %v7088_v22, %v7096_v3  ;;  %v1649_v23 = vrot.slane %v7721_v6, 5  ;;  %v1644_v55 = vor.u32 %v1643_v19, %v1639_v63  ;;  %v7725_v60 = vrot.slane %v7724_v14, 5  ;;  %4660 = vmatmul.mubr.msk.bf16.gmra.mrb[32].mxu1 %vm3252_vm15, %v4460_v58 }
 0x19c   : > { %v2570_v49 = vrot.slane %v7723_v24, 4  ;;  %v1661_v9 = vshll.u32 %v7726_v21, 16  ;;  %v1640_v13 = vsel %vm5047_vm13, %v7016_v62, %v1639_v63  ;;  %v7727_v31 = vmov %v7723_v24  ;;  %v3187_v62 = vpop.permute.xlu0 %3186  ;;  %4663 = vmatprep.mubr.msk.bf16.mxu1 %vm3252_vm15, %v4461_v5  ;;  %v4814_v5 = vld [vmem:[#allocation2 + $0x64] sm:$0xf] }
 0x19d   : > { %v2577_v33 = vrot.slane %v7725_v60, 4  ;;  %v7119_v26 = vsel %vm5020_vm9, %v4321_v50, %v7727_v31  ;;  %v7729_v32 = vrot.slane %v7728_v42, 5  ;;  %v1665_v45 = vshrl.u32 %v7726_v21, 16 }
 0x19e   : > { %v1645_v54 = vrot.slane %v1644_v55, 4  ;;  %v7730_v15 = vmov %v7725_v60  ;;  %v7732_v63 = vrot.slane %v7731_v57, 5  ;;  %v3485_v61 = vsel %vm3334_vm2, %v3446_v44, %v3187_v62 }
 0x19f   : > { %v7125_v43 = vsel %vm5020_vm9, %v2570_v49, %v7729_v32  ;;  %v2576_v48 = vsel %vm5020_vm9, %v4322_v12, %v7730_v15  ;;  %v1663_v35 = vrot.slane %v1661_v9, 5  ;;  %v1667_v19 = vrot.slane %v1665_v45, 4  ;;  %3798 = vmatprep.mubr.bf16.mxu0 %v3485_v61  ;;  %v4816_v45 = vld [vmem:[#allocation2 + $0x70] sm:$0xf] }
 0x1a0   : > { %v4465_v47 = vcombine.low %v7119_v26, %v7125_v43  ;;  %v2579_v8 = vsel %vm5020_vm9, %v2577_v33, %v7732_v63  ;;  %v1695_v6 = vshll.u32 %v7733_v0, 16  ;;  %v1650_v50 = vsel %vm5047_vm13, %v1645_v54, %v1649_v23  ;;  %3799 = vmatmul.mubr.bf16.gmra.mrb[28].mxu0 %v3357_v27  ;;  %v3013_v20 = vpop.permute.xlu0 %3012  ;;  %v4815_v43 = vld [vmem:[#allocation2 + $0x6c] sm:$0xf] }
 0x1a1   : > { %v4466_v59 = vcombine.low %v2576_v48, %v2579_v8  ;;  %v1685_v51 = vshll.u32 %v6644_v2, 16  ;;  %v4396_v24 = vcombine.low %v1640_v13, %v1650_v50  ;;  %v1668_v49 = vor.u32 %v1667_v19, %v1663_v35 }
 0x1a2   : > { %v1673_v10 = vrot.slane %v1671_v56, 5  ;;  %v1689_v34 = vshrl.u32 %v6644_v2, 16  ;;  %v2550_v25 = vrot.slane %v6726_v29, 5  ;;  %v1683_v44 = vrot.slane %v1682_v17, 4  ;;  %v2709_v56 = vpop.permute.xlu1 %2708 }
 0x1a3   : > { %v4318_v55 = vrot.slane %v2415_v30, 9  ;;  %v1687_v12 = vrot.slane %v1685_v51, 5  ;;  %v2549_v23 = vrot.slane %v2547_v46, 4  ;;  %v1664_v27 = vsel %vm5047_vm13, %v7044_v53, %v1663_v35  ;;  %v4817_v30 = vld [vmem:[#allocation2 + $0x78] sm:$0xf] }
 0x1a4   : > { %v1669_v14 = vrot.slane %v1668_v49, 4  ;;  %v1691_v4 = vrot.slane %v1689_v34, 4  ;;  %v1697_v60 = vrot.slane %v1695_v6, 5  ;;  %v4331_v21 = vcombine.low %v4813_v18, %v4814_v5 }
 0x1a5   : > { %v2548_v1 = vsel %vm5020_vm9, %v4318_v55, %v2547_v46  ;;  %v2551_v53 = vsel %vm5020_vm9, %v2549_v23, %v2550_v25  ;;  %v1688_v17 = vsel %vm5047_vm13, %v1683_v44, %v1687_v12  ;;  %v3109_v46 = vpop.permute.xlu0 %3108  ;;  %v3409_v52 = vsel %vm3252_vm15, %v7103_v38, %v3013_v20  ;;  %v7735_v23 = vld [vmem:[#allocation9_spill] sm:$0xff] }
 0x1a6   : > { %v1674_v2 = vsel %vm5047_vm13, %v1669_v14, %v1673_v10  ;;  %v1692_v29 = vor.u32 %v1691_v4, %v1687_v12  ;;  %v4462_v33 = vcombine.low %v2548_v1, %v2551_v53  ;;  %v2789_v11 = vpop.permute.xlu1 %2788  ;;  %v3279_v9 = vsel %vm3252_vm15, %v4331_v21, %v2709_v56  ;;  %v7734_v12 = vld [vmem:[#allocation18_spill] sm:$0xff] }
 0x1a7   : > { %v4397_v41 = vcombine.low %v1664_v27, %v1674_v2  ;;  %v3319_v13 = vsel %vm3301_vm1, %v3279_v9, %v2789_v11  ;;  %v3448_v31 = vsel %vm3301_vm1, %v3409_v52, %v3109_v46  ;;  %v4332_v62 = vcombine.low %v4815_v43, %v4816_v45 }
 0x1a8   : > { %v1693_v36 = vrot.slane %v1692_v29, 4  ;;  %4664 = vmatmul.mubr.msk.bf16.gmra.mrb[36].mxu1 %vm3252_vm15, %v4462_v33  ;;  %v4334_v27 = vcombine.low %v7735_v23, %v7734_v12  ;;  %v4819_v23 = vld [vmem:[%s5027_s28 + $0x8] sm:$0xf] }
 0x1a9   : > { %4667 = vmatprep.mubr.msk.bf16.mxu1 %vm3252_vm15, %v4463_v40 }
 0x1aa   : > { %v1698_v58 = vsel %vm5047_vm13, %v1693_v36, %v1697_v60  ;;  %v2885_v16 = vpop.permute.xlu1 %2884  ;;  %v3189_v26 = vpop.permute.xlu0 %3188 }
 0x1ab   : > { %v4398_v39 = vcombine.low %v1688_v17, %v1698_v58  ;;  %v3360_v42 = vsel %vm3334_vm2, %v3319_v13, %v2885_v16  ;;  %v3488_v7 = vsel %vm3334_vm2, %v3448_v31, %v3189_v26 }
 0x1ac   : > { %3806 = vmatprep.mubr.bf16.mxu0 %v3488_v7 }
 0x1ad   : > { %3807 = vmatmul.mubr.bf16.gmra.mrb[32].mxu0 %v3360_v42 }
 0x1ae   : > { %v2711_v28 = vpop.permute.xlu1 %2710  ;;  %v3015_v38 = vpop.permute.xlu0 %3014 }
 0x1af   : > { %v3282_v22 = vsel %vm3252_vm15, %v4332_v62, %v2711_v28  ;;  %v3412_v3 = vsel %vm3252_vm15, %v4396_v24, %v3015_v38 }
 0x1b0   : > { %4668 = vmatmul.mubr.msk.bf16.gmra.mrb[40].mxu1 %vm3252_vm15, %v4464_v37 }
 0x1b1   : > { %4671 = vmatprep.mubr.msk.bf16.mxu1 %vm3252_vm15, %v4465_v47 }
 0x1b2   : > { %v2791_v40 = vpop.permute.xlu1 %2790 }
 0x1b3   : > { %v3111_v54 = vpop.permute.xlu0 %3110  ;;  %v3321_v37 = vsel %vm3301_vm1, %v3282_v22, %v2791_v40 }
 0x1b4   : > { %v3450_v48 = vsel %vm3301_vm1, %v3412_v3, %v3111_v54 }
 0x1b6   : > { %v2887_v32 = vpop.permute.xlu1 %2886 }
 0x1b7   : > { %v3363_v57 = vsel %vm3334_vm2, %v3321_v37, %v2887_v32 }
 0x1b8   : > { %4672 = vmatmul.mubr.msk.bf16.gmra.mrb[44].mxu1 %vm3252_vm15, %v4466_v59  ;;  %v4818_v59 = vld [vmem:[#allocation2 + $0x7c] sm:$0xf] }
 0x1b9   : > { %v4333_v35 = vcombine.low %v4817_v30, %v4818_v59 }
 0x1bb   : > { %v2713_v15 = vpop.permute.xlu1 %2712 }
 0x1bc   : > { %v3285_v6 = vsel %vm3252_vm15, %v4333_v35, %v2713_v15 }
 0x1bf   : > { %v2793_v8 = vpop.permute.xlu1 %2792 }
 0x1c0   : > { %v3191_v47 = vpop.permute.xlu0 %3190  ;;  %v3323_v51 = vsel %vm3301_vm1, %v3285_v6, %v2793_v8 }
 0x1c1   : > { %v3491_v63 = vsel %vm3334_vm2, %v3450_v48, %v3191_v47 }
 0x1c2   : > { %3814 = vmatprep.mubr.bf16.mxu0 %v3491_v63 }
 0x1c3   : > { %3815 = vmatmul.mubr.bf16.gmra.mrb[36].mxu0 %v3363_v57  ;;  %v2889_v0 = vpop.permute.xlu1 %2888 }
 0x1c4   : > { %v3017_v61 = vpop.permute.xlu0 %3016  ;;  %v3366_v10 = vsel %vm3334_vm2, %v3323_v51, %v2889_v0 }
 0x1c5   : > { %v3415_v50 = vsel %vm3252_vm15, %v4397_v41, %v3017_v61 }
 0x1c9   : > { %v3113_v19 = vpop.permute.xlu0 %3112 }
 0x1ca   : > { %v3452_v24 = vsel %vm3301_vm1, %v3415_v50, %v3113_v19 }
 0x1cd   : > { %v3193_v49 = vpop.permute.xlu0 %3192 }
 0x1ce   : > { %v3494_v34 = vsel %vm3334_vm2, %v3452_v24, %v3193_v49 }
 0x1cf   : > { %3822 = vmatprep.mubr.bf16.mxu0 %v3494_v34 }
 0x1d0   : > { %3823 = vmatmul.mubr.bf16.gmra.mrb[40].mxu0 %v3366_v10 }
 0x1d1   : > { %v3019_v25 = vpop.permute.xlu0 %3018 }
 0x1d2   : > { %v2715_v44 = vpop.permute.xlu1 %2714  ;;  %v3418_v4 = vsel %vm3252_vm15, %v4398_v39, %v3019_v25 }
 0x1d3   : > { %v3288_v56 = vsel %vm3252_vm15, %v4334_v27, %v2715_v44  ;;  %v7248_v44 = vld [vmem:[%s7479_s2] ss:$0 sm:$0xff]  ;;  %v4066_v27 = vunpack.c.l.bf16 %v4819_v23 }
 0x1d5   : > { %v3115_v55 = vpop.permute.xlu0 %3114 }
 0x1d6   : > { %v2795_v14 = vpop.permute.xlu1 %2794  ;;  %v3454_v2 = vsel %vm3301_vm1, %v3418_v4, %v3115_v55 }
 0x1d7   : > { %v3325_v29 = vsel %vm3301_vm1, %v3288_v56, %v2795_v14  ;;  %v4820_v56 = vld [vmem:[%s5027_s28] sm:$0xf] }
 0x1da   : > { %v3195_v60 = vpop.permute.xlu0 %3194  ;;  %v2891_v41 = vpop.permute.xlu1 %2890 }
 0x1db   : > { %v3497_v1 = vsel %vm3334_vm2, %v3454_v2, %v3195_v60  ;;  %v3369_v53 = vsel %vm3334_vm2, %v3325_v29, %v2891_v41  ;;  %v4064_v2 = vunpack.c.l.bf16 %v4820_v56 }
 0x1dc   : > { %3830 = vmatprep.mubr.bf16.mxu0 %v3497_v1  ;;  %v4821_v1 = vld [vmem:[%s5027_s28 + $0xc] sm:$0xf] }
 0x1dd   : > { %3831 = vmatmul.mubr.bf16.gmra.mrb[44].mxu0 %v3369_v53  ;;  %v4067_v53 = vunpack.c.l.bf16 %v4821_v1 }
 0x1e0   : > { %v4525_v17 = vpop.f32.mrb[0].mxu0 }
 0x1e1   : > { %v4526_v36 = vpop.f32.mrb[1].mxu0 }
 0x1e2   : > { %v4527_v20 = vadd.f32 %v4526_v36, %v4525_v17  ;;  %v4528_v58 = vpop.f32.mrb[2].mxu0 }
 0x1e3   : > { %v4529_v33 = vpop.f32.mrb[3].mxu0  ;;  %v4597_v39 = vpop.f32.mrb[0].mxu1 }
 0x1e4   : > { %v7221_v11 = vadd.f32 %v4529_v33, %v4528_v58  ;;  %v4598_v18 = vpop.f32.mrb[1].mxu1  ;;  %v3745_v41 = vadd.f32 %v4527_v20, %v7248_v44  ;;  %v4822_v33 = vld [vmem:[%s5027_s28 + $0x4] sm:$0xf]  ;;  %v4096_v20 = vsel %vm3252_vm15, %v4064_v2, 0.0 }
 0x1e5   : > { %v7223_v5 = vadd.f32 %v4598_v18, %v4597_v39  ;;  %v4600_v21 = vpop.f32.mrb[2].mxu1  ;;  %v4065_v39 = vunpack.c.l.bf16 %v4822_v33  ;;  %v4098_v18 = vsel %vm3252_vm15, %v4066_v27, 0.0 }
 0x1e6   : > { %v4601_v46 = vpop.f32.mrb[3].mxu1 }
 0x1e7   : > { %v7225_v16 = vadd.f32 %v4601_v46, %v4600_v21 }
 0x1ee   : > { %v4531_v9 = vpop.f32.mrb[4].mxu0 }
 0x1ef   : > { %v4532_v52 = vpop.f32.mrb[5].mxu0 }
 0x1f0   : > { %v4533_v13 = vadd.f32 %v4532_v52, %v4531_v9  ;;  %v4534_v31 = vpop.f32.mrb[6].mxu0  ;;  %v3748_v9 = vadd.f32 %v7221_v11, %v7248_v44 }
 0x1f1   : > { %v4535_v26 = vpop.f32.mrb[7].mxu0 }
 0x1f2   : > { %v4536_v42 = vadd.f32 %v4535_v26, %v4534_v31  ;;  %v3753_v4 = vadd.f32 %v4533_v13, %v7248_v44 }
 0x1f4   : > { %v3756_v58 = vadd.f32 %v4536_v42, %v7248_v44 }
 0x203   : > { %v4603_v7 = vpop.f32.mrb[4].mxu1 }
 0x204   : > { %v4604_v28 = vpop.f32.mrb[5].mxu1 }
 0x205   : > { %v7227_v40 = vadd.f32 %v4604_v28, %v4603_v7  ;;  %v4606_v38 = vpop.f32.mrb[6].mxu1  ;;  %v4099_v28 = vsel %vm3252_vm15, %v4067_v53, 0.0 }
 0x206   : > { %v4607_v32 = vpop.f32.mrb[7].mxu1 }
 0x207   : > { %v7229_v43 = vadd.f32 %v4607_v32, %v4606_v38 }
 0x21a   : > { %v4537_v45 = vpop.f32.mrb[8].mxu0 }
 0x21b   : > { %v4538_v62 = vpop.f32.mrb[9].mxu0 }
 0x21c   : > { %v7231_v54 = vadd.f32 %v4538_v62, %v4537_v45  ;;  %v4540_v15 = vpop.f32.mrb[10].mxu0  ;;  %v4097_v62 = vsel %vm3252_vm15, %v4065_v39, 0.0 }
 0x21d   : > { %v4541_v22 = vpop.f32.mrb[11].mxu0 }
 0x21e   : > { %v7233_v3 = vadd.f32 %v4541_v22, %v4540_v15 }
 0x22f   : > { %v4609_v37 = vpop.f32.mrb[8].mxu1 }
 0x230   : > { %v4610_v48 = vpop.f32.mrb[9].mxu1 }
 0x231   : > { %v7235_v47 = vadd.f32 %v4610_v48, %v4609_v37  ;;  %v4612_v57 = vpop.f32.mrb[10].mxu1  ;;  %v4823_v48 = vld [vmem:[%s5027_s28 + $0x18] sm:$0xf] }
 0x232   : > { %v4613_v63 = vpop.f32.mrb[11].mxu1 }
 0x233   : > { %v7237_v8 = vadd.f32 %v4613_v63, %v4612_v57  ;;  %v4070_v57 = vunpack.c.l.bf16 %v4823_v48 }
 0x23e   : > { %v4543_v61 = vpop.f32.mrb[12].mxu0 }
 0x23f   : > { %v4544_v30 = vpop.f32.mrb[13].mxu0 }
 0x240   : > { %v4545_v59 = vadd.f32 %v4544_v30, %v4543_v61  ;;  %v4546_v35 = vpop.f32.mrb[14].mxu0 }
 0x241   : > { %v4547_v19 = vpop.f32.mrb[15].mxu0 }
 0x242   : > { %v7239_v0 = vadd.f32 %v4547_v19, %v4546_v35  ;;  %v3769_v30 = vadd.f32 %v4545_v59, %v7248_v44  ;;  %v4824_v35 = vld [vmem:[%s5027_s28 + $0x10] sm:$0xf] }
 0x243   : > { %v4068_v19 = vunpack.c.l.bf16 %v4824_v35 }
 0x244   : > { %v3772_v27 = vadd.f32 %v7239_v0, %v7248_v44 }
 0x246   : > { %v4615_v6 = vpop.f32.mrb[12].mxu1 }
 0x247   : > { %v4616_v50 = vpop.f32.mrb[13].mxu1 }
 0x248   : > { %v7241_v51 = vadd.f32 %v4616_v50, %v4615_v6  ;;  %v4618_v24 = vpop.f32.mrb[14].mxu1 }
 0x249   : > { %v4619_v49 = vpop.f32.mrb[15].mxu1 }
 0x24a   : > { %v4549_v10 = vpop.f32.mrb[16].mxu0  ;;  %v7243_v34 = vadd.f32 %v4619_v49, %v4618_v24  ;;  %v3761_v49 = vadd.f32 %v7231_v54, %v7248_v44 }
 0x24b   : > { %v4550_v25 = vpop.f32.mrb[17].mxu0 }
 0x24c   : > { %v7250_v55 = vadd.f32 %v4550_v25, %v4549_v10  ;;  %v4552_v12 = vpop.f32.mrb[18].mxu0  ;;  %v4825_v10 = vld [vmem:[%s5027_s28 + $0x1c] sm:$0xf] }
 0x24d   : > { %v4553_v14 = vpop.f32.mrb[19].mxu0  ;;  %v4071_v25 = vunpack.c.l.bf16 %v4825_v10 }
 0x24e   : > { %v7256_v29 = vadd.f32 %v4553_v14, %v4552_v12  ;;  %v4645_v60 = vpop.f32.mrb[16].mxu1  ;;  %v4826_v14 = vld [vmem:[%s5027_s28 + $0x14] sm:$0xf] }
 0x24f   : > { %v3914_v17 = vadd.f32 %v4645_v60, %v3753_v4  ;;  %v3905_v36 = vpop.f32.mrb[17].mxu1  ;;  %v4069_v59 = vunpack.c.l.bf16 %v4826_v14  ;;  %v4102_v4 = vsel %vm3252_vm15, %v4070_v57, 0.0  ;;  %v3764_v60 = vadd.f32 %v7233_v3, %v7248_v44  ;;  %v4830_v57 = vld [vmem:[%s5027_s28 + $0x24] sm:$0xf] }
 0x250   : > { %v3906_v21 = vadd.f32 %v3905_v36, %v3745_v41  ;;  %v4646_v46 = vpop.f32.mrb[18].mxu1  ;;  %v4100_v41 = vsel %vm3252_vm15, %v4068_v19, 0.0  ;;  %v4103_v0 = vsel %vm3252_vm15, %v4071_v25, 0.0  ;;  %v3780_v19 = vadd.f32 %v7256_v29, %v7248_v44 }
 0x251   : > { %v4034_v52 = vmax.f32 %v3914_v17, 0.0  ;;  %v3917_v13 = vadd.f32 %v4646_v46, %v3756_v58  ;;  %v3908_v31 = vpop.f32.mrb[19].mxu1 }
 0x252   : > { %v4032_v7 = vmax.f32 %v3906_v21, 0.0  ;;  %v3909_v42 = vadd.f32 %v3908_v31, %v3748_v9 }
 0x253   : > { %v4555_v26 = vpop.f32.mrb[20].mxu0  ;;  %v4130_v32 = vadd.f32 %v4098_v18, %v4034_v52  ;;  %v4035_v45 = vmax.f32 %v3917_v13, 0.0  ;;  %v4101_v18 = vsel %vm3252_vm15, %v4069_v59, 0.0  ;;  %v4827_v52 = vld [vmem:[%s5027_s28 + $0x28] sm:$0xf] }
 0x254   : > { %v4556_v38 = vpop.f32.mrb[21].mxu0  ;;  %v4128_v11 = vadd.f32 %v4096_v20, %v4032_v7  ;;  %v4033_v37 = vmax.f32 %v3909_v42, 0.0  ;;  %v4074_v20 = vunpack.c.l.bf16 %v4827_v52  ;;  %v4828_v7 = vld [vmem:[%s5027_s28 + $0x20] sm:$0xf] }
 0x255   : > { %v4557_v15 = vadd.f32 %v4556_v38, %v4555_v26  ;;  %v4558_v22 = vpop.f32.mrb[22].mxu0  ;;  %4162 = vst [vmem:[%s7271_s20 + $0x10] sm:$0xff] %v4130_v32  ;;  %v4131_v61 = vadd.f32 %v4099_v28, %v4035_v45  ;;  %v4072_v28 = vunpack.c.l.bf16 %v4828_v7 }
 0x256   : > { %v4559_v63 = vpop.f32.mrb[23].mxu0  ;;  %4160 = vst [vmem:[%s7271_s20] sm:$0xff] %v4128_v11  ;;  %v4129_v50 = vadd.f32 %v4097_v62, %v4033_v37  ;;  %v4649_v24 = vpop.f32.mrb[20].mxu1  ;;  %v3777_v62 = vadd.f32 %v7250_v55, %v7248_v44 }
 0x257   : > { %v4560_v6 = vadd.f32 %v4559_v63, %v4558_v22  ;;  %4163 = vst [vmem:[%s7271_s20 + $0x18] sm:$0xff] %v4131_v61  ;;  %v3930_v12 = vadd.f32 %v4649_v24, %v3769_v30  ;;  %v3921_v23 = vpop.f32.mrb[21].mxu1  ;;  %v3785_v3 = vadd.f32 %v4557_v15, %v7248_v44  ;;  %v4829_v15 = vld [vmem:[%s5027_s28 + $0x2c] sm:$0xf]  ;;  %v4073_v63 = vunpack.c.l.bf16 %v4830_v57 }
 0x258   : > { %4161 = vst [vmem:[%s7271_s20 + $0x8] sm:$0xff] %v4129_v50  ;;  %v3922_v56 = vadd.f32 %v3921_v23, %v3761_v49  ;;  %v4650_v2 = vpop.f32.mrb[22].mxu1  ;;  %v4075_v22 = vunpack.c.l.bf16 %v4829_v15  ;;  %v4106_v61 = vsel %vm3252_vm15, %v4074_v20, 0.0  ;;  %v4104_v55 = vsel %vm3252_vm15, %v4072_v28, 0.0 }
 0x259   : > { %v4038_v54 = vmax.f32 %v3930_v12, 0.0  ;;  %v3933_v1 = vadd.f32 %v4650_v2, %v3772_v27  ;;  %v3924_v53 = vpop.f32.mrb[23].mxu1  ;;  %v3788_v42 = vadd.f32 %v4560_v6, %v7248_v44  ;;  %v4105_v27 = vsel %vm3252_vm15, %v4073_v63, 0.0 }
 0x25a   : > { %v4036_v17 = vmax.f32 %v3922_v56, 0.0  ;;  %v3925_v36 = vadd.f32 %v3924_v53, %v3764_v60  ;;  %v4107_v10 = vsel %vm3252_vm15, %v4075_v22, 0.0  ;;  %v4831_v56 = vld [vmem:[%s5027_s28 + $0x30] sm:$0xf]  ;;  %v4832_v53 = vld [vmem:[%s5027_s28 + $0x34] sm:$0xf] }
 0x25b   : > { %v4134_v33 = vadd.f32 %v4102_v4, %v4038_v54  ;;  %v4039_v39 = vmax.f32 %v3933_v1, 0.0  ;;  %v4076_v2 = vunpack.c.l.bf16 %v4831_v56 }
 0x25c   : > { %v4132_v46 = vadd.f32 %v4100_v41, %v4036_v17  ;;  %v4037_v9 = vmax.f32 %v3925_v36, 0.0  ;;  %v4077_v17 = vunpack.c.l.bf16 %v4832_v53  ;;  %v3852_v53 = vadd.f32 %v7229_v43, %v7248_v44 }
 0x25d   : > { %4166 = vst [vmem:[%s7271_s20 + $0x30] sm:$0xff] %v4134_v33  ;;  %v4135_v26 = vadd.f32 %v4103_v0, %v4039_v39 }
 0x25e   : > { %4164 = vst [vmem:[%s7271_s20 + $0x20] sm:$0xff] %v4132_v46  ;;  %v4133_v32 = vadd.f32 %v4101_v18, %v4037_v9  ;;  %v4653_v45 = vpop.f32.mrb[24].mxu1  ;;  %v4109_v46 = vsel %vm3252_vm15, %v4077_v17, 0.0  ;;  %v4840_v17 = vld [vmem:[%s5027_s28 + $0x44] sm:$0xf] }
 0x25f   : > { %4167 = vst [vmem:[%s7271_s20 + $0x38] sm:$0xff] %v4135_v26  ;;  %v3946_v37 = vadd.f32 %v4653_v45, %v3785_v3  ;;  %v3937_v48 = vpop.f32.mrb[25].mxu1  ;;  %v4834_v45 = vld [vmem:[%s5027_s28 + $0x3c] sm:$0xf] }
 0x260   : > { %v4561_v58 = vpop.f32.mrb[24].mxu0  ;;  %4165 = vst [vmem:[%s7271_s20 + $0x28] sm:$0xff] %v4133_v32  ;;  %v3938_v30 = vadd.f32 %v3937_v48, %v3777_v62  ;;  %v4654_v35 = vpop.f32.mrb[26].mxu1  ;;  %v4079_v62 = vunpack.c.l.bf16 %v4834_v45 }
 0x261   : > { %v4562_v21 = vpop.f32.mrb[25].mxu0  ;;  %v4042_v6 = vmax.f32 %v3946_v37, 0.0  ;;  %v3949_v50 = vadd.f32 %v4654_v35, %v3788_v42  ;;  %v3940_v24 = vpop.f32.mrb[27].mxu1 }
 0x262   : > { %v4563_v13 = vadd.f32 %v4562_v21, %v4561_v58  ;;  %v4564_v31 = vpop.f32.mrb[26].mxu0  ;;  %v4040_v49 = vmax.f32 %v3938_v30, 0.0  ;;  %v3941_v25 = vadd.f32 %v3940_v24, %v3780_v19  ;;  %v4108_v58 = vsel %vm3252_vm15, %v4076_v2, 0.0 }
 0x263   : > { %v4565_v38 = vpop.f32.mrb[27].mxu0  ;;  %v4138_v12 = vadd.f32 %v4106_v61, %v4042_v6  ;;  %v4043_v23 = vmax.f32 %v3949_v50, 0.0  ;;  %v4111_v30 = vsel %vm3252_vm15, %v4079_v62, 0.0  ;;  %v3841_v2 = vadd.f32 %v7223_v5, %v7248_v44 }
 0x264   : > { %v4566_v11 = vadd.f32 %v4565_v38, %v4564_v31  ;;  %v4136_v14 = vadd.f32 %v4104_v55, %v4040_v49  ;;  %v4041_v29 = vmax.f32 %v3941_v25, 0.0  ;;  %v3793_v59 = vadd.f32 %v4563_v13, %v7248_v44  ;;  %v4833_v31 = vld [vmem:[%s5027_s28 + $0x38] sm:$0xf] }
 0x265   : > { %4170 = vst [vmem:[%s7271_s20 + $0x50] sm:$0xff] %v4138_v12  ;;  %v4139_v4 = vadd.f32 %v4107_v10, %v4043_v23  ;;  %v4078_v26 = vunpack.c.l.bf16 %v4833_v31  ;;  %v4835_v10 = vld [vmem:[%s5027_s28 + $0x68] sm:$0xf]  ;;  %v4836_v12 = vld [vmem:[%s5027_s28 + $0x60] sm:$0xf] }
 0x266   : > { %4168 = vst [vmem:[%s7271_s20 + $0x40] sm:$0xff] %v4136_v14  ;;  %v4137_v60 = vadd.f32 %v4105_v27, %v4041_v29  ;;  %v4657_v54 = vpop.f32.mrb[28].mxu1  ;;  %v3796_v41 = vadd.f32 %v4566_v11, %v7248_v44  ;;  %v4090_v25 = vunpack.c.l.bf16 %v4835_v10  ;;  %v4088_v23 = vunpack.c.l.bf16 %v4836_v12  ;;  %v4837_v14 = vld [vmem:[%s5027_s28 + $0x6c] sm:$0xf] }
 0x267   : > { %4171 = vst [vmem:[%s7271_s20 + $0x58] sm:$0xff] %v4139_v4  ;;  %v3953_v1 = vpop.f32.mrb[29].mxu1  ;;  %v4110_v37 = vsel %vm3252_vm15, %v4078_v26, 0.0  ;;  %v3849_v27 = vadd.f32 %v7227_v40, %v7248_v44  ;;  %v4091_v29 = vunpack.c.l.bf16 %v4837_v14 }
 0x268   : > { %4169 = vst [vmem:[%s7271_s20 + $0x48] sm:$0xff] %v4137_v60  ;;  %v3954_v0 = vadd.f32 %v3953_v1, %v3793_v59  ;;  %v4658_v36 = vpop.f32.mrb[30].mxu1  ;;  %v4838_v59 = vld [vmem:[%s5027_s28 + $0x64] sm:$0xf]  ;;  %v4839_v60 = vld [vmem:[%s5027_s28 + $0x40] sm:$0xf] }
 0x269   : > { %v3956_v33 = vpop.f32.mrb[31].mxu1  ;;  %v4089_v4 = vunpack.c.l.bf16 %v4838_v59  ;;  %v3868_v59 = vadd.f32 %v7243_v34, %v7248_v44 }
 0x26a   : > { %v4044_v18 = vmax.f32 %v3954_v0, 0.0  ;;  %v3957_v3 = vadd.f32 %v3956_v33, %v3796_v41  ;;  %v4081_v0 = vunpack.c.l.bf16 %v4840_v17 }
 0x26b   : > { %v4121_v43 = vsel %vm3252_vm15, %v4089_v4, 0.0  ;;  %v4844_v4 = vld [vmem:[%s5027_s28 + $0x74] sm:$0xf] }
 0x26c   : > { %v4140_v20 = vadd.f32 %v4108_v58, %v4044_v18  ;;  %v4045_v13 = vmax.f32 %v3957_v3, 0.0  ;;  %v4120_v58 = vsel %vm3252_vm15, %v4088_v23, 0.0 }
 0x26e   : > { %4172 = vst [vmem:[%s7271_s20 + $0x60] sm:$0xff] %v4140_v20  ;;  %v4141_v38 = vadd.f32 %v4109_v46, %v4045_v13  ;;  %v7322_v32 = vpop.f32.mrb[32].mxu1 }
 0x26f   : > { %v7325_v22 = vpop.f32.mrb[33].mxu1 }
 0x270   : > { %4173 = vst [vmem:[%s7271_s20 + $0x68] sm:$0xff] %v4141_v38  ;;  %v7330_v48 = vpop.f32.mrb[34].mxu1  ;;  %v4841_v38 = vld [vmem:[%s5027_s28 + $0x78] sm:$0xf] }
 0x271   : > { %v7332_v61 = vpop.f32.mrb[35].mxu1  ;;  %v4094_v45 = vunpack.c.l.bf16 %v4841_v38 }
 0x273   : > { %v4567_v39 = vpop.f32.mrb[28].mxu0 }
 0x274   : > { %v4568_v21 = vpop.f32.mrb[29].mxu0 }
 0x275   : > { %v4569_v9 = vadd.f32 %v4568_v21, %v4567_v39  ;;  %v4570_v52 = vpop.f32.mrb[30].mxu0  ;;  %v3844_v39 = vadd.f32 %v7225_v16, %v7248_v44  ;;  %v4123_v21 = vsel %vm3252_vm15, %v4091_v29, 0.0 }
 0x276   : > { %v4571_v7 = vpop.f32.mrb[31].mxu0 }
 0x277   : > { %v3801_v28 = vadd.f32 %v4569_v9, %v7248_v44  ;;  %v4572_v42 = vadd.f32 %v4571_v7, %v4570_v52 }
 0x279   : > { %v3962_v15 = vadd.f32 %v4657_v54, %v3801_v28  ;;  %v3804_v11 = vadd.f32 %v4572_v42, %v7248_v44  ;;  %v4080_v54 = vunpack.c.l.bf16 %v4839_v60  ;;  %v4113_v42 = vsel %vm3252_vm15, %v4081_v0, 0.0 }
 0x27b   : > { %v4046_v57 = vmax.f32 %v3962_v15, 0.0  ;;  %v3965_v63 = vadd.f32 %v4658_v36, %v3804_v11  ;;  %v7336_v55 = vpop.f32.mrb[36].mxu1  ;;  %v4122_v36 = vsel %vm3252_vm15, %v4090_v25, 0.0  ;;  %v4112_v31 = vsel %vm3252_vm15, %v4080_v54, 0.0 }
 0x27c   : > { %v7339_v50 = vpop.f32.mrb[37].mxu1 }
 0x27d   : > { %v4142_v35 = vadd.f32 %v4110_v37, %v4046_v57  ;;  %v4047_v19 = vmax.f32 %v3965_v63, 0.0  ;;  %v7341_v24 = vpop.f32.mrb[38].mxu1  ;;  %v3865_v63 = vadd.f32 %v7241_v51, %v7248_v44  ;;  %v4126_v51 = vsel %vm3252_vm15, %v4094_v45, 0.0 }
 0x27e   : > { %v7343_v49 = vpop.f32.mrb[39].mxu1 }
 0x27f   : > { %4174 = vst [vmem:[%s7271_s20 + $0x70] sm:$0xff] %v4142_v35  ;;  %v4143_v6 = vadd.f32 %v4111_v30, %v4047_v19  ;;  %v4842_v30 = vld [vmem:[%s5027_s28 + $0x70] sm:$0xf]  ;;  %v4843_v19 = vld [vmem:[%s5027_s28 + $0x7c] sm:$0xf] }
 0x280   : > { %v4573_v18 = vpop.f32.mrb[32].mxu0  ;;  %v4092_v35 = vunpack.c.l.bf16 %v4842_v30 }
 0x281   : > { %4175 = vst [vmem:[%s7271_s20 + $0x78] sm:$0xff] %v4143_v6  ;;  %v4574_v9 = vpop.f32.mrb[33].mxu0  ;;  %v4095_v6 = vunpack.c.l.bf16 %v4843_v19 }
 0x282   : > { %v4575_v13 = vadd.f32 %v4574_v9, %v4573_v18  ;;  %v4576_v26 = vpop.f32.mrb[34].mxu0 }
 0x283   : > { %v4669_v56 = vpop.f32.mrb[40].mxu1  ;;  %v4577_v28 = vpop.f32.mrb[35].mxu0  ;;  %v4127_v34 = vsel %vm3252_vm15, %v4095_v6, 0.0 }
 0x284   : > { %v4010_v41 = vadd.f32 %v4669_v56, %v3849_v27  ;;  %v4001_v1 = vpop.f32.mrb[41].mxu1  ;;  %v3809_v11 = vadd.f32 %v4575_v13, %v7248_v44  ;;  %v4578_v37 = vadd.f32 %v4577_v28, %v4576_v26  ;;  %v3857_v27 = vadd.f32 %v7235_v47, %v7248_v44 }
 0x285   : > { %v4002_v40 = vadd.f32 %v4001_v1, %v3841_v2  ;;  %v4670_v33 = vpop.f32.mrb[42].mxu1  ;;  %v4093_v56 = vunpack.c.l.bf16 %v4844_v4  ;;  %v3860_v47 = vadd.f32 %v7237_v8, %v7248_v44  ;;  %v4124_v1 = vsel %vm3252_vm15, %v4092_v35, 0.0 }
 0x286   : > { %v4058_v5 = vmax.f32 %v4010_v41, 0.0  ;;  %v4013_v3 = vadd.f32 %v4670_v33, %v3852_v53  ;;  %v4004_v46 = vpop.f32.mrb[43].mxu1  ;;  %v3970_v25 = vadd.f32 %v7325_v22, %v3809_v11  ;;  %v3812_v12 = vadd.f32 %v4578_v37, %v7248_v44 }
 0x287   : > { %v4056_v52 = vmax.f32 %v4002_v40, 0.0  ;;  %v4005_v20 = vadd.f32 %v4004_v46, %v3844_v39  ;;  %v4125_v8 = vsel %vm3252_vm15, %v4093_v56, 0.0 }
 0x288   : > { %v4154_v16 = vadd.f32 %v4122_v36, %v4058_v5  ;;  %v4059_v7 = vmax.f32 %v4013_v3, 0.0  ;;  %v4048_v2 = vmax.f32 %v3970_v25, 0.0  ;;  %v3973_v22 = vadd.f32 %v7332_v61, %v3812_v12 }
 0x289   : > { %v4152_v62 = vadd.f32 %v4120_v58, %v4056_v52  ;;  %v4057_v15 = vmax.f32 %v4005_v20, 0.0  ;;  %v4845_v20 = vld [vmem:[%s5027_s28 + $0x48] sm:$0xf] }
 0x28a   : > { %4186 = vst [vmem:[%s7271_s20 + $0xd0] sm:$0xff] %v4154_v16  ;;  %v4155_v57 = vadd.f32 %v4123_v21, %v4059_v7  ;;  %v4144_v0 = vadd.f32 %v4112_v31, %v4048_v2  ;;  %v4049_v36 = vmax.f32 %v3973_v22, 0.0  ;;  %v4082_v13 = vunpack.c.l.bf16 %v4845_v20  ;;  %v4846_v7 = vld [vmem:[%s5027_s28 + $0x4c] sm:$0xf] }
 0x28b   : > { %4184 = vst [vmem:[%s7271_s20 + $0xc0] sm:$0xff] %v4152_v62  ;;  %v4153_v10 = vadd.f32 %v4121_v43, %v4057_v15  ;;  %v4673_v23 = vpop.f32.mrb[44].mxu1  ;;  %v4083_v28 = vunpack.c.l.bf16 %v4846_v7 }
 0x28c   : > { %4187 = vst [vmem:[%s7271_s20 + $0xd8] sm:$0xff] %v4155_v57  ;;  %v4026_v14 = vadd.f32 %v4673_v23, %v3865_v63  ;;  %v4017_v29 = vpop.f32.mrb[45].mxu1  ;;  %4176 = vst [vmem:[%s7271_s20 + $0x80] sm:$0xff] %v4144_v0  ;;  %v4145_v39 = vadd.f32 %v4113_v42, %v4049_v36  ;;  %v4114_v45 = vsel %vm3252_vm15, %v4082_v13, 0.0  ;;  %v4848_v23 = vld [vmem:[%s5027_s28 + $0x54] sm:$0xf] }
 0x28d   : > { %4185 = vst [vmem:[%s7271_s20 + $0xc8] sm:$0xff] %v4153_v10  ;;  %v4018_v60 = vadd.f32 %v4017_v29, %v3857_v27  ;;  %v4674_v54 = vpop.f32.mrb[46].mxu1  ;;  %v4115_v11 = vsel %vm3252_vm15, %v4083_v28, 0.0  ;;  %v4085_v27 = vunpack.c.l.bf16 %v4848_v23  ;;  %v4850_v0 = vld [vmem:[%s5027_s28 + $0x5c] sm:$0xf] }
 0x28e   : > { %v4062_v41 = vmax.f32 %v4026_v14, 0.0  ;;  %v4029_v53 = vadd.f32 %v4674_v54, %v3868_v59  ;;  %v4020_v17 = vpop.f32.mrb[47].mxu1  ;;  %4177 = vst [vmem:[%s7271_s20 + $0x88] sm:$0xff] %v4145_v39  ;;  %v4087_v36 = vunpack.c.l.bf16 %v4850_v0 }
 0x28f   : > { %v4060_v61 = vmax.f32 %v4018_v60, 0.0  ;;  %v4021_v40 = vadd.f32 %v4020_v17, %v3860_v47  ;;  %v4117_v56 = vsel %vm3252_vm15, %v4085_v27, 0.0 }
 0x290   : > { %v4158_v58 = vadd.f32 %v4126_v51, %v4062_v41  ;;  %v4063_v33 = vmax.f32 %v4029_v53, 0.0  ;;  %v4119_v39 = vsel %vm3252_vm15, %v4087_v36, 0.0 }
 0x291   : > { %v4156_v18 = vadd.f32 %v4124_v1, %v4060_v61  ;;  %v4061_v5 = vmax.f32 %v4021_v40, 0.0  ;;  %v4849_v1 = vld [vmem:[%s5027_s28 + $0x58] sm:$0xf] }
 0x292   : > { %4190 = vst [vmem:[%s7271_s20 + $0xf0] sm:$0xff] %v4158_v58  ;;  %v4159_v3 = vadd.f32 %v4127_v34, %v4063_v33  ;;  %v4086_v53 = vunpack.c.l.bf16 %v4849_v1 }
 0x293   : > { %4188 = vst [vmem:[%s7271_s20 + $0xe0] sm:$0xff] %v4156_v18  ;;  %v4157_v21 = vadd.f32 %v4125_v8, %v4061_v5 }
 0x294   : > { %4191 = vst [vmem:[%s7271_s20 + $0xf8] sm:$0xff] %v4159_v3  ;;  %v4118_v58 = vsel %vm3252_vm15, %v4086_v53, 0.0 }
 0x295   : > { %4189 = vst [vmem:[%s7271_s20 + $0xe8] sm:$0xff] %v4157_v21 }
 0x296   : > { %v4579_v46 = vpop.f32.mrb[36].mxu0 }
 0x297   : > { %v4580_v43 = vpop.f32.mrb[37].mxu0 }
 0x298   : > { %v4581_v9 = vadd.f32 %v4580_v43, %v4579_v46  ;;  %v4582_v52 = vpop.f32.mrb[38].mxu0 }
 0x299   : > { %v4583_v31 = vpop.f32.mrb[39].mxu0 }
 0x29a   : > { %v3817_v26 = vadd.f32 %v4581_v9, %v7248_v44  ;;  %v4584_v16 = vadd.f32 %v4583_v31, %v4582_v52 }
 0x29c   : > { %v3978_v42 = vadd.f32 %v7322_v32, %v3817_v26  ;;  %v3820_v38 = vadd.f32 %v4584_v16, %v7248_v44  ;;  %v4847_v32 = vld [vmem:[%s5027_s28 + $0x50] sm:$0xf] }
 0x29d   : > { %v4084_v10 = vunpack.c.l.bf16 %v4847_v32 }
 0x29e   : > { %v4050_v62 = vmax.f32 %v3978_v42, 0.0  ;;  %v3981_v15 = vadd.f32 %v7330_v48, %v3820_v38 }
 0x29f   : > { %v4116_v29 = vsel %vm3252_vm15, %v4084_v10, 0.0 }
 0x2a0   : > { %v4146_v37 = vadd.f32 %v4114_v45, %v4050_v62  ;;  %v4051_v57 = vmax.f32 %v3981_v15, 0.0 }
 0x2a2   : > { %4178 = vst [vmem:[%s7271_s20 + $0x90] sm:$0xff] %v4146_v37  ;;  %v4147_v63 = vadd.f32 %v4115_v11, %v4051_v57 }
 0x2a3   : > { %v4585_v30 = vpop.f32.mrb[40].mxu0 }
 0x2a4   : > { %v4586_v35 = vpop.f32.mrb[41].mxu0  ;;  %4179 = vst [vmem:[%s7271_s20 + $0x98] sm:$0xff] %v4147_v63 }
 0x2a5   : > { %v4587_v19 = vadd.f32 %v4586_v35, %v4585_v30  ;;  %v4588_v6 = vpop.f32.mrb[42].mxu0 }
 0x2a6   : > { %v4589_v25 = vpop.f32.mrb[43].mxu0 }
 0x2a7   : > { %v3825_v12 = vadd.f32 %v4587_v19, %v7248_v44  ;;  %v4590_v48 = vadd.f32 %v4589_v25, %v4588_v6 }
 0x2a9   : > { %v3986_v14 = vadd.f32 %v7339_v50, %v3825_v12  ;;  %v3828_v51 = vadd.f32 %v4590_v48, %v7248_v44 }
 0x2ab   : > { %v4052_v59 = vmax.f32 %v3986_v14, 0.0  ;;  %v3989_v4 = vadd.f32 %v7343_v49, %v3828_v51 }
 0x2ad   : > { %v4148_v2 = vadd.f32 %v4116_v29, %v4052_v59  ;;  %v4053_v22 = vmax.f32 %v3989_v4, 0.0 }
 0x2af   : > { %4180 = vst [vmem:[%s7271_s20 + $0xa0] sm:$0xff] %v4148_v2  ;;  %v4149_v60 = vadd.f32 %v4117_v56, %v4053_v22 }
 0x2b0   : > { %v4591_v54 = vpop.f32.mrb[44].mxu0 }
 0x2b1   : > { %4181 = vst [vmem:[%s7271_s20 + $0xa8] sm:$0xff] %v4149_v60  ;;  %v4592_v47 = vpop.f32.mrb[45].mxu0 }
 0x2b2   : > { %v4593_v50 = vadd.f32 %v4592_v47, %v4591_v54  ;;  %v4594_v41 = vpop.f32.mrb[46].mxu0 }
 0x2b3   : > { %v4595_v34 = vpop.f32.mrb[47].mxu0 }
 0x2b4   : > { %v3833_v17 = vadd.f32 %v4593_v50, %v7248_v44  ;;  %v4596_v49 = vadd.f32 %v4595_v34, %v4594_v41 }
 0x2b6   : > { %v3994_v61 = vadd.f32 %v7336_v55, %v3833_v17  ;;  %v3836_v40 = vadd.f32 %v4596_v49, %v7248_v44 }
 0x2b8   : > { %v4054_v33 = vmax.f32 %v3994_v61, 0.0  ;;  %v3997_v8 = vadd.f32 %v7341_v24, %v3836_v40 }
 0x2ba   : > { %v4150_v18 = vadd.f32 %v4118_v58, %v4054_v33  ;;  %v4055_v5 = vmax.f32 %v3997_v8, 0.0 }
 0x2bc   : > { %4182 = vst [vmem:[%s7271_s20 + $0xb0] sm:$0xff] %v4150_v18  ;;  %v4151_v44 = vadd.f32 %v4119_v39, %v4055_v5 }
 0x2be   : > { %4183 = vst [vmem:[%s7271_s20 + $0xb8] sm:$0xff] %v4151_v44 }
 0x2bf   : > { %4864 = shalt.err (!%p4861_p3)
}
 0x2c0   : > { %s4865_s9 = scalar_lea.hbm %s7428_s27, 4096  ;;  %s4869_s17 = scalar_lea.hbm %s7480_s3, 8192 }
 0x2c1   : > { %p4866_p4 = scmp.ne.s32.totalorder %s7428_s27, %s4865_s9  ;;  %p4870_p9 = scmp.lt.u32.totalorder %s7428_s27, %s7480_s3 }
 0x2c2   : > { %p4871_p10 = scmp.lt.u32.totalorder %s4869_s17, %s4865_s9  ;;  %p4873_p12 = scmp.lt.u32.totalorder %s4865_s9, %s7428_s27 }
 0x2c3   : > { %p4867_p7 = pnand %p4866_p4, %p4980_p5 }
 0x2c4   : > { %p4872_p11 = por %p4871_p10, %p4870_p9 }
 0x2c5   : > { %p4868_p8 = pneg %p4867_p7 }
 0x2c6   : > { %p4874_p13 = por %p4873_p12, %p4872_p11 }
 0x2c8   : > { %p4875_p0 = pnand %p4874_p13, %p4868_p8 }
 0x2ca   : > { %4878 = shalt.err (!%p4875_p0)
}
 0x2cb   : > { %s4920_s4 = smov 128   ;;  %s4921_s19 = smov 8  }
 0x2cc   : > { %4691 = dma.vmem_to_hbm [thread:$0]  (%p4980_p5), %s7430_s25, 4096, %s7428_s27, %s7436_s16, %s4920_s4, %s4920_s4, %s4921_s19  }
 0x2cd PF: > { %p4697_p1 = scmp.ge.s32.totalorder %s4913_s15, 2  ;;  %s4221_s20 = sand.u32 1, %s4901_s12  }
 0x2ce   : > { %s4222_s24 = scalar_lea.sflag [#allocation4], %s4221_s20 }
 0x2cf   : > { %p4694_p2 = pnand %p4697_p1, %p4984_p6 }
 0x2d1   : > { %4896 = dma.done.wait (!%p4694_p2), %s4222_s24, 4096  }
 0x2d2   : > { %4898 = vsyncadd (!%p4694_p2), %s4222_s24, 4294963200  ;;  %p13_p3 = scmp.ge.s32.totalorder %s4967_s18, 4   ;;  %s7736_s12 = smov %s4905_s13 }
 0x2d3   : > { %s7737_s13 = smov %s4909_s14  ;;  %s7738_s14 = smov %s4978_s21 }
 0x2d4   : > { %s7739_s15 = smov %s4967_s18  ;;  %15 = sbr.rel (!%p13_p3) target bundleno = 3 (0x3), region = 70 }
 0x2db   :  { %4227 = vsyncpa [#allocation4], 1 }
 0x2dc   :  { %4229 = vsyncpa [#allocation4 + $0x1], 1 }

</bundles_post_ra>
